<compile_context>
chip_gen: v7x
topology: tpu7x:2x2x1
jax: 0.10.0
libtpu: 0.0.40
codegen_flags: <defaults>
</compile_context>

<pallas_src>
import math
import functools

import jax
import jax.numpy as jnp
from jax.experimental import pallas as pl
from jax.experimental.pallas import tpu as pltpu


# ----------------------------------------------------------------------------
# In-kernel math helpers
# ----------------------------------------------------------------------------
def _erf(x):
    # Abramowitz & Stegun 7.1.26 polynomial approximation (|err| <= 1.5e-7),
    # built only from ops with guaranteed Mosaic lowerings.
    # TODO(synk): replace with jax.lax.erf once erf_p lowering is guaranteed
    # on all Mosaic versions; torch.nn.GELU() uses exact erf.
    a1, a2, a3, a4, a5 = (0.254829592, -0.284496736, 1.421413741,
                          -1.453152027, 1.061405429)
    p = 0.3275911
    ax = jnp.abs(x)
    t = 1.0 / (1.0 + p * ax)
    poly = ((((a5 * t + a4) * t + a3) * t + a2) * t + a1) * t
    y = 1.0 - poly * jnp.exp(-ax * ax)
    return jnp.where(x >= 0, y, -y)


def _gelu_exact(x):
    # matches torch.nn.GELU(): 0.5 * x * (1 + erf(x / sqrt(2)))
    return 0.5 * x * (1.0 + _erf(x * (1.0 / math.sqrt(2.0))))


def _layernorm(x, gamma, beta, eps=1e-5):
    mu = jnp.mean(x, axis=-1, keepdims=True)
    var = jnp.mean(jnp.square(x - mu), axis=-1, keepdims=True)
    return (x - mu) * jax.lax.rsqrt(var + eps) * gamma + beta


def _roll_seq(y3, k):
    # circular roll by -k (k > 0, static) along the sequence axis (axis=1) of
    # a (B, S, E) value; identical to torch.roll(y, shifts=-k, dims=1).
    return jnp.concatenate([y3[:, k:, :], y3[:, :k, :]], axis=1)


# ----------------------------------------------------------------------------
# Fused Pallas kernel: embedding -> L ChordMixer blocks -> linear decoder
# ----------------------------------------------------------------------------
def fused_chordmixer_kernel(x_ref, emb_w_ref, emb_b_ref, w1_ref, w2_ref,
                            vecs_ref, dec_w_ref, dec_b_ref, o_ref,
                            *, B, S, E, H, T, L):
    BS = B * S

    # --- embedding (nn.Linear input_size -> E), batch folded into M rows ---
    x = x_ref[...].astype(jnp.float32)                      # (BS, In)
    h = jnp.dot(x, emb_w_ref[...],
                preferred_element_type=jnp.float32) + emb_b_ref[...]   # (BS, E)

    # --- hoisted lane masks for RotateChord (track i occupies lanes
    #     [i*T, (i+1)*T); built against the real E=40, never padded lanes) ---
    lane = jax.lax.broadcasted_iota(jnp.int32, (BS, E), 1)
    n_tracks = E // T
    track_masks = [(lane >= i * T) & (lane < (i + 1) * T)
                   for i in range(1, n_tracks)]

    # --- encoder: statically-unrolled loop over L ChordMixer blocks ---
    for l in range(L):
        v = vecs_ref[l]                                     # (8, 128) packed
        ln1_g = v[0:1, :E]
        ln1_b = v[1:2, :E]
        b1 = v[2:3, :H]
        b2 = v[3:4, :E]
        ln2_g = v[4:5, :E]
        ln2_b = v[5:6, :E]

        res = h
        hn = _layernorm(h, ln1_g, ln1_b)

        # Mlp: fc1 -> GELU -> fc2 (dropout = identity at inference)
        a = _gelu_exact(jnp.dot(hn, w1_ref[l],
                                preferred_element_type=jnp.float32) + b1)
        y = jnp.dot(a, w2_ref[l],
                    preferred_element_type=jnp.float32) + b2          # (BS, E)

        # RotateChord: track 0 unchanged, track i rolled by -2**(i-1) along S.
        # Full-width sequence rolls + lane-mask selects (no 8-lane slices,
        # no lane-axis concatenate).
        y3 = y.reshape(B, S, E)
        rolled = y
        for i in range(1, n_tracks):
            shift = 2 ** (i - 1)
            yr = _roll_seq(y3, shift).reshape(BS, E)
            rolled = jnp.where(track_masks[i - 1], yr, rolled)

        # residual + post-norm
        h = _layernorm(rolled + res, ln2_g, ln2_b)

    # --- decoder: mean over sequence, then linear E -> O ---
    m = jnp.mean(h.reshape(B, S, E), axis=1)                # (B, E)
    out = jnp.dot(m, dec_w_ref[...],
                  preferred_element_type=jnp.float32) + dec_b_ref[...]
    o_ref[...] = out.astype(o_ref.dtype)


def chordmixer_forward(params, x):
    B, S, In = x.shape
    E = params["E"]
    H = params["H"]
    L = params["L"]
    T = params["track_size"]
    O = params["dec_w"].shape[1]

    x2 = x.reshape(B * S, In)    # fold batch into the matmul M dimension

    kernel = functools.partial(fused_chordmixer_kernel,
                               B=B, S=S, E=E, H=H, T=T, L=L)
    return pl.pallas_call(
        kernel,
        out_shape=jax.ShapeDtypeStruct((B, O), x.dtype),
        grid=(1,),
        in_specs=[
            pl.BlockSpec((B * S, In), lambda i: (0, 0)),      # x (folded)
            pl.BlockSpec((In, E), lambda i: (0, 0)),          # embedding weight
            pl.BlockSpec((1, E), lambda i: (0, 0)),           # embedding bias
            pl.BlockSpec((L, E, H), lambda i: (0, 0, 0)),     # stacked fc1 W
            pl.BlockSpec((L, H, E), lambda i: (0, 0, 0)),     # stacked fc2 W
            pl.BlockSpec((L, 8, 128), lambda i: (0, 0, 0)),   # packed vectors
            pl.BlockSpec((E, O), lambda i: (0, 0)),           # decoder weight
            pl.BlockSpec((1, O), lambda i: (0, 0)),           # decoder bias
        ],
        out_specs=pl.BlockSpec((B, O), lambda i: (0, 0)),
        compiler_params=pltpu.CompilerParams(
            dimension_semantics=("arbitrary",)),
    )(x2, params["emb_w"], params["emb_b"], params["w1"], params["w2"],
      params["vecs"], params["dec_w"], params["dec_b"])


# ----------------------------------------------------------------------------
# Deterministic parameter init (matches ChordMixer._init_weights)
# ----------------------------------------------------------------------------
def _xavier_uniform(key, fan_in, fan_out):
    limit = math.sqrt(6.0 / (fan_in + fan_out))
    return jax.random.uniform(key, (fan_in, fan_out), jnp.float32, -limit, limit)


def init_params(key, *, input_size, output_size, max_seq_len, track_size,
                hidden_size):
    L = int(math.ceil(math.log2(max_seq_len)))
    E = (L + 1) * track_size
    H = hidden_size
    keys = jax.random.split(key, 2 + 2 * L)

    emb_w = _xavier_uniform(keys[0], input_size, E)
    dec_w = _xavier_uniform(keys[1], E, output_size)
    w1 = jnp.stack([_xavier_uniform(keys[2 + 2 * l], E, H) for l in range(L)])
    w2 = jnp.stack([_xavier_uniform(keys[3 + 2 * l], H, E) for l in range(L)])

    # Packed per-layer vectors, one (8, 128) slab per layer.
    # rows: 0 ln1 gamma | 1 ln1 beta | 2 fc1 bias | 3 fc2 bias
    #       4 ln2 gamma | 5 ln2 beta | 6,7 unused
    vecs = jnp.zeros((L, 8, 128), jnp.float32)
    vecs = vecs.at[:, 0, :E].set(1.0)   # LayerNorm gammas init to 1
    vecs = vecs.at[:, 4, :E].set(1.0)   # (betas / biases stay 0, per PyTorch init)

    return {
        "track_size": track_size, "E": E, "H": H, "L": L,
        "emb_w": emb_w, "emb_b": jnp.zeros((1, E), jnp.float32),
        "w1": w1, "w2": w2, "vecs": vecs,
        "dec_w": dec_w, "dec_b": jnp.zeros((1, output_size), jnp.float32),
    }


# ----------------------------------------------------------------------------
# Pure-JAX reference (original slice/roll/concat RotateChord formulation)
# ----------------------------------------------------------------------------
def reference_forward(params, x):
    T = params["track_size"]
    E = params["E"]
    H = params["H"]
    L = params["L"]

    h = jnp.einsum("bsi,ie->bse", x, params["emb_w"]) + params["emb_b"]
    for l in range(L):
        v = params["vecs"][l]
        ln1_g, ln1_b = v[0, :E], v[1, :E]
        b1, b2 = v[2, :H], v[3, :E]
        ln2_g, ln2_b = v[4, :E], v[5, :E]

        res = h
        hn = _layernorm(h, ln1_g, ln1_b)
        a = _gelu_exact(hn @ params["w1"][l] + b1)
        y = a @ params["w2"][l] + b2
        tracks = [y[..., :T]]
        for i in range(1, E // T):
            tracks.append(jnp.roll(y[..., i * T:(i + 1) * T],
                                   -(2 ** (i - 1)), axis=1))
        y = jnp.concatenate(tracks, axis=-1)
        h = _layernorm(y + res, ln2_g, ln2_b)
    return jnp.mean(h, axis=1) @ params["dec_w"] + params["dec_b"]


# ----------------------------------------------------------------------------
# TODO(synk): variable-length mode (RotateChordVarLen / LinearDecoderVarLen)
# is data-dependent ragged processing and is not implemented here; this kernel
# covers the fixed-length (var_len=False) configuration.
# ----------------------------------------------------------------------------
if __name__ == "__main__":
    cfg = dict(input_size=10, output_size=5, max_seq_len=16,
               track_size=8, hidden_size=64)
    B = 2

    key = jax.random.PRNGKey(0)
    pkey, xkey = jax.random.split(key)
    params = init_params(pkey, **cfg)
    x = jax.random.normal(xkey, (B, cfg["max_seq_len"], cfg["input_size"]),
                          jnp.float32)

    out = jax.block_until_ready(chordmixer_forward(params, x))
    ref = jax.block_until_ready(reference_forward(params, x))

    assert out.shape == (B, cfg["output_size"]), out.shape
    assert jnp.allclose(out, ref, atol=1e-3, rtol=1e-3), (out, ref)
    print("KERNEL_OK")
</pallas_src>

<mosaic_0001>
module attributes {stable_mosaic.version = 11 : i64} {
  func.func @fused_chordmixer_kernel(%arg0: i32, %arg1: memref<32x10xf32, #tpu.memory_space<vmem>>, %arg2: memref<10x40xf32, #tpu.memory_space<vmem>>, %arg3: memref<1x40xf32, #tpu.memory_space<vmem>>, %arg4: memref<4x40x64xf32, #tpu.memory_space<vmem>>, %arg5: memref<4x64x40xf32, #tpu.memory_space<vmem>>, %arg6: memref<4x8x128xf32, #tpu.memory_space<vmem>>, %arg7: memref<40x5xf32, #tpu.memory_space<vmem>>, %arg8: memref<1x5xf32, #tpu.memory_space<vmem>>, %arg9: memref<2x5xf32, #tpu.memory_space<vmem>>) attributes {dimension_semantics = [#tpu.dimension_semantics<arbitrary>], iteration_bounds = array<i64: 1>, scalar_prefetch = 0 : i64, scratch_operands = 0 : i64, tpu.core_type = #tpu.core_type<tc>, window_params = [{pipeline_mode = #tpu.pipeline_mode<synchronous>, transform_indices = @transform_0, window_bounds = array<i64: 32, 10>}, {pipeline_mode = #tpu.pipeline_mode<synchronous>, transform_indices = @transform_1, window_bounds = array<i64: 10, 40>}, {pipeline_mode = #tpu.pipeline_mode<synchronous>, transform_indices = @transform_2, window_bounds = array<i64: 1, 40>}, {pipeline_mode = #tpu.pipeline_mode<synchronous>, transform_indices = @transform_3, window_bounds = array<i64: 4, 40, 64>}, {pipeline_mode = #tpu.pipeline_mode<synchronous>, transform_indices = @transform_4, window_bounds = array<i64: 4, 64, 40>}, {pipeline_mode = #tpu.pipeline_mode<synchronous>, transform_indices = @transform_5, window_bounds = array<i64: 4, 8, 128>}, {pipeline_mode = #tpu.pipeline_mode<synchronous>, transform_indices = @transform_6, window_bounds = array<i64: 40, 5>}, {pipeline_mode = #tpu.pipeline_mode<synchronous>, transform_indices = @transform_7, window_bounds = array<i64: 1, 5>}, {pipeline_mode = #tpu.pipeline_mode<synchronous>, transform_indices = @transform_8, window_bounds = array<i64: 2, 5>}]} {
    %c0 = arith.constant 0 : index
    %c0_0 = arith.constant 0 : index
    %0 = vector.load %arg1[%c0, %c0_0] : memref<32x10xf32, #tpu.memory_space<vmem>>, vector<32x10xf32>
    %c0_1 = arith.constant 0 : index
    %c0_2 = arith.constant 0 : index
    %1 = vector.load %arg2[%c0_1, %c0_2] : memref<10x40xf32, #tpu.memory_space<vmem>>, vector<10x40xf32>
    %cst = arith.constant dense<0.000000e+00> : vector<32x40xf32>
    %2 = tpu.matmul %0, %1, %cst {dimension_numbers = #tpu.dot_dimension_numbers<[1], [0], [0], [1], [0, 0, 1, 1], [], []>} : vector<32x10xf32>, vector<10x40xf32>, vector<32x40xf32> -> vector<32x40xf32>
    %c0_3 = arith.constant 0 : index
    %c0_4 = arith.constant 0 : index
    %3 = vector.load %arg3[%c0_3, %c0_4] : memref<1x40xf32, #tpu.memory_space<vmem>>, vector<1x40xf32>
    %4 = vector.broadcast %3 : vector<1x40xf32> to vector<32x40xf32>
    %5 = arith.addf %2, %4 : vector<32x40xf32>
    %6 = tpu.iota {dimensions = array<i32: 1>} : vector<32x40xi32>
    %c8_i32 = arith.constant 8 : i32
    %7 = vector.broadcast %c8_i32 : i32 to vector<32x40xi32>
    %8 = arith.cmpi sge, %6, %7 : vector<32x40xi32>
    %c16_i32 = arith.constant 16 : i32
    %9 = vector.broadcast %c16_i32 : i32 to vector<32x40xi32>
    %10 = arith.cmpi slt, %6, %9 : vector<32x40xi32>
    %11 = arith.andi %8, %10 : vector<32x40xi1>
    %c16_i32_5 = arith.constant 16 : i32
    %12 = vector.broadcast %c16_i32_5 : i32 to vector<32x40xi32>
    %13 = arith.cmpi sge, %6, %12 : vector<32x40xi32>
    %c24_i32 = arith.constant 24 : i32
    %14 = vector.broadcast %c24_i32 : i32 to vector<32x40xi32>
    %15 = arith.cmpi slt, %6, %14 : vector<32x40xi32>
    %16 = arith.andi %13, %15 : vector<32x40xi1>
    %c24_i32_6 = arith.constant 24 : i32
    %17 = vector.broadcast %c24_i32_6 : i32 to vector<32x40xi32>
    %18 = arith.cmpi sge, %6, %17 : vector<32x40xi32>
    %c32_i32 = arith.constant 32 : i32
    %19 = vector.broadcast %c32_i32 : i32 to vector<32x40xi32>
    %20 = arith.cmpi slt, %6, %19 : vector<32x40xi32>
    %21 = arith.andi %18, %20 : vector<32x40xi1>
    %c32_i32_7 = arith.constant 32 : i32
    %22 = vector.broadcast %c32_i32_7 : i32 to vector<32x40xi32>
    %23 = arith.cmpi sge, %6, %22 : vector<32x40xi32>
    %c40_i32 = arith.constant 40 : i32
    %24 = vector.broadcast %c40_i32 : i32 to vector<32x40xi32>
    %25 = arith.cmpi slt, %6, %24 : vector<32x40xi32>
    %26 = arith.andi %23, %25 : vector<32x40xi1>
    %c0_8 = arith.constant 0 : index
    %c0_9 = arith.constant 0 : index
    %c0_10 = arith.constant 0 : index
    %27 = vector.load %arg6[%c0_8, %c0_9, %c0_10] : memref<4x8x128xf32, #tpu.memory_space<vmem>>, vector<1x8x128xf32>
    %28 = vector.shape_cast %27 : vector<1x8x128xf32> to vector<8x128xf32>
    %29 = vector.extract_strided_slice %28 {offsets = [0, 0], sizes = [1, 40], strides = [1, 1]} : vector<8x128xf32> to vector<1x40xf32>
    %30 = vector.extract_strided_slice %28 {offsets = [1, 0], sizes = [1, 40], strides = [1, 1]} : vector<8x128xf32> to vector<1x40xf32>
    %31 = vector.extract_strided_slice %28 {offsets = [2, 0], sizes = [1, 64], strides = [1, 1]} : vector<8x128xf32> to vector<1x64xf32>
    %32 = vector.extract_strided_slice %28 {offsets = [3, 0], sizes = [1, 40], strides = [1, 1]} : vector<8x128xf32> to vector<1x40xf32>
    %33 = vector.extract_strided_slice %28 {offsets = [4, 0], sizes = [1, 40], strides = [1, 1]} : vector<8x128xf32> to vector<1x40xf32>
    %34 = vector.extract_strided_slice %28 {offsets = [5, 0], sizes = [1, 40], strides = [1, 1]} : vector<8x128xf32> to vector<1x40xf32>
    %cst_11 = arith.constant dense<0.000000e+00> : vector<32xf32>
    %35 = vector.multi_reduction <add>, %5, %cst_11 [1] : vector<32x40xf32> to vector<32xf32>
    %36 = vector.shape_cast %35 : vector<32xf32> to vector<32x1xf32>
    %cst_12 = arith.constant 4.000000e+01 : f32
    %37 = vector.broadcast %cst_12 : f32 to vector<32x1xf32>
    %38 = arith.divf %36, %37 : vector<32x1xf32>
    %39 = vector.broadcast %38 : vector<32x1xf32> to vector<32x40xf32>
    %40 = arith.subf %5, %39 : vector<32x40xf32>
    %41 = arith.mulf %40, %40 : vector<32x40xf32>
    %cst_13 = arith.constant dense<0.000000e+00> : vector<32xf32>
    %42 = vector.multi_reduction <add>, %41, %cst_13 [1] : vector<32x40xf32> to vector<32xf32>
    %43 = vector.shape_cast %42 : vector<32xf32> to vector<32x1xf32>
    %cst_14 = arith.constant 4.000000e+01 : f32
    %44 = vector.broadcast %cst_14 : f32 to vector<32x1xf32>
    %45 = arith.divf %43, %44 : vector<32x1xf32>
    %46 = vector.broadcast %38 : vector<32x1xf32> to vector<32x40xf32>
    %47 = arith.subf %5, %46 : vector<32x40xf32>
    %cst_15 = arith.constant 9.99999974E-6 : f32
    %48 = vector.broadcast %cst_15 : f32 to vector<32x1xf32>
    %49 = arith.addf %45, %48 : vector<32x1xf32>
    %50 = math.rsqrt %49 : vector<32x1xf32>
    %51 = vector.broadcast %50 : vector<32x1xf32> to vector<32x40xf32>
    %52 = arith.mulf %47, %51 : vector<32x40xf32>
    %53 = vector.broadcast %29 : vector<1x40xf32> to vector<32x40xf32>
    %54 = arith.mulf %52, %53 : vector<32x40xf32>
    %55 = vector.broadcast %30 : vector<1x40xf32> to vector<32x40xf32>
    %56 = arith.addf %54, %55 : vector<32x40xf32>
    %c0_16 = arith.constant 0 : index
    %c0_17 = arith.constant 0 : index
    %c0_18 = arith.constant 0 : index
    %57 = vector.load %arg4[%c0_16, %c0_17, %c0_18] : memref<4x40x64xf32, #tpu.memory_space<vmem>>, vector<1x40x64xf32>
    %58 = vector.shape_cast %57 : vector<1x40x64xf32> to vector<40x64xf32>
    %cst_19 = arith.constant dense<0.000000e+00> : vector<32x64xf32>
    %59 = tpu.matmul %56, %58, %cst_19 {dimension_numbers = #tpu.dot_dimension_numbers<[1], [0], [0], [1], [0, 0, 1, 1], [], []>} : vector<32x40xf32>, vector<40x64xf32>, vector<32x64xf32> -> vector<32x64xf32>
    %60 = vector.broadcast %31 : vector<1x64xf32> to vector<32x64xf32>
    %61 = arith.addf %59, %60 : vector<32x64xf32>
    %cst_20 = arith.constant 5.000000e-01 : f32
    %62 = vector.broadcast %cst_20 : f32 to vector<32x64xf32>
    %63 = arith.mulf %62, %61 : vector<32x64xf32>
    %cst_21 = arith.constant 0.707106769 : f32
    %64 = vector.broadcast %cst_21 : f32 to vector<32x64xf32>
    %65 = arith.mulf %61, %64 : vector<32x64xf32>
    %66 = math.absf %65 : vector<32x64xf32>
    %cst_22 = arith.constant 0.327591091 : f32
    %67 = vector.broadcast %cst_22 : f32 to vector<32x64xf32>
    %68 = arith.mulf %67, %66 : vector<32x64xf32>
    %cst_23 = arith.constant 1.000000e+00 : f32
    %69 = vector.broadcast %cst_23 : f32 to vector<32x64xf32>
    %70 = arith.addf %69, %68 : vector<32x64xf32>
    %cst_24 = arith.constant 1.000000e+00 : f32
    %71 = vector.broadcast %cst_24 : f32 to vector<32x64xf32>
    %72 = arith.divf %71, %70 : vector<32x64xf32>
    %cst_25 = arith.constant 1.06140542 : f32
    %73 = vector.broadcast %cst_25 : f32 to vector<32x64xf32>
    %74 = arith.mulf %73, %72 : vector<32x64xf32>
    %cst_26 = arith.constant -1.45315206 : f32
    %75 = vector.broadcast %cst_26 : f32 to vector<32x64xf32>
    %76 = arith.addf %74, %75 : vector<32x64xf32>
    %77 = arith.mulf %76, %72 : vector<32x64xf32>
    %cst_27 = arith.constant 1.42141378 : f32
    %78 = vector.broadcast %cst_27 : f32 to vector<32x64xf32>
    %79 = arith.addf %77, %78 : vector<32x64xf32>
    %80 = arith.mulf %79, %72 : vector<32x64xf32>
    %cst_28 = arith.constant -0.284496725 : f32
    %81 = vector.broadcast %cst_28 : f32 to vector<32x64xf32>
    %82 = arith.addf %80, %81 : vector<32x64xf32>
    %83 = arith.mulf %82, %72 : vector<32x64xf32>
    %cst_29 = arith.constant 0.254829586 : f32
    %84 = vector.broadcast %cst_29 : f32 to vector<32x64xf32>
    %85 = arith.addf %83, %84 : vector<32x64xf32>
    %86 = arith.mulf %85, %72 : vector<32x64xf32>
    %cst_30 = arith.constant 0.000000e+00 : f32
    %87 = vector.broadcast %cst_30 : f32 to vector<32x64xf32>
    %88 = arith.subf %87, %66 : vector<32x64xf32>
    %89 = arith.mulf %88, %66 : vector<32x64xf32>
    %90 = math.exp %89 : vector<32x64xf32>
    %91 = arith.mulf %86, %90 : vector<32x64xf32>
    %cst_31 = arith.constant 1.000000e+00 : f32
    %92 = vector.broadcast %cst_31 : f32 to vector<32x64xf32>
    %93 = arith.subf %92, %91 : vector<32x64xf32>
    %cst_32 = arith.constant 0.000000e+00 : f32
    %94 = vector.broadcast %cst_32 : f32 to vector<32x64xf32>
    %95 = arith.cmpf oge, %65, %94 : vector<32x64xf32>
    %cst_33 = arith.constant 0.000000e+00 : f32
    %96 = vector.broadcast %cst_33 : f32 to vector<32x64xf32>
    %97 = arith.subf %96, %93 : vector<32x64xf32>
    %98 = arith.select %95, %93, %97 : vector<32x64xi1>, vector<32x64xf32>
    %cst_34 = arith.constant 1.000000e+00 : f32
    %99 = vector.broadcast %cst_34 : f32 to vector<32x64xf32>
    %100 = arith.addf %99, %98 : vector<32x64xf32>
    %101 = arith.mulf %63, %100 : vector<32x64xf32>
    %c0_35 = arith.constant 0 : index
    %c0_36 = arith.constant 0 : index
    %c0_37 = arith.constant 0 : index
    %102 = vector.load %arg5[%c0_35, %c0_36, %c0_37] : memref<4x64x40xf32, #tpu.memory_space<vmem>>, vector<1x64x40xf32>
    %103 = vector.shape_cast %102 : vector<1x64x40xf32> to vector<64x40xf32>
    %cst_38 = arith.constant dense<0.000000e+00> : vector<32x40xf32>
    %104 = tpu.matmul %101, %103, %cst_38 {dimension_numbers = #tpu.dot_dimension_numbers<[1], [0], [0], [1], [0, 0, 1, 1], [], []>} : vector<32x64xf32>, vector<64x40xf32>, vector<32x40xf32> -> vector<32x40xf32>
    %105 = vector.broadcast %32 : vector<1x40xf32> to vector<32x40xf32>
    %106 = arith.addf %104, %105 : vector<32x40xf32>
    %107 = vector.shape_cast %106 : vector<32x40xf32> to vector<2x16x40xf32>
    %108 = vector.extract_strided_slice %107 {offsets = [0, 1, 0], sizes = [2, 15, 40], strides = [1, 1, 1]} : vector<2x16x40xf32> to vector<2x15x40xf32>
    %109 = vector.extract_strided_slice %107 {offsets = [0, 0, 0], sizes = [2, 1, 40], strides = [1, 1, 1]} : vector<2x16x40xf32> to vector<2x1x40xf32>
    %110 = tpu.concatenate %108, %109 in 1 : vector<2x15x40xf32>, vector<2x1x40xf32> -> vector<2x16x40xf32>
    %111 = vector.shape_cast %110 : vector<2x16x40xf32> to vector<32x40xf32>
    %112 = arith.select %11, %111, %106 : vector<32x40xi1>, vector<32x40xf32>
    %113 = vector.extract_strided_slice %107 {offsets = [0, 2, 0], sizes = [2, 14, 40], strides = [1, 1, 1]} : vector<2x16x40xf32> to vector<2x14x40xf32>
    %114 = vector.extract_strided_slice %107 {offsets = [0, 0, 0], sizes = [2, 2, 40], strides = [1, 1, 1]} : vector<2x16x40xf32> to vector<2x2x40xf32>
    %115 = tpu.concatenate %113, %114 in 1 : vector<2x14x40xf32>, vector<2x2x40xf32> -> vector<2x16x40xf32>
    %116 = vector.shape_cast %115 : vector<2x16x40xf32> to vector<32x40xf32>
    %117 = arith.select %16, %116, %112 : vector<32x40xi1>, vector<32x40xf32>
    %118 = vector.extract_strided_slice %107 {offsets = [0, 4, 0], sizes = [2, 12, 40], strides = [1, 1, 1]} : vector<2x16x40xf32> to vector<2x12x40xf32>
    %119 = vector.extract_strided_slice %107 {offsets = [0, 0, 0], sizes = [2, 4, 40], strides = [1, 1, 1]} : vector<2x16x40xf32> to vector<2x4x40xf32>
    %120 = tpu.concatenate %118, %119 in 1 : vector<2x12x40xf32>, vector<2x4x40xf32> -> vector<2x16x40xf32>
    %121 = vector.shape_cast %120 : vector<2x16x40xf32> to vector<32x40xf32>
    %122 = arith.select %21, %121, %117 : vector<32x40xi1>, vector<32x40xf32>
    %123 = vector.extract_strided_slice %107 {offsets = [0, 8, 0], sizes = [2, 8, 40], strides = [1, 1, 1]} : vector<2x16x40xf32> to vector<2x8x40xf32>
    %124 = vector.extract_strided_slice %107 {offsets = [0, 0, 0], sizes = [2, 8, 40], strides = [1, 1, 1]} : vector<2x16x40xf32> to vector<2x8x40xf32>
    %125 = tpu.concatenate %123, %124 in 1 : vector<2x8x40xf32>, vector<2x8x40xf32> -> vector<2x16x40xf32>
    %126 = vector.shape_cast %125 : vector<2x16x40xf32> to vector<32x40xf32>
    %127 = arith.select %26, %126, %122 : vector<32x40xi1>, vector<32x40xf32>
    %128 = arith.addf %127, %5 : vector<32x40xf32>
    %cst_39 = arith.constant dense<0.000000e+00> : vector<32xf32>
    %129 = vector.multi_reduction <add>, %128, %cst_39 [1] : vector<32x40xf32> to vector<32xf32>
    %130 = vector.shape_cast %129 : vector<32xf32> to vector<32x1xf32>
    %cst_40 = arith.constant 4.000000e+01 : f32
    %131 = vector.broadcast %cst_40 : f32 to vector<32x1xf32>
    %132 = arith.divf %130, %131 : vector<32x1xf32>
    %133 = vector.broadcast %132 : vector<32x1xf32> to vector<32x40xf32>
    %134 = arith.subf %128, %133 : vector<32x40xf32>
    %135 = arith.mulf %134, %134 : vector<32x40xf32>
    %cst_41 = arith.constant dense<0.000000e+00> : vector<32xf32>
    %136 = vector.multi_reduction <add>, %135, %cst_41 [1] : vector<32x40xf32> to vector<32xf32>
    %137 = vector.shape_cast %136 : vector<32xf32> to vector<32x1xf32>
    %cst_42 = arith.constant 4.000000e+01 : f32
    %138 = vector.broadcast %cst_42 : f32 to vector<32x1xf32>
    %139 = arith.divf %137, %138 : vector<32x1xf32>
    %140 = vector.broadcast %132 : vector<32x1xf32> to vector<32x40xf32>
    %141 = arith.subf %128, %140 : vector<32x40xf32>
    %cst_43 = arith.constant 9.99999974E-6 : f32
    %142 = vector.broadcast %cst_43 : f32 to vector<32x1xf32>
    %143 = arith.addf %139, %142 : vector<32x1xf32>
    %144 = math.rsqrt %143 : vector<32x1xf32>
    %145 = vector.broadcast %144 : vector<32x1xf32> to vector<32x40xf32>
    %146 = arith.mulf %141, %145 : vector<32x40xf32>
    %147 = vector.broadcast %33 : vector<1x40xf32> to vector<32x40xf32>
    %148 = arith.mulf %146, %147 : vector<32x40xf32>
    %149 = vector.broadcast %34 : vector<1x40xf32> to vector<32x40xf32>
    %150 = arith.addf %148, %149 : vector<32x40xf32>
    %c1 = arith.constant 1 : index
    %c0_44 = arith.constant 0 : index
    %c0_45 = arith.constant 0 : index
    %151 = vector.load %arg6[%c1, %c0_44, %c0_45] : memref<4x8x128xf32, #tpu.memory_space<vmem>>, vector<1x8x128xf32>
    %152 = vector.shape_cast %151 : vector<1x8x128xf32> to vector<8x128xf32>
    %153 = vector.extract_strided_slice %152 {offsets = [0, 0], sizes = [1, 40], strides = [1, 1]} : vector<8x128xf32> to vector<1x40xf32>
    %154 = vector.extract_strided_slice %152 {offsets = [1, 0], sizes = [1, 40], strides = [1, 1]} : vector<8x128xf32> to vector<1x40xf32>
    %155 = vector.extract_strided_slice %152 {offsets = [2, 0], sizes = [1, 64], strides = [1, 1]} : vector<8x128xf32> to vector<1x64xf32>
    %156 = vector.extract_strided_slice %152 {offsets = [3, 0], sizes = [1, 40], strides = [1, 1]} : vector<8x128xf32> to vector<1x40xf32>
    %157 = vector.extract_strided_slice %152 {offsets = [4, 0], sizes = [1, 40], strides = [1, 1]} : vector<8x128xf32> to vector<1x40xf32>
    %158 = vector.extract_strided_slice %152 {offsets = [5, 0], sizes = [1, 40], strides = [1, 1]} : vector<8x128xf32> to vector<1x40xf32>
    %cst_46 = arith.constant dense<0.000000e+00> : vector<32xf32>
    %159 = vector.multi_reduction <add>, %150, %cst_46 [1] : vector<32x40xf32> to vector<32xf32>
    %160 = vector.shape_cast %159 : vector<32xf32> to vector<32x1xf32>
    %cst_47 = arith.constant 4.000000e+01 : f32
    %161 = vector.broadcast %cst_47 : f32 to vector<32x1xf32>
    %162 = arith.divf %160, %161 : vector<32x1xf32>
    %163 = vector.broadcast %162 : vector<32x1xf32> to vector<32x40xf32>
    %164 = arith.subf %150, %163 : vector<32x40xf32>
    %165 = arith.mulf %164, %164 : vector<32x40xf32>
    %cst_48 = arith.constant dense<0.000000e+00> : vector<32xf32>
    %166 = vector.multi_reduction <add>, %165, %cst_48 [1] : vector<32x40xf32> to vector<32xf32>
    %167 = vector.shape_cast %166 : vector<32xf32> to vector<32x1xf32>
    %cst_49 = arith.constant 4.000000e+01 : f32
    %168 = vector.broadcast %cst_49 : f32 to vector<32x1xf32>
    %169 = arith.divf %167, %168 : vector<32x1xf32>
    %170 = vector.broadcast %162 : vector<32x1xf32> to vector<32x40xf32>
    %171 = arith.subf %150, %170 : vector<32x40xf32>
    %cst_50 = arith.constant 9.99999974E-6 : f32
    %172 = vector.broadcast %cst_50 : f32 to vector<32x1xf32>
    %173 = arith.addf %169, %172 : vector<32x1xf32>
    %174 = math.rsqrt %173 : vector<32x1xf32>
    %175 = vector.broadcast %174 : vector<32x1xf32> to vector<32x40xf32>
    %176 = arith.mulf %171, %175 : vector<32x40xf32>
    %177 = vector.broadcast %153 : vector<1x40xf32> to vector<32x40xf32>
    %178 = arith.mulf %176, %177 : vector<32x40xf32>
    %179 = vector.broadcast %154 : vector<1x40xf32> to vector<32x40xf32>
    %180 = arith.addf %178, %179 : vector<32x40xf32>
    %c1_51 = arith.constant 1 : index
    %c0_52 = arith.constant 0 : index
    %c0_53 = arith.constant 0 : index
    %181 = vector.load %arg4[%c1_51, %c0_52, %c0_53] : memref<4x40x64xf32, #tpu.memory_space<vmem>>, vector<1x40x64xf32>
    %182 = vector.shape_cast %181 : vector<1x40x64xf32> to vector<40x64xf32>
    %cst_54 = arith.constant dense<0.000000e+00> : vector<32x64xf32>
    %183 = tpu.matmul %180, %182, %cst_54 {dimension_numbers = #tpu.dot_dimension_numbers<[1], [0], [0], [1], [0, 0, 1, 1], [], []>} : vector<32x40xf32>, vector<40x64xf32>, vector<32x64xf32> -> vector<32x64xf32>
    %184 = vector.broadcast %155 : vector<1x64xf32> to vector<32x64xf32>
    %185 = arith.addf %183, %184 : vector<32x64xf32>
    %cst_55 = arith.constant 5.000000e-01 : f32
    %186 = vector.broadcast %cst_55 : f32 to vector<32x64xf32>
    %187 = arith.mulf %186, %185 : vector<32x64xf32>
    %cst_56 = arith.constant 0.707106769 : f32
    %188 = vector.broadcast %cst_56 : f32 to vector<32x64xf32>
    %189 = arith.mulf %185, %188 : vector<32x64xf32>
    %190 = math.absf %189 : vector<32x64xf32>
    %cst_57 = arith.constant 0.327591091 : f32
    %191 = vector.broadcast %cst_57 : f32 to vector<32x64xf32>
    %192 = arith.mulf %191, %190 : vector<32x64xf32>
    %cst_58 = arith.constant 1.000000e+00 : f32
    %193 = vector.broadcast %cst_58 : f32 to vector<32x64xf32>
    %194 = arith.addf %193, %192 : vector<32x64xf32>
    %cst_59 = arith.constant 1.000000e+00 : f32
    %195 = vector.broadcast %cst_59 : f32 to vector<32x64xf32>
    %196 = arith.divf %195, %194 : vector<32x64xf32>
    %cst_60 = arith.constant 1.06140542 : f32
    %197 = vector.broadcast %cst_60 : f32 to vector<32x64xf32>
    %198 = arith.mulf %197, %196 : vector<32x64xf32>
    %cst_61 = arith.constant -1.45315206 : f32
    %199 = vector.broadcast %cst_61 : f32 to vector<32x64xf32>
    %200 = arith.addf %198, %199 : vector<32x64xf32>
    %201 = arith.mulf %200, %196 : vector<32x64xf32>
    %cst_62 = arith.constant 1.42141378 : f32
    %202 = vector.broadcast %cst_62 : f32 to vector<32x64xf32>
    %203 = arith.addf %201, %202 : vector<32x64xf32>
    %204 = arith.mulf %203, %196 : vector<32x64xf32>
    %cst_63 = arith.constant -0.284496725 : f32
    %205 = vector.broadcast %cst_63 : f32 to vector<32x64xf32>
    %206 = arith.addf %204, %205 : vector<32x64xf32>
    %207 = arith.mulf %206, %196 : vector<32x64xf32>
    %cst_64 = arith.constant 0.254829586 : f32
    %208 = vector.broadcast %cst_64 : f32 to vector<32x64xf32>
    %209 = arith.addf %207, %208 : vector<32x64xf32>
    %210 = arith.mulf %209, %196 : vector<32x64xf32>
    %cst_65 = arith.constant 0.000000e+00 : f32
    %211 = vector.broadcast %cst_65 : f32 to vector<32x64xf32>
    %212 = arith.subf %211, %190 : vector<32x64xf32>
    %213 = arith.mulf %212, %190 : vector<32x64xf32>
    %214 = math.exp %213 : vector<32x64xf32>
    %215 = arith.mulf %210, %214 : vector<32x64xf32>
    %cst_66 = arith.constant 1.000000e+00 : f32
    %216 = vector.broadcast %cst_66 : f32 to vector<32x64xf32>
    %217 = arith.subf %216, %215 : vector<32x64xf32>
    %cst_67 = arith.constant 0.000000e+00 : f32
    %218 = vector.broadcast %cst_67 : f32 to vector<32x64xf32>
    %219 = arith.cmpf oge, %189, %218 : vector<32x64xf32>
    %cst_68 = arith.constant 0.000000e+00 : f32
    %220 = vector.broadcast %cst_68 : f32 to vector<32x64xf32>
    %221 = arith.subf %220, %217 : vector<32x64xf32>
    %222 = arith.select %219, %217, %221 : vector<32x64xi1>, vector<32x64xf32>
    %cst_69 = arith.constant 1.000000e+00 : f32
    %223 = vector.broadcast %cst_69 : f32 to vector<32x64xf32>
    %224 = arith.addf %223, %222 : vector<32x64xf32>
    %225 = arith.mulf %187, %224 : vector<32x64xf32>
    %c1_70 = arith.constant 1 : index
    %c0_71 = arith.constant 0 : index
    %c0_72 = arith.constant 0 : index
    %226 = vector.load %arg5[%c1_70, %c0_71, %c0_72] : memref<4x64x40xf32, #tpu.memory_space<vmem>>, vector<1x64x40xf32>
    %227 = vector.shape_cast %226 : vector<1x64x40xf32> to vector<64x40xf32>
    %cst_73 = arith.constant dense<0.000000e+00> : vector<32x40xf32>
    %228 = tpu.matmul %225, %227, %cst_73 {dimension_numbers = #tpu.dot_dimension_numbers<[1], [0], [0], [1], [0, 0, 1, 1], [], []>} : vector<32x64xf32>, vector<64x40xf32>, vector<32x40xf32> -> vector<32x40xf32>
    %229 = vector.broadcast %156 : vector<1x40xf32> to vector<32x40xf32>
    %230 = arith.addf %228, %229 : vector<32x40xf32>
    %231 = vector.shape_cast %230 : vector<32x40xf32> to vector<2x16x40xf32>
    %232 = vector.extract_strided_slice %231 {offsets = [0, 1, 0], sizes = [2, 15, 40], strides = [1, 1, 1]} : vector<2x16x40xf32> to vector<2x15x40xf32>
    %233 = vector.extract_strided_slice %231 {offsets = [0, 0, 0], sizes = [2, 1, 40], strides = [1, 1, 1]} : vector<2x16x40xf32> to vector<2x1x40xf32>
    %234 = tpu.concatenate %232, %233 in 1 : vector<2x15x40xf32>, vector<2x1x40xf32> -> vector<2x16x40xf32>
    %235 = vector.shape_cast %234 : vector<2x16x40xf32> to vector<32x40xf32>
    %236 = arith.select %11, %235, %230 : vector<32x40xi1>, vector<32x40xf32>
    %237 = vector.extract_strided_slice %231 {offsets = [0, 2, 0], sizes = [2, 14, 40], strides = [1, 1, 1]} : vector<2x16x40xf32> to vector<2x14x40xf32>
    %238 = vector.extract_strided_slice %231 {offsets = [0, 0, 0], sizes = [2, 2, 40], strides = [1, 1, 1]} : vector<2x16x40xf32> to vector<2x2x40xf32>
    %239 = tpu.concatenate %237, %238 in 1 : vector<2x14x40xf32>, vector<2x2x40xf32> -> vector<2x16x40xf32>
    %240 = vector.shape_cast %239 : vector<2x16x40xf32> to vector<32x40xf32>
    %241 = arith.select %16, %240, %236 : vector<32x40xi1>, vector<32x40xf32>
    %242 = vector.extract_strided_slice %231 {offsets = [0, 4, 0], sizes = [2, 12, 40], strides = [1, 1, 1]} : vector<2x16x40xf32> to vector<2x12x40xf32>
    %243 = vector.extract_strided_slice %231 {offsets = [0, 0, 0], sizes = [2, 4, 40], strides = [1, 1, 1]} : vector<2x16x40xf32> to vector<2x4x40xf32>
    %244 = tpu.concatenate %242, %243 in 1 : vector<2x12x40xf32>, vector<2x4x40xf32> -> vector<2x16x40xf32>
    %245 = vector.shape_cast %244 : vector<2x16x40xf32> to vector<32x40xf32>
    %246 = arith.select %21, %245, %241 : vector<32x40xi1>, vector<32x40xf32>
    %247 = vector.extract_strided_slice %231 {offsets = [0, 8, 0], sizes = [2, 8, 40], strides = [1, 1, 1]} : vector<2x16x40xf32> to vector<2x8x40xf32>
    %248 = vector.extract_strided_slice %231 {offsets = [0, 0, 0], sizes = [2, 8, 40], strides = [1, 1, 1]} : vector<2x16x40xf32> to vector<2x8x40xf32>
    %249 = tpu.concatenate %247, %248 in 1 : vector<2x8x40xf32>, vector<2x8x40xf32> -> vector<2x16x40xf32>
    %250 = vector.shape_cast %249 : vector<2x16x40xf32> to vector<32x40xf32>
    %251 = arith.select %26, %250, %246 : vector<32x40xi1>, vector<32x40xf32>
    %252 = arith.addf %251, %150 : vector<32x40xf32>
    %cst_74 = arith.constant dense<0.000000e+00> : vector<32xf32>
    %253 = vector.multi_reduction <add>, %252, %cst_74 [1] : vector<32x40xf32> to vector<32xf32>
    %254 = vector.shape_cast %253 : vector<32xf32> to vector<32x1xf32>
    %cst_75 = arith.constant 4.000000e+01 : f32
    %255 = vector.broadcast %cst_75 : f32 to vector<32x1xf32>
    %256 = arith.divf %254, %255 : vector<32x1xf32>
    %257 = vector.broadcast %256 : vector<32x1xf32> to vector<32x40xf32>
    %258 = arith.subf %252, %257 : vector<32x40xf32>
    %259 = arith.mulf %258, %258 : vector<32x40xf32>
    %cst_76 = arith.constant dense<0.000000e+00> : vector<32xf32>
    %260 = vector.multi_reduction <add>, %259, %cst_76 [1] : vector<32x40xf32> to vector<32xf32>
    %261 = vector.shape_cast %260 : vector<32xf32> to vector<32x1xf32>
    %cst_77 = arith.constant 4.000000e+01 : f32
    %262 = vector.broadcast %cst_77 : f32 to vector<32x1xf32>
    %263 = arith.divf %261, %262 : vector<32x1xf32>
    %264 = vector.broadcast %256 : vector<32x1xf32> to vector<32x40xf32>
    %265 = arith.subf %252, %264 : vector<32x40xf32>
    %cst_78 = arith.constant 9.99999974E-6 : f32
    %266 = vector.broadcast %cst_78 : f32 to vector<32x1xf32>
    %267 = arith.addf %263, %266 : vector<32x1xf32>
    %268 = math.rsqrt %267 : vector<32x1xf32>
    %269 = vector.broadcast %268 : vector<32x1xf32> to vector<32x40xf32>
    %270 = arith.mulf %265, %269 : vector<32x40xf32>
    %271 = vector.broadcast %157 : vector<1x40xf32> to vector<32x40xf32>
    %272 = arith.mulf %270, %271 : vector<32x40xf32>
    %273 = vector.broadcast %158 : vector<1x40xf32> to vector<32x40xf32>
    %274 = arith.addf %272, %273 : vector<32x40xf32>
    %c2 = arith.constant 2 : index
    %c0_79 = arith.constant 0 : index
    %c0_80 = arith.constant 0 : index
    %275 = vector.load %arg6[%c2, %c0_79, %c0_80] : memref<4x8x128xf32, #tpu.memory_space<vmem>>, vector<1x8x128xf32>
    %276 = vector.shape_cast %275 : vector<1x8x128xf32> to vector<8x128xf32>
    %277 = vector.extract_strided_slice %276 {offsets = [0, 0], sizes = [1, 40], strides = [1, 1]} : vector<8x128xf32> to vector<1x40xf32>
    %278 = vector.extract_strided_slice %276 {offsets = [1, 0], sizes = [1, 40], strides = [1, 1]} : vector<8x128xf32> to vector<1x40xf32>
    %279 = vector.extract_strided_slice %276 {offsets = [2, 0], sizes = [1, 64], strides = [1, 1]} : vector<8x128xf32> to vector<1x64xf32>
    %280 = vector.extract_strided_slice %276 {offsets = [3, 0], sizes = [1, 40], strides = [1, 1]} : vector<8x128xf32> to vector<1x40xf32>
    %281 = vector.extract_strided_slice %276 {offsets = [4, 0], sizes = [1, 40], strides = [1, 1]} : vector<8x128xf32> to vector<1x40xf32>
    %282 = vector.extract_strided_slice %276 {offsets = [5, 0], sizes = [1, 40], strides = [1, 1]} : vector<8x128xf32> to vector<1x40xf32>
    %cst_81 = arith.constant dense<0.000000e+00> : vector<32xf32>
    %283 = vector.multi_reduction <add>, %274, %cst_81 [1] : vector<32x40xf32> to vector<32xf32>
    %284 = vector.shape_cast %283 : vector<32xf32> to vector<32x1xf32>
    %cst_82 = arith.constant 4.000000e+01 : f32
    %285 = vector.broadcast %cst_82 : f32 to vector<32x1xf32>
    %286 = arith.divf %284, %285 : vector<32x1xf32>
    %287 = vector.broadcast %286 : vector<32x1xf32> to vector<32x40xf32>
    %288 = arith.subf %274, %287 : vector<32x40xf32>
    %289 = arith.mulf %288, %288 : vector<32x40xf32>
    %cst_83 = arith.constant dense<0.000000e+00> : vector<32xf32>
    %290 = vector.multi_reduction <add>, %289, %cst_83 [1] : vector<32x40xf32> to vector<32xf32>
    %291 = vector.shape_cast %290 : vector<32xf32> to vector<32x1xf32>
    %cst_84 = arith.constant 4.000000e+01 : f32
    %292 = vector.broadcast %cst_84 : f32 to vector<32x1xf32>
    %293 = arith.divf %291, %292 : vector<32x1xf32>
    %294 = vector.broadcast %286 : vector<32x1xf32> to vector<32x40xf32>
    %295 = arith.subf %274, %294 : vector<32x40xf32>
    %cst_85 = arith.constant 9.99999974E-6 : f32
    %296 = vector.broadcast %cst_85 : f32 to vector<32x1xf32>
    %297 = arith.addf %293, %296 : vector<32x1xf32>
    %298 = math.rsqrt %297 : vector<32x1xf32>
    %299 = vector.broadcast %298 : vector<32x1xf32> to vector<32x40xf32>
    %300 = arith.mulf %295, %299 : vector<32x40xf32>
    %301 = vector.broadcast %277 : vector<1x40xf32> to vector<32x40xf32>
    %302 = arith.mulf %300, %301 : vector<32x40xf32>
    %303 = vector.broadcast %278 : vector<1x40xf32> to vector<32x40xf32>
    %304 = arith.addf %302, %303 : vector<32x40xf32>
    %c2_86 = arith.constant 2 : index
    %c0_87 = arith.constant 0 : index
    %c0_88 = arith.constant 0 : index
    %305 = vector.load %arg4[%c2_86, %c0_87, %c0_88] : memref<4x40x64xf32, #tpu.memory_space<vmem>>, vector<1x40x64xf32>
    %306 = vector.shape_cast %305 : vector<1x40x64xf32> to vector<40x64xf32>
    %cst_89 = arith.constant dense<0.000000e+00> : vector<32x64xf32>
    %307 = tpu.matmul %304, %306, %cst_89 {dimension_numbers = #tpu.dot_dimension_numbers<[1], [0], [0], [1], [0, 0, 1, 1], [], []>} : vector<32x40xf32>, vector<40x64xf32>, vector<32x64xf32> -> vector<32x64xf32>
    %308 = vector.broadcast %279 : vector<1x64xf32> to vector<32x64xf32>
    %309 = arith.addf %307, %308 : vector<32x64xf32>
    %cst_90 = arith.constant 5.000000e-01 : f32
    %310 = vector.broadcast %cst_90 : f32 to vector<32x64xf32>
    %311 = arith.mulf %310, %309 : vector<32x64xf32>
    %cst_91 = arith.constant 0.707106769 : f32
    %312 = vector.broadcast %cst_91 : f32 to vector<32x64xf32>
    %313 = arith.mulf %309, %312 : vector<32x64xf32>
    %314 = math.absf %313 : vector<32x64xf32>
    %cst_92 = arith.constant 0.327591091 : f32
    %315 = vector.broadcast %cst_92 : f32 to vector<32x64xf32>
    %316 = arith.mulf %315, %314 : vector<32x64xf32>
    %cst_93 = arith.constant 1.000000e+00 : f32
    %317 = vector.broadcast %cst_93 : f32 to vector<32x64xf32>
    %318 = arith.addf %317, %316 : vector<32x64xf32>
    %cst_94 = arith.constant 1.000000e+00 : f32
    %319 = vector.broadcast %cst_94 : f32 to vector<32x64xf32>
    %320 = arith.divf %319, %318 : vector<32x64xf32>
    %cst_95 = arith.constant 1.06140542 : f32
    %321 = vector.broadcast %cst_95 : f32 to vector<32x64xf32>
    %322 = arith.mulf %321, %320 : vector<32x64xf32>
    %cst_96 = arith.constant -1.45315206 : f32
    %323 = vector.broadcast %cst_96 : f32 to vector<32x64xf32>
    %324 = arith.addf %322, %323 : vector<32x64xf32>
    %325 = arith.mulf %324, %320 : vector<32x64xf32>
    %cst_97 = arith.constant 1.42141378 : f32
    %326 = vector.broadcast %cst_97 : f32 to vector<32x64xf32>
    %327 = arith.addf %325, %326 : vector<32x64xf32>
    %328 = arith.mulf %327, %320 : vector<32x64xf32>
    %cst_98 = arith.constant -0.284496725 : f32
    %329 = vector.broadcast %cst_98 : f32 to vector<32x64xf32>
    %330 = arith.addf %328, %329 : vector<32x64xf32>
    %331 = arith.mulf %330, %320 : vector<32x64xf32>
    %cst_99 = arith.constant 0.254829586 : f32
    %332 = vector.broadcast %cst_99 : f32 to vector<32x64xf32>
    %333 = arith.addf %331, %332 : vector<32x64xf32>
    %334 = arith.mulf %333, %320 : vector<32x64xf32>
    %cst_100 = arith.constant 0.000000e+00 : f32
    %335 = vector.broadcast %cst_100 : f32 to vector<32x64xf32>
    %336 = arith.subf %335, %314 : vector<32x64xf32>
    %337 = arith.mulf %336, %314 : vector<32x64xf32>
    %338 = math.exp %337 : vector<32x64xf32>
    %339 = arith.mulf %334, %338 : vector<32x64xf32>
    %cst_101 = arith.constant 1.000000e+00 : f32
    %340 = vector.broadcast %cst_101 : f32 to vector<32x64xf32>
    %341 = arith.subf %340, %339 : vector<32x64xf32>
    %cst_102 = arith.constant 0.000000e+00 : f32
    %342 = vector.broadcast %cst_102 : f32 to vector<32x64xf32>
    %343 = arith.cmpf oge, %313, %342 : vector<32x64xf32>
    %cst_103 = arith.constant 0.000000e+00 : f32
    %344 = vector.broadcast %cst_103 : f32 to vector<32x64xf32>
    %345 = arith.subf %344, %341 : vector<32x64xf32>
    %346 = arith.select %343, %341, %345 : vector<32x64xi1>, vector<32x64xf32>
    %cst_104 = arith.constant 1.000000e+00 : f32
    %347 = vector.broadcast %cst_104 : f32 to vector<32x64xf32>
    %348 = arith.addf %347, %346 : vector<32x64xf32>
    %349 = arith.mulf %311, %348 : vector<32x64xf32>
    %c2_105 = arith.constant 2 : index
    %c0_106 = arith.constant 0 : index
    %c0_107 = arith.constant 0 : index
    %350 = vector.load %arg5[%c2_105, %c0_106, %c0_107] : memref<4x64x40xf32, #tpu.memory_space<vmem>>, vector<1x64x40xf32>
    %351 = vector.shape_cast %350 : vector<1x64x40xf32> to vector<64x40xf32>
    %cst_108 = arith.constant dense<0.000000e+00> : vector<32x40xf32>
    %352 = tpu.matmul %349, %351, %cst_108 {dimension_numbers = #tpu.dot_dimension_numbers<[1], [0], [0], [1], [0, 0, 1, 1], [], []>} : vector<32x64xf32>, vector<64x40xf32>, vector<32x40xf32> -> vector<32x40xf32>
    %353 = vector.broadcast %280 : vector<1x40xf32> to vector<32x40xf32>
    %354 = arith.addf %352, %353 : vector<32x40xf32>
    %355 = vector.shape_cast %354 : vector<32x40xf32> to vector<2x16x40xf32>
    %356 = vector.extract_strided_slice %355 {offsets = [0, 1, 0], sizes = [2, 15, 40], strides = [1, 1, 1]} : vector<2x16x40xf32> to vector<2x15x40xf32>
    %357 = vector.extract_strided_slice %355 {offsets = [0, 0, 0], sizes = [2, 1, 40], strides = [1, 1, 1]} : vector<2x16x40xf32> to vector<2x1x40xf32>
    %358 = tpu.concatenate %356, %357 in 1 : vector<2x15x40xf32>, vector<2x1x40xf32> -> vector<2x16x40xf32>
    %359 = vector.shape_cast %358 : vector<2x16x40xf32> to vector<32x40xf32>
    %360 = arith.select %11, %359, %354 : vector<32x40xi1>, vector<32x40xf32>
    %361 = vector.extract_strided_slice %355 {offsets = [0, 2, 0], sizes = [2, 14, 40], strides = [1, 1, 1]} : vector<2x16x40xf32> to vector<2x14x40xf32>
    %362 = vector.extract_strided_slice %355 {offsets = [0, 0, 0], sizes = [2, 2, 40], strides = [1, 1, 1]} : vector<2x16x40xf32> to vector<2x2x40xf32>
    %363 = tpu.concatenate %361, %362 in 1 : vector<2x14x40xf32>, vector<2x2x40xf32> -> vector<2x16x40xf32>
    %364 = vector.shape_cast %363 : vector<2x16x40xf32> to vector<32x40xf32>
    %365 = arith.select %16, %364, %360 : vector<32x40xi1>, vector<32x40xf32>
    %366 = vector.extract_strided_slice %355 {offsets = [0, 4, 0], sizes = [2, 12, 40], strides = [1, 1, 1]} : vector<2x16x40xf32> to vector<2x12x40xf32>
    %367 = vector.extract_strided_slice %355 {offsets = [0, 0, 0], sizes = [2, 4, 40], strides = [1, 1, 1]} : vector<2x16x40xf32> to vector<2x4x40xf32>
    %368 = tpu.concatenate %366, %367 in 1 : vector<2x12x40xf32>, vector<2x4x40xf32> -> vector<2x16x40xf32>
    %369 = vector.shape_cast %368 : vector<2x16x40xf32> to vector<32x40xf32>
    %370 = arith.select %21, %369, %365 : vector<32x40xi1>, vector<32x40xf32>
    %371 = vector.extract_strided_slice %355 {offsets = [0, 8, 0], sizes = [2, 8, 40], strides = [1, 1, 1]} : vector<2x16x40xf32> to vector<2x8x40xf32>
    %372 = vector.extract_strided_slice %355 {offsets = [0, 0, 0], sizes = [2, 8, 40], strides = [1, 1, 1]} : vector<2x16x40xf32> to vector<2x8x40xf32>
    %373 = tpu.concatenate %371, %372 in 1 : vector<2x8x40xf32>, vector<2x8x40xf32> -> vector<2x16x40xf32>
    %374 = vector.shape_cast %373 : vector<2x16x40xf32> to vector<32x40xf32>
    %375 = arith.select %26, %374, %370 : vector<32x40xi1>, vector<32x40xf32>
    %376 = arith.addf %375, %274 : vector<32x40xf32>
    %cst_109 = arith.constant dense<0.000000e+00> : vector<32xf32>
    %377 = vector.multi_reduction <add>, %376, %cst_109 [1] : vector<32x40xf32> to vector<32xf32>
    %378 = vector.shape_cast %377 : vector<32xf32> to vector<32x1xf32>
    %cst_110 = arith.constant 4.000000e+01 : f32
    %379 = vector.broadcast %cst_110 : f32 to vector<32x1xf32>
    %380 = arith.divf %378, %379 : vector<32x1xf32>
    %381 = vector.broadcast %380 : vector<32x1xf32> to vector<32x40xf32>
    %382 = arith.subf %376, %381 : vector<32x40xf32>
    %383 = arith.mulf %382, %382 : vector<32x40xf32>
    %cst_111 = arith.constant dense<0.000000e+00> : vector<32xf32>
    %384 = vector.multi_reduction <add>, %383, %cst_111 [1] : vector<32x40xf32> to vector<32xf32>
    %385 = vector.shape_cast %384 : vector<32xf32> to vector<32x1xf32>
    %cst_112 = arith.constant 4.000000e+01 : f32
    %386 = vector.broadcast %cst_112 : f32 to vector<32x1xf32>
    %387 = arith.divf %385, %386 : vector<32x1xf32>
    %388 = vector.broadcast %380 : vector<32x1xf32> to vector<32x40xf32>
    %389 = arith.subf %376, %388 : vector<32x40xf32>
    %cst_113 = arith.constant 9.99999974E-6 : f32
    %390 = vector.broadcast %cst_113 : f32 to vector<32x1xf32>
    %391 = arith.addf %387, %390 : vector<32x1xf32>
    %392 = math.rsqrt %391 : vector<32x1xf32>
    %393 = vector.broadcast %392 : vector<32x1xf32> to vector<32x40xf32>
    %394 = arith.mulf %389, %393 : vector<32x40xf32>
    %395 = vector.broadcast %281 : vector<1x40xf32> to vector<32x40xf32>
    %396 = arith.mulf %394, %395 : vector<32x40xf32>
    %397 = vector.broadcast %282 : vector<1x40xf32> to vector<32x40xf32>
    %398 = arith.addf %396, %397 : vector<32x40xf32>
    %c3 = arith.constant 3 : index
    %c0_114 = arith.constant 0 : index
    %c0_115 = arith.constant 0 : index
    %399 = vector.load %arg6[%c3, %c0_114, %c0_115] : memref<4x8x128xf32, #tpu.memory_space<vmem>>, vector<1x8x128xf32>
    %400 = vector.shape_cast %399 : vector<1x8x128xf32> to vector<8x128xf32>
    %401 = vector.extract_strided_slice %400 {offsets = [0, 0], sizes = [1, 40], strides = [1, 1]} : vector<8x128xf32> to vector<1x40xf32>
    %402 = vector.extract_strided_slice %400 {offsets = [1, 0], sizes = [1, 40], strides = [1, 1]} : vector<8x128xf32> to vector<1x40xf32>
    %403 = vector.extract_strided_slice %400 {offsets = [2, 0], sizes = [1, 64], strides = [1, 1]} : vector<8x128xf32> to vector<1x64xf32>
    %404 = vector.extract_strided_slice %400 {offsets = [3, 0], sizes = [1, 40], strides = [1, 1]} : vector<8x128xf32> to vector<1x40xf32>
    %405 = vector.extract_strided_slice %400 {offsets = [4, 0], sizes = [1, 40], strides = [1, 1]} : vector<8x128xf32> to vector<1x40xf32>
    %406 = vector.extract_strided_slice %400 {offsets = [5, 0], sizes = [1, 40], strides = [1, 1]} : vector<8x128xf32> to vector<1x40xf32>
    %cst_116 = arith.constant dense<0.000000e+00> : vector<32xf32>
    %407 = vector.multi_reduction <add>, %398, %cst_116 [1] : vector<32x40xf32> to vector<32xf32>
    %408 = vector.shape_cast %407 : vector<32xf32> to vector<32x1xf32>
    %cst_117 = arith.constant 4.000000e+01 : f32
    %409 = vector.broadcast %cst_117 : f32 to vector<32x1xf32>
    %410 = arith.divf %408, %409 : vector<32x1xf32>
    %411 = vector.broadcast %410 : vector<32x1xf32> to vector<32x40xf32>
    %412 = arith.subf %398, %411 : vector<32x40xf32>
    %413 = arith.mulf %412, %412 : vector<32x40xf32>
    %cst_118 = arith.constant dense<0.000000e+00> : vector<32xf32>
    %414 = vector.multi_reduction <add>, %413, %cst_118 [1] : vector<32x40xf32> to vector<32xf32>
    %415 = vector.shape_cast %414 : vector<32xf32> to vector<32x1xf32>
    %cst_119 = arith.constant 4.000000e+01 : f32
    %416 = vector.broadcast %cst_119 : f32 to vector<32x1xf32>
    %417 = arith.divf %415, %416 : vector<32x1xf32>
    %418 = vector.broadcast %410 : vector<32x1xf32> to vector<32x40xf32>
    %419 = arith.subf %398, %418 : vector<32x40xf32>
    %cst_120 = arith.constant 9.99999974E-6 : f32
    %420 = vector.broadcast %cst_120 : f32 to vector<32x1xf32>
    %421 = arith.addf %417, %420 : vector<32x1xf32>
    %422 = math.rsqrt %421 : vector<32x1xf32>
    %423 = vector.broadcast %422 : vector<32x1xf32> to vector<32x40xf32>
    %424 = arith.mulf %419, %423 : vector<32x40xf32>
    %425 = vector.broadcast %401 : vector<1x40xf32> to vector<32x40xf32>
    %426 = arith.mulf %424, %425 : vector<32x40xf32>
    %427 = vector.broadcast %402 : vector<1x40xf32> to vector<32x40xf32>
    %428 = arith.addf %426, %427 : vector<32x40xf32>
    %c3_121 = arith.constant 3 : index
    %c0_122 = arith.constant 0 : index
    %c0_123 = arith.constant 0 : index
    %429 = vector.load %arg4[%c3_121, %c0_122, %c0_123] : memref<4x40x64xf32, #tpu.memory_space<vmem>>, vector<1x40x64xf32>
    %430 = vector.shape_cast %429 : vector<1x40x64xf32> to vector<40x64xf32>
    %cst_124 = arith.constant dense<0.000000e+00> : vector<32x64xf32>
    %431 = tpu.matmul %428, %430, %cst_124 {dimension_numbers = #tpu.dot_dimension_numbers<[1], [0], [0], [1], [0, 0, 1, 1], [], []>} : vector<32x40xf32>, vector<40x64xf32>, vector<32x64xf32> -> vector<32x64xf32>
    %432 = vector.broadcast %403 : vector<1x64xf32> to vector<32x64xf32>
    %433 = arith.addf %431, %432 : vector<32x64xf32>
    %cst_125 = arith.constant 5.000000e-01 : f32
    %434 = vector.broadcast %cst_125 : f32 to vector<32x64xf32>
    %435 = arith.mulf %434, %433 : vector<32x64xf32>
    %cst_126 = arith.constant 0.707106769 : f32
    %436 = vector.broadcast %cst_126 : f32 to vector<32x64xf32>
    %437 = arith.mulf %433, %436 : vector<32x64xf32>
    %438 = math.absf %437 : vector<32x64xf32>
    %cst_127 = arith.constant 0.327591091 : f32
    %439 = vector.broadcast %cst_127 : f32 to vector<32x64xf32>
    %440 = arith.mulf %439, %438 : vector<32x64xf32>
    %cst_128 = arith.constant 1.000000e+00 : f32
    %441 = vector.broadcast %cst_128 : f32 to vector<32x64xf32>
    %442 = arith.addf %441, %440 : vector<32x64xf32>
    %cst_129 = arith.constant 1.000000e+00 : f32
    %443 = vector.broadcast %cst_129 : f32 to vector<32x64xf32>
    %444 = arith.divf %443, %442 : vector<32x64xf32>
    %cst_130 = arith.constant 1.06140542 : f32
    %445 = vector.broadcast %cst_130 : f32 to vector<32x64xf32>
    %446 = arith.mulf %445, %444 : vector<32x64xf32>
    %cst_131 = arith.constant -1.45315206 : f32
    %447 = vector.broadcast %cst_131 : f32 to vector<32x64xf32>
    %448 = arith.addf %446, %447 : vector<32x64xf32>
    %449 = arith.mulf %448, %444 : vector<32x64xf32>
    %cst_132 = arith.constant 1.42141378 : f32
    %450 = vector.broadcast %cst_132 : f32 to vector<32x64xf32>
    %451 = arith.addf %449, %450 : vector<32x64xf32>
    %452 = arith.mulf %451, %444 : vector<32x64xf32>
    %cst_133 = arith.constant -0.284496725 : f32
    %453 = vector.broadcast %cst_133 : f32 to vector<32x64xf32>
    %454 = arith.addf %452, %453 : vector<32x64xf32>
    %455 = arith.mulf %454, %444 : vector<32x64xf32>
    %cst_134 = arith.constant 0.254829586 : f32
    %456 = vector.broadcast %cst_134 : f32 to vector<32x64xf32>
    %457 = arith.addf %455, %456 : vector<32x64xf32>
    %458 = arith.mulf %457, %444 : vector<32x64xf32>
    %cst_135 = arith.constant 0.000000e+00 : f32
    %459 = vector.broadcast %cst_135 : f32 to vector<32x64xf32>
    %460 = arith.subf %459, %438 : vector<32x64xf32>
    %461 = arith.mulf %460, %438 : vector<32x64xf32>
    %462 = math.exp %461 : vector<32x64xf32>
    %463 = arith.mulf %458, %462 : vector<32x64xf32>
    %cst_136 = arith.constant 1.000000e+00 : f32
    %464 = vector.broadcast %cst_136 : f32 to vector<32x64xf32>
    %465 = arith.subf %464, %463 : vector<32x64xf32>
    %cst_137 = arith.constant 0.000000e+00 : f32
    %466 = vector.broadcast %cst_137 : f32 to vector<32x64xf32>
    %467 = arith.cmpf oge, %437, %466 : vector<32x64xf32>
    %cst_138 = arith.constant 0.000000e+00 : f32
    %468 = vector.broadcast %cst_138 : f32 to vector<32x64xf32>
    %469 = arith.subf %468, %465 : vector<32x64xf32>
    %470 = arith.select %467, %465, %469 : vector<32x64xi1>, vector<32x64xf32>
    %cst_139 = arith.constant 1.000000e+00 : f32
    %471 = vector.broadcast %cst_139 : f32 to vector<32x64xf32>
    %472 = arith.addf %471, %470 : vector<32x64xf32>
    %473 = arith.mulf %435, %472 : vector<32x64xf32>
    %c3_140 = arith.constant 3 : index
    %c0_141 = arith.constant 0 : index
    %c0_142 = arith.constant 0 : index
    %474 = vector.load %arg5[%c3_140, %c0_141, %c0_142] : memref<4x64x40xf32, #tpu.memory_space<vmem>>, vector<1x64x40xf32>
    %475 = vector.shape_cast %474 : vector<1x64x40xf32> to vector<64x40xf32>
    %cst_143 = arith.constant dense<0.000000e+00> : vector<32x40xf32>
    %476 = tpu.matmul %473, %475, %cst_143 {dimension_numbers = #tpu.dot_dimension_numbers<[1], [0], [0], [1], [0, 0, 1, 1], [], []>} : vector<32x64xf32>, vector<64x40xf32>, vector<32x40xf32> -> vector<32x40xf32>
    %477 = vector.broadcast %404 : vector<1x40xf32> to vector<32x40xf32>
    %478 = arith.addf %476, %477 : vector<32x40xf32>
    %479 = vector.shape_cast %478 : vector<32x40xf32> to vector<2x16x40xf32>
    %480 = vector.extract_strided_slice %479 {offsets = [0, 1, 0], sizes = [2, 15, 40], strides = [1, 1, 1]} : vector<2x16x40xf32> to vector<2x15x40xf32>
    %481 = vector.extract_strided_slice %479 {offsets = [0, 0, 0], sizes = [2, 1, 40], strides = [1, 1, 1]} : vector<2x16x40xf32> to vector<2x1x40xf32>
    %482 = tpu.concatenate %480, %481 in 1 : vector<2x15x40xf32>, vector<2x1x40xf32> -> vector<2x16x40xf32>
    %483 = vector.shape_cast %482 : vector<2x16x40xf32> to vector<32x40xf32>
    %484 = arith.select %11, %483, %478 : vector<32x40xi1>, vector<32x40xf32>
    %485 = vector.extract_strided_slice %479 {offsets = [0, 2, 0], sizes = [2, 14, 40], strides = [1, 1, 1]} : vector<2x16x40xf32> to vector<2x14x40xf32>
    %486 = vector.extract_strided_slice %479 {offsets = [0, 0, 0], sizes = [2, 2, 40], strides = [1, 1, 1]} : vector<2x16x40xf32> to vector<2x2x40xf32>
    %487 = tpu.concatenate %485, %486 in 1 : vector<2x14x40xf32>, vector<2x2x40xf32> -> vector<2x16x40xf32>
    %488 = vector.shape_cast %487 : vector<2x16x40xf32> to vector<32x40xf32>
    %489 = arith.select %16, %488, %484 : vector<32x40xi1>, vector<32x40xf32>
    %490 = vector.extract_strided_slice %479 {offsets = [0, 4, 0], sizes = [2, 12, 40], strides = [1, 1, 1]} : vector<2x16x40xf32> to vector<2x12x40xf32>
    %491 = vector.extract_strided_slice %479 {offsets = [0, 0, 0], sizes = [2, 4, 40], strides = [1, 1, 1]} : vector<2x16x40xf32> to vector<2x4x40xf32>
    %492 = tpu.concatenate %490, %491 in 1 : vector<2x12x40xf32>, vector<2x4x40xf32> -> vector<2x16x40xf32>
    %493 = vector.shape_cast %492 : vector<2x16x40xf32> to vector<32x40xf32>
    %494 = arith.select %21, %493, %489 : vector<32x40xi1>, vector<32x40xf32>
    %495 = vector.extract_strided_slice %479 {offsets = [0, 8, 0], sizes = [2, 8, 40], strides = [1, 1, 1]} : vector<2x16x40xf32> to vector<2x8x40xf32>
    %496 = vector.extract_strided_slice %479 {offsets = [0, 0, 0], sizes = [2, 8, 40], strides = [1, 1, 1]} : vector<2x16x40xf32> to vector<2x8x40xf32>
    %497 = tpu.concatenate %495, %496 in 1 : vector<2x8x40xf32>, vector<2x8x40xf32> -> vector<2x16x40xf32>
    %498 = vector.shape_cast %497 : vector<2x16x40xf32> to vector<32x40xf32>
    %499 = arith.select %26, %498, %494 : vector<32x40xi1>, vector<32x40xf32>
    %500 = arith.addf %499, %398 : vector<32x40xf32>
    %cst_144 = arith.constant dense<0.000000e+00> : vector<32xf32>
    %501 = vector.multi_reduction <add>, %500, %cst_144 [1] : vector<32x40xf32> to vector<32xf32>
    %502 = vector.shape_cast %501 : vector<32xf32> to vector<32x1xf32>
    %cst_145 = arith.constant 4.000000e+01 : f32
    %503 = vector.broadcast %cst_145 : f32 to vector<32x1xf32>
    %504 = arith.divf %502, %503 : vector<32x1xf32>
    %505 = vector.broadcast %504 : vector<32x1xf32> to vector<32x40xf32>
    %506 = arith.subf %500, %505 : vector<32x40xf32>
    %507 = arith.mulf %506, %506 : vector<32x40xf32>
    %cst_146 = arith.constant dense<0.000000e+00> : vector<32xf32>
    %508 = vector.multi_reduction <add>, %507, %cst_146 [1] : vector<32x40xf32> to vector<32xf32>
    %509 = vector.shape_cast %508 : vector<32xf32> to vector<32x1xf32>
    %cst_147 = arith.constant 4.000000e+01 : f32
    %510 = vector.broadcast %cst_147 : f32 to vector<32x1xf32>
    %511 = arith.divf %509, %510 : vector<32x1xf32>
    %512 = vector.broadcast %504 : vector<32x1xf32> to vector<32x40xf32>
    %513 = arith.subf %500, %512 : vector<32x40xf32>
    %cst_148 = arith.constant 9.99999974E-6 : f32
    %514 = vector.broadcast %cst_148 : f32 to vector<32x1xf32>
    %515 = arith.addf %511, %514 : vector<32x1xf32>
    %516 = math.rsqrt %515 : vector<32x1xf32>
    %517 = vector.broadcast %516 : vector<32x1xf32> to vector<32x40xf32>
    %518 = arith.mulf %513, %517 : vector<32x40xf32>
    %519 = vector.broadcast %405 : vector<1x40xf32> to vector<32x40xf32>
    %520 = arith.mulf %518, %519 : vector<32x40xf32>
    %521 = vector.broadcast %406 : vector<1x40xf32> to vector<32x40xf32>
    %522 = arith.addf %520, %521 : vector<32x40xf32>
    %523 = vector.shape_cast %522 : vector<32x40xf32> to vector<2x16x40xf32>
    %cst_149 = arith.constant dense<0.000000e+00> : vector<2x40xf32>
    %524 = vector.multi_reduction <add>, %523, %cst_149 [1] : vector<2x16x40xf32> to vector<2x40xf32>
    %cst_150 = arith.constant 1.600000e+01 : f32
    %525 = vector.broadcast %cst_150 : f32 to vector<2x40xf32>
    %526 = arith.divf %524, %525 : vector<2x40xf32>
    %c0_151 = arith.constant 0 : index
    %c0_152 = arith.constant 0 : index
    %527 = vector.load %arg7[%c0_151, %c0_152] : memref<40x5xf32, #tpu.memory_space<vmem>>, vector<40x5xf32>
    %cst_153 = arith.constant dense<0.000000e+00> : vector<2x5xf32>
    %528 = tpu.matmul %526, %527, %cst_153 {dimension_numbers = #tpu.dot_dimension_numbers<[1], [0], [0], [1], [0, 0, 1, 1], [], []>} : vector<2x40xf32>, vector<40x5xf32>, vector<2x5xf32> -> vector<2x5xf32>
    %c0_154 = arith.constant 0 : index
    %c0_155 = arith.constant 0 : index
    %529 = vector.load %arg8[%c0_154, %c0_155] : memref<1x5xf32, #tpu.memory_space<vmem>>, vector<1x5xf32>
    %530 = vector.broadcast %529 : vector<1x5xf32> to vector<2x5xf32>
    %531 = arith.addf %528, %530 : vector<2x5xf32>
    %c0_156 = arith.constant 0 : index
    %c0_157 = arith.constant 0 : index
    %532 = vector.load %arg9[%c0_156, %c0_157] : memref<2x5xf32, #tpu.memory_space<vmem>>, vector<2x5xf32>
    tpu.vector_store %arg9[%c0_156, %c0_157], %531 {strides = array<i32>} : memref<2x5xf32, #tpu.memory_space<vmem>>, vector<2x5xf32>,
    return
  }
  func.func @transform_0(%arg0: i32) -> (i32, i32) {
    %c0_i32 = arith.constant 0 : i32
    %c0_i32_0 = arith.constant 0 : i32
    %c0_i32_1 = arith.constant 0 : i32
    return %c0_i32, %c0_i32_0 : i32, i32
  }
  func.func @transform_1(%arg0: i32) -> (i32, i32) {
    %c0_i32 = arith.constant 0 : i32
    %c0_i32_0 = arith.constant 0 : i32
    %c0_i32_1 = arith.constant 0 : i32
    return %c0_i32, %c0_i32_0 : i32, i32
  }
  func.func @transform_2(%arg0: i32) -> (i32, i32) {
    %c0_i32 = arith.constant 0 : i32
    %c0_i32_0 = arith.constant 0 : i32
    %c0_i32_1 = arith.constant 0 : i32
    return %c0_i32, %c0_i32_0 : i32, i32
  }
  func.func @transform_3(%arg0: i32) -> (i32, i32, i32) {
    %c0_i32 = arith.constant 0 : i32
    %c0_i32_0 = arith.constant 0 : i32
    %c0_i32_1 = arith.constant 0 : i32
    %c0_i32_2 = arith.constant 0 : i32
    return %c0_i32, %c0_i32_0, %c0_i32_1 : i32, i32, i32
  }
  func.func @transform_4(%arg0: i32) -> (i32, i32, i32) {
    %c0_i32 = arith.constant 0 : i32
    %c0_i32_0 = arith.constant 0 : i32
    %c0_i32_1 = arith.constant 0 : i32
    %c0_i32_2 = arith.constant 0 : i32
    return %c0_i32, %c0_i32_0, %c0_i32_1 : i32, i32, i32
  }
  func.func @transform_5(%arg0: i32) -> (i32, i32, i32) {
    %c0_i32 = arith.constant 0 : i32
    %c0_i32_0 = arith.constant 0 : i32
    %c0_i32_1 = arith.constant 0 : i32
    %c0_i32_2 = arith.constant 0 : i32
    return %c0_i32, %c0_i32_0, %c0_i32_1 : i32, i32, i32
  }
  func.func @transform_6(%arg0: i32) -> (i32, i32) {
    %c0_i32 = arith.constant 0 : i32
    %c0_i32_0 = arith.constant 0 : i32
    %c0_i32_1 = arith.constant 0 : i32
    return %c0_i32, %c0_i32_0 : i32, i32
  }
  func.func @transform_7(%arg0: i32) -> (i32, i32) {
    %c0_i32 = arith.constant 0 : i32
    %c0_i32_0 = arith.constant 0 : i32
    %c0_i32_1 = arith.constant 0 : i32
    return %c0_i32, %c0_i32_0 : i32, i32
  }
  func.func @transform_8(%arg0: i32) -> (i32, i32) {
    %c0_i32 = arith.constant 0 : i32
    %c0_i32_0 = arith.constant 0 : i32
    %c0_i32_1 = arith.constant 0 : i32
    return %c0_i32, %c0_i32_0 : i32, i32
  }
}

</mosaic_0001>

<bundles_post_ra>
// kernel: tpu_custom_call.1
= control target key start
LH: loop header
LB: loop body
LE: loop exit
PB: predicated region body
PF: predicated region fallthrough
CT: control target
= control target key end

     0   :  { %vm56_vm0 = vcmask 1041408   ;;  %vm3021_vm1 = vmmov 1   ;;  %vm43_vm3 = vcmask 80896   ;;  %s3876_s0 = inlined_call_operand.vmem [shape: f32[32,10], index: 0, kind: input, shape index: {}]   ;;  %s3877_s1 = inlined_call_operand.vmem [shape: f32[10,40], index: 1, kind: input, shape index: {}]   ;;  %s3878_s2 = inlined_call_operand.vmem [shape: f32[1,40], index: 2, kind: input, shape index: {}]   ;;  %s3879_s3 = inlined_call_operand.vmem [shape: f32[4,40,64], index: 3, kind: input, shape index: {}]   ;;  %s3880_s4 = inlined_call_operand.vmem [shape: f32[4,64,40], index: 4, kind: input, shape index: {}]   ;;  %s3881_s5 = inlined_call_operand.vmem [shape: f32[4,8,128], index: 5, kind: input, shape index: {}]   ;;  %s3882_s6 = inlined_call_operand.vmem [shape: f32[40,5], index: 6, kind: input, shape index: {}]   ;;  %s3883_s7 = inlined_call_operand.vmem [shape: f32[1,5], index: 7, kind: input, shape index: {}]   ;;  %s3884_s8 = inlined_call_operand.hbm [shape: f32[2,5], index: 8, kind: output, shape index: {}]  }
   0x1   :  { %v34_v0 = vld [vmem:[%s3877_s1] sm:$0xff]  ;;  %v35_v1 = vld [vmem:[%s3877_s1 + $0x8] sm:$0x3]  ;;  %vm2757_vm2 = vmpackc.low %vm56_vm0, %vm3021_vm1 }
   0x2   :  { %v30_v2 = vld [vmem:[%s3876_s0] sm:$0xff]  ;;  %v2756_v3 = vpack.c.bf16 %v35_v1, %v34_v0 }
   0x3   :  { %2585 = vmatprep.mubr.msk.f32.mxu1 %vm43_vm3, %v30_v2 }
   0x4   :  { %13 = vsyncpa [#allocation3], 0  ;;  %2758 = vmatprep.subr.msk.bf16.mxu1 %vm2757_vm2, %v2756_v3  ;;  %v31_v4 = vld [vmem:[%s3876_s0 + $0x8] sm:$0xff]  ;;  %v32_v5 = vld [vmem:[%s3876_s0 + $0x10] sm:$0xff]  ;;  %vm160_vm4 = vcmask 326656   ;;  %v145_v49 = vlaneseq  ;;  %vm456_vm8 = vcmask 523264  }
   0x5   :  { %2761 = vmatpush3.bf16.msk.msra.mxu1 %vm2757_vm2, %v2756_v3  ;;  %v33_v6 = vld [vmem:[%s3876_s0 + $0x18] sm:$0xff]  ;;  %v2403_v7 = vld [vmem:[%s3878_s2] ss:$0 sm:$0xff]  ;;  %v231_v41 = vld [vmem:[%s3879_s3 + $0x8] sm:$0xff]  ;;  %vm558_vm12 = vcmask 1046528   ;;  %vm577_vm15 = vcmask 1045504  }
   0x6   :  { %v230_v40 = vld [vmem:[%s3879_s3] sm:$0xff]  ;;  %v232_v43 = vld [vmem:[%s3879_s3 + $0x10] sm:$0xff]  ;;  %v233_v44 = vld [vmem:[%s3879_s3 + $0x18] sm:$0xff]  ;;  %v3132_v55 = vshrl.u32 %v145_v49, 7  ;;  %vm596_vm2 = vcmask 1043456   ;;  %s3025_s13 = smov [#allocation2]  }
   0x7   :  { %v2762_v42 = vpack.c.bf16 %v231_v41, %v230_v40  ;;  %v2766_v45 = vpack.c.bf16 %v233_v44, %v232_v43  ;;  %v234_v46 = vld [vmem:[%s3879_s3 + $0x20] sm:$0xff] }
   0x8   :  { %2586 = vmatmul.mubr.msk.f32.vlgmr.msra.gmra.mrb[0].mxu1 %vm43_vm3, %v31_v4  ;;  %v3135_v60 = vsub.s32 0, %v3132_v55  ;;  %v3140_v61 = vld [vmem:[%s3881_s5] sm:$0xff]  ;;  %v3143_v63 = vsub.s32 1, %v3132_v55 }
   0x9   :  { %2588 = vmatprep.mubr.msk.f32.mxu1 %vm43_vm3, %v32_v5  ;;  %2763 = vmatprep.subr.bf16.mxu1 %v2762_v42 }
   0xa   :  { %2765 = vmatpush3.bf16.msra.mxu1 %v2762_v42  ;;  %v217_v0 = vrot.slane %v3140_v61, %v3135_v60  ;;  %v225_v3 = vrot.slane %v3140_v61, %v3143_v63 }
   0xb   :  { %2767 = vmatprep.subr.bf16.mxu1 %v2766_v45 }
   0xc   :  { %2589 = vmatmul.mubr.msk.f32.gmra.mrb[2].mxu1 %vm43_vm3, %v33_v6 }
   0xe   :  { %2769 = vmatpush3.bf16.msra.mxu1 %v2766_v45 }
   0xf   :  { %2599 = vmatprep.subr.mxu1 %v234_v46 }
  0x12   :  { %2600 = vmatpush3.msra.mxu1 %v234_v46 }
  0xdb   :  { %v2587_v8 = vpop.f32.mrb[0].mxu1 }
  0xdc   :  { %v126_v9 = vpop.f32.mrb[1].mxu1  ;;  %v3094_v11 = vadd.f32 %v2587_v8, %v2403_v7 }
  0xdd   :  { %v3092_v10 = vadd.f32 %v2403_v7, %v126_v9 }
  0xde   :  { %v164_v18 = vsel %vm160_vm4, %v3094_v11, 0.0 }
  0xdf   :  { %v2590_v12 = vpop.f32.mrb[2].mxu1  ;;  %v161_v13 = vsel %vm160_vm4, %v3092_v10, 0.0 }
  0xe0   :  { %v136_v14 = vpop.f32.mrb[3].mxu1  ;;  %162 = vadd.xlane.f32.xlu0 %v161_v13  ;;  %v3100_v16 = vadd.f32 %v2590_v12, %v2403_v7 }
  0xe1   :  { %v3098_v15 = vadd.f32 %v2403_v7, %v136_v14 }
  0xe2   :  { %v170_v19 = vsel %vm160_vm4, %v3100_v16, 0.0 }
  0xe3   :  { %v167_v17 = vsel %vm160_vm4, %v3098_v15, 0.0 }
  0xe4   :  { %168 = vadd.xlane.f32.xlu1 %v167_v17  ;;  %165 = vadd.xlane.f32.xlu0 %v164_v18 }
  0xe8   :  { %171 = vadd.xlane.f32.xlu1 %v170_v19 }
 0x16d   :  { %v163_v20 = vpop.xlane.xlu0 %162 }
 0x16e   :  { %v174_v21 = vmul.f32 0.025, %v163_v20 }
 0x170   :  { %v178_v22 = vsub.f32 %v3092_v10, %v174_v21 }
 0x171   :  { %v169_v23 = vpop.xlane.xlu1 %168  ;;  %v166_v24 = vpop.xlane.xlu0 %165 }
 0x172   :  { %v176_v25 = vmul.f32 0.025, %v169_v23  ;;  %v175_v26 = vmul.f32 0.025, %v166_v24  ;;  %v182_v27 = vmul.f32 %v178_v22, %v178_v22  ;;  %v445_v23 = vld [vmem:[%s3880_s4 + $0x8] sm:$0xff] }
 0x174   :  { %v180_v28 = vsub.f32 %v3098_v15, %v176_v25  ;;  %v179_v29 = vsub.f32 %v3094_v11, %v175_v26  ;;  %v186_v30 = vsel %vm160_vm4, %v182_v27, 0.0  ;;  %v446_v25 = vld [vmem:[%s3880_s4 + $0x10] sm:$0xff]  ;;  %v447_v26 = vld [vmem:[%s3880_s4 + $0x18] sm:$0xff] }
 0x175   :  { %v172_v31 = vpop.xlane.xlu1 %171  ;;  %187 = vadd.xlane.f32.xlu0 %v186_v30  ;;  %v2774_v27 = vpack.c.bf16 %v447_v26, %v446_v25 }
 0x176   :  { %v177_v32 = vmul.f32 0.025, %v172_v31  ;;  %v184_v33 = vmul.f32 %v180_v28, %v180_v28  ;;  %v183_v34 = vmul.f32 %v179_v29, %v179_v29  ;;  %v450_v31 = vld [vmem:[%s3880_s4 + $0x30] sm:$0xff] }
 0x178   :  { %v181_v35 = vsub.f32 %v3100_v16, %v177_v32  ;;  %v192_v36 = vsel %vm160_vm4, %v184_v33, 0.0  ;;  %v189_v37 = vsel %vm160_vm4, %v183_v34, 0.0  ;;  %v451_v32 = vld [vmem:[%s3880_s4 + $0x38] sm:$0xff]  ;;  %v3178_v34 = vsub.s32 2, %v3132_v55 }
 0x179   :  { %193 = vadd.xlane.f32.xlu0 %v192_v36  ;;  %190 = vadd.xlane.f32.xlu1 %v189_v37  ;;  %v2782_v33 = vpack.c.bf16 %v451_v32, %v450_v31 }
 0x17a   :  { %v185_v38 = vmul.f32 %v181_v35, %v181_v35 }
 0x17c   :  { %v195_v39 = vsel %vm160_vm4, %v185_v38, 0.0 }
 0x17d   :  { %196 = vadd.xlane.f32.xlu1 %v195_v39 }
 0x202   :  { %v188_v47 = vpop.xlane.xlu0 %187 }
 0x203   :  { %v198_v48 = vmul.f32 0.025, %v188_v47 }
 0x205   :  { %v202_v50 = vadd.f32 1e-05, %v198_v48 }
 0x206   :  { %v191_v51 = vpop.xlane.xlu1 %190  ;;  %v194_v52 = vpop.xlane.xlu0 %193 }
 0x207   :  { %2869 = vrsqrt.f32 %v202_v50  ;;  %v199_v53 = vmul.f32 0.025, %v191_v51  ;;  %v200_v54 = vmul.f32 0.025, %v194_v52 }
 0x209   :  { %v203_v56 = vadd.f32 1e-05, %v199_v53  ;;  %v204_v57 = vadd.f32 1e-05, %v200_v54 }
 0x20a   :  { %v197_v58 = vpop.xlane.xlu1 %196 }
 0x20b   :  { %2871 = vrsqrt.f32 %v203_v56  ;;  %v201_v59 = vmul.f32 0.025, %v197_v58 }
 0x20c   :  { %2873 = vrsqrt.f32 %v204_v57 }
 0x20d   :  { %v205_v62 = vadd.f32 1e-05, %v201_v59 }
 0x20f   :  { %2875 = vrsqrt.f32 %v205_v62 }
 0x211   :  { %v2870_v1 = vpop.eup %2869 }
 0x212   :  { %v210_v2 = vmul.f32 %v2870_v1, %v178_v22  ;;  %v444_v22 = vld [vmem:[%s3880_s4] sm:$0xff] }
 0x213   :  { %v2770_v24 = vpack.c.bf16 %v445_v23, %v444_v22 }
 0x214   :  { %v218_v4 = vmul.f32 %v217_v0, %v210_v2 }
 0x215   :  { %v2872_v5 = vpop.eup %2871  ;;  %2771 = vmatprep.subr.bf16.mxu0 %v2770_v24 }
 0x216   :  { %v2874_v6 = vpop.eup %2873  ;;  %v211_v7 = vmul.f32 %v2872_v5, %v179_v29  ;;  %v226_v8 = vadd.f32 %v225_v3, %v218_v4  ;;  %2773 = vmatpush3.bf16.msra.mxu0 %v2770_v24  ;;  %v449_v29 = vld [vmem:[%s3880_s4 + $0x28] sm:$0xff] }
 0x217   :  { %v212_v9 = vmul.f32 %v2874_v6, %v180_v28  ;;  %2775 = vmatprep.subr.bf16.mxu0 %v2774_v27  ;;  %v448_v28 = vld [vmem:[%s3880_s4 + $0x20] sm:$0xff] }
 0x218   :  { %v219_v12 = vmul.f32 %v217_v0, %v211_v7  ;;  %2601 = vmatprep.mubr.msk.f32.mxu1 %vm160_vm4, %v226_v8  ;;  %v2778_v30 = vpack.c.bf16 %v449_v29, %v448_v28 }
 0x219   :  { %v2876_v13 = vpop.eup %2875  ;;  %v220_v14 = vmul.f32 %v217_v0, %v212_v9 }
 0x21a   :  { %v227_v17 = vadd.f32 %v225_v3, %v219_v12  ;;  %v213_v18 = vmul.f32 %v2876_v13, %v181_v35  ;;  %2777 = vmatpush3.bf16.msra.mxu0 %v2774_v27  ;;  %v238_v35 = vrot.slane %v3140_v61, %v3178_v34 }
 0x21b   :  { %v228_v19 = vadd.f32 %v225_v3, %v220_v14  ;;  %2779 = vmatprep.subr.bf16.mxu0 %v2778_v30 }
 0x21c   :  { %2602 = vmatmul.mubr.msk.f32.vlgmr.msra.gmra.mrb[4].mxu1 %vm160_vm4, %v227_v17  ;;  %v221_v20 = vmul.f32 %v217_v0, %v213_v18 }
 0x21d   :  { %2604 = vmatprep.mubr.msk.f32.mxu1 %vm160_vm4, %v228_v19 }
 0x21e   :  { %v229_v21 = vadd.f32 %v225_v3, %v221_v20  ;;  %2781 = vmatpush3.bf16.msra.mxu0 %v2778_v30 }
 0x21f   :  { %2783 = vmatprep.subr.bf16.mxu0 %v2782_v33 }
 0x220   :  { %2605 = vmatmul.mubr.msk.f32.gmra.mrb[6].mxu1 %vm160_vm4, %v229_v21 }
 0x222   :  { %2785 = vmatpush3.bf16.msra.mxu0 %v2782_v33 }
 0x2ef   :  { %v2603_v36 = vpop.f32.mrb[4].mxu1 }
 0x2f0   :  { %v3182_v37 = vadd.f32 %v2603_v36, %v238_v35  ;;  %v317_v38 = vpop.f32.mrb[5].mxu1 }
 0x2f1   :  { %v3184_v39 = vadd.f32 %v317_v38, %v238_v35 }
 0x2f2   :  { %v3187_v40 = vmul.f32 0.70710677, %v3182_v37 }
 0x2f3   :  { %v3190_v41 = vmul.f32 0.70710677, %v3184_v39  ;;  %v2606_v42 = vpop.f32.mrb[6].mxu1 }
 0x2f4   :  { %v345_v43 = vand.u32 2147483647, %v3187_v40  ;;  %v3193_v44 = vadd.f32 %v2606_v42, %v238_v35  ;;  %v327_v45 = vpop.f32.mrb[7].mxu1  ;;  %vm425_vm5 = vcmp.ge.f32.partialorder %v3187_v40, 0.0 }
 0x2f5   :  { %v344_v46 = vand.u32 2147483647, %v3190_v41  ;;  %v3196_v47 = vadd.f32 %v327_v45, %v238_v35  ;;  %vm424_vm6 = vcmp.ge.f32.partialorder %v3190_v41, 0.0 }
 0x2f6   :  { %v349_v48 = vmul.f32 0.3275911, %v345_v43  ;;  %v3199_v50 = vmul.f32 0.70710677, %v3193_v44  ;;  %v401_v1 = vsub.f32 0.0, %v345_v43 }
 0x2f7   :  { %v348_v51 = vmul.f32 0.3275911, %v344_v46  ;;  %v3202_v52 = vmul.f32 0.70710677, %v3196_v47  ;;  %v400_v2 = vsub.f32 0.0, %v344_v46 }
 0x2f8   :  { %v353_v53 = vadd.f32 1.0, %v349_v48  ;;  %v347_v54 = vand.u32 2147483647, %v3199_v50  ;;  %v405_v4 = vmul.f32 %v401_v1, %v345_v43  ;;  %vm427_vm7 = vcmp.ge.f32.partialorder %v3199_v50, 0.0 }
 0x2f9   :  { %v352_v56 = vadd.f32 1.0, %v348_v51  ;;  %v346_v57 = vand.u32 2147483647, %v3202_v52  ;;  %v404_v8 = vmul.f32 %v400_v2, %v344_v46  ;;  %vm426_vm9 = vcmp.ge.f32.partialorder %v3202_v52, 0.0 }
 0x2fa   :  { %2877 = vrcp.f32 %v353_v53  ;;  %v351_v58 = vmul.f32 0.3275911, %v347_v54  ;;  %v403_v5 = vsub.f32 0.0, %v347_v54  ;;  %v410_v17 = vmul.f32 1.442695, %v405_v4 }
 0x2fb   :  { %2879 = vrcp.f32 %v352_v56  ;;  %v350_v59 = vmul.f32 0.3275911, %v346_v57  ;;  %v402_v9 = vsub.f32 0.0, %v346_v57  ;;  %v408_v22 = vmul.f32 1.442695, %v404_v8 }
 0x2fc   :  { %v355_v62 = vadd.f32 1.0, %v351_v58  ;;  %v407_v18 = vmul.f32 %v403_v5, %v347_v54  ;;  %v3219_v52 = vsub.s32 3, %v3132_v55 }
 0x2fd   :  { %v354_v0 = vadd.f32 1.0, %v350_v59  ;;  %v406_v24 = vmul.f32 %v402_v9, %v346_v57 }
 0x2fe   :  { %2881 = vrcp.f32 %v355_v62  ;;  %v414_v29 = vmul.f32 1.442695, %v407_v18 }
 0x2ff   :  { %2883 = vrcp.f32 %v354_v0  ;;  %v412_v35 = vmul.f32 1.442695, %v406_v24 }
 0x300   :  { %2885 = vpow2.f32 %v410_v17 }
 0x301   :  { %2887 = vpow2.f32 %v408_v22 }
 0x302   :  { %2889 = vpow2.f32 %v414_v29 }
 0x303   :  { %2891 = vpow2.f32 %v412_v35 }
 0x304   :  { %v2878_v3 = vpop.eup %2877 }
 0x305   :  { %v2880_v6 = vpop.eup %2879  ;;  %v365_v7 = vmul.f32 1.0614054, %v2878_v3 }
 0x306   :  { %v364_v12 = vmul.f32 1.0614054, %v2880_v6 }
 0x307   :  { %v369_v13 = vadd.f32 -1.4531521, %v365_v7 }
 0x308   :  { %v2882_v14 = vpop.eup %2881  ;;  %v368_v19 = vadd.f32 -1.4531521, %v364_v12 }
 0x309   :  { %v2884_v20 = vpop.eup %2883  ;;  %v373_v21 = vmul.f32 %v2878_v3, %v369_v13  ;;  %v367_v23 = vmul.f32 1.0614054, %v2882_v14 }
 0x30a   :  { %v366_v25 = vmul.f32 1.0614054, %v2884_v20  ;;  %v372_v26 = vmul.f32 %v2880_v6, %v368_v19  ;;  %v2886_v1 = vpop.eup %2885 }
 0x30b   :  { %v377_v27 = vadd.f32 1.4214138, %v373_v21  ;;  %v371_v28 = vadd.f32 -1.4531521, %v367_v23  ;;  %v2888_v5 = vpop.eup %2887 }
 0x30c   :  { %v370_v30 = vadd.f32 -1.4531521, %v366_v25  ;;  %v376_v31 = vadd.f32 1.4214138, %v372_v26  ;;  %v2890_v18 = vpop.eup %2889 }
 0x30d   :  { %v381_v32 = vmul.f32 %v2878_v3, %v377_v27  ;;  %v375_v33 = vmul.f32 %v2882_v14, %v371_v28  ;;  %v2892_v22 = vpop.eup %2891 }
 0x30e   :  { %v374_v36 = vmul.f32 %v2884_v20, %v370_v30  ;;  %v380_v38 = vmul.f32 %v2880_v6, %v376_v31  ;;  %v336_v30 = vmul.f32 0.5, %v3184_v39  ;;  %v339_v39 = vmul.f32 0.5, %v3193_v44 }
 0x30f   :  { %v385_v42 = vadd.f32 -0.28449672, %v381_v32  ;;  %v379_v43 = vadd.f32 1.4214138, %v375_v33 }
 0x310   :  { %v378_v45 = vadd.f32 1.4214138, %v374_v36  ;;  %v384_v46 = vadd.f32 -0.28449672, %v380_v38  ;;  %v338_v38 = vmul.f32 0.5, %v3196_v47  ;;  %v455_v47 = vrot.slane %v3140_v61, %v3219_v52 }
 0x311   :  { %v389_v48 = vmul.f32 %v2878_v3, %v385_v42  ;;  %v383_v51 = vmul.f32 %v2882_v14, %v379_v43  ;;  %v146_v43 = vand.u32 127, %v145_v49 }
 0x312   :  { %v382_v53 = vmul.f32 %v2884_v20, %v378_v45  ;;  %v388_v54 = vmul.f32 %v2880_v6, %v384_v46 }
 0x313   :  { %v393_v56 = vadd.f32 0.2548296, %v389_v48  ;;  %v387_v57 = vadd.f32 -0.28449672, %v383_v51  ;;  %vm147_vm10 = vcmp.ge.s32.totalorder %v146_v43, 8  ;;  %vm148_vm11 = vcmp.lt.s32.totalorder %v146_v43, 16 }
 0x314   :  { %v386_v58 = vadd.f32 -0.28449672, %v382_v53  ;;  %v392_v59 = vadd.f32 0.2548296, %v388_v54  ;;  %vm150_vm13 = vcmp.ge.s32.totalorder %v146_v43, 16  ;;  %vm151_vm14 = vcmp.lt.s32.totalorder %v146_v43, 24 }
 0x315   :  { %v397_v62 = vmul.f32 %v2878_v3, %v393_v56  ;;  %v391_v0 = vmul.f32 %v2882_v14, %v387_v57  ;;  %vm153_vm0 = vcmp.ge.s32.totalorder %v146_v43, 24  ;;  %vm154_vm1 = vcmp.lt.s32.totalorder %v146_v43, 32 }
 0x316   :  { %v390_v2 = vmul.f32 %v2884_v20, %v386_v58  ;;  %v396_v4 = vmul.f32 %v2880_v6, %v392_v59  ;;  %vm156_vm3 = vcmp.ge.s32.totalorder %v146_v43, 32 }
 0x317   :  { %v417_v7 = vmul.f32 %v2886_v1, %v397_v62  ;;  %v395_v8 = vadd.f32 0.2548296, %v391_v0 }
 0x318   :  { %v394_v9 = vadd.f32 0.2548296, %v390_v2  ;;  %v416_v12 = vmul.f32 %v2888_v5, %v396_v4 }
 0x319   :  { %v421_v13 = vsub.f32 1.0, %v417_v7  ;;  %v399_v17 = vmul.f32 %v2882_v14, %v395_v8 }
 0x31a   :  { %v398_v19 = vmul.f32 %v2884_v20, %v394_v9  ;;  %v420_v21 = vsub.f32 1.0, %v416_v12  ;;  %v337_v20 = vmul.f32 0.5, %v3182_v37 }
 0x31b   :  { %v429_v23 = vsub.f32 0.0, %v421_v13  ;;  %v419_v24 = vmul.f32 %v2890_v18, %v399_v17 }
 0x31c   :  { %v418_v3 = vmul.f32 %v2892_v22, %v398_v19  ;;  %v428_v25 = vsub.f32 0.0, %v420_v21 }
 0x31d   :  { %v433_v26 = vsel %vm425_vm5, %v421_v13, %v429_v23  ;;  %v423_v6 = vsub.f32 1.0, %v419_v24  ;;  %vm3226_vm5 = vmand %vm147_vm10, %vm148_vm11 }
 0x31e   :  { %v437_v27 = vadd.f32 1.0, %v433_v26  ;;  %v422_v28 = vsub.f32 1.0, %v418_v3  ;;  %v432_v29 = vsel %vm424_vm6, %v420_v21, %v428_v25  ;;  %vm157_vm6 = vcmp.lt.s32.totalorder %v146_v43, 40 }
 0x31f   :  { %v431_v14 = vsub.f32 0.0, %v423_v6  ;;  %v436_v31 = vadd.f32 1.0, %v432_v29  ;;  %vm3246_vm10 = vmand %vm156_vm3, %vm157_vm6 }
 0x320   :  { %v430_v32 = vsub.f32 0.0, %v422_v28  ;;  %v441_v35 = vmul.f32 %v437_v27, %v337_v20 }
 0x321   :  { %v435_v40 = vsel %vm427_vm7, %v423_v6, %v431_v14  ;;  %v440_v33 = vmul.f32 %v436_v31, %v336_v30  ;;  %vm3232_vm7 = vmand %vm150_vm13, %vm151_vm14 }
 0x322   :  { %v439_v41 = vadd.f32 1.0, %v435_v40  ;;  %v434_v36 = vsel %vm426_vm9, %v422_v28, %v430_v32  ;;  %vm3238_vm9 = vmand %vm153_vm0, %vm154_vm1 }
 0x323   :  { %v438_v42 = vadd.f32 1.0, %v434_v36  ;;  %2623 = vmatprep.mubr.msk.f32.mxu0 %vm456_vm8, %v440_v33 }
 0x324   :  { %2624 = vmatmul.mubr.msk.f32.vlgmr.msra.gmra.mrb[0].mxu0 %vm456_vm8, %v441_v35  ;;  %v443_v50 = vmul.f32 %v439_v41, %v339_v39 }
 0x325   :  { %v442_v37 = vmul.f32 %v438_v42, %v338_v38 }
 0x327   :  { %2626 = vmatprep.mubr.msk.f32.mxu0 %vm456_vm8, %v442_v37 }
 0x328   :  { %2627 = vmatmul.mubr.msk.f32.gmra.mrb[2].mxu0 %vm456_vm8, %v443_v50 }
 0x3f7   :  { %v2625_v45 = vpop.f32.mrb[0].mxu0 }
 0x3f8   :  { %v541_v44 = vadd.f32 %v2625_v45, %v455_v47  ;;  %v535_v46 = vpop.f32.mrb[1].mxu0 }
 0x3f9   :  { %v536_v48 = vadd.f32 %v535_v46, %v455_v47 }
 0x3fa   :  { %v560_v51 = vrot.slane %v541_v44, 1  ;;  %v579_v53 = vrot.slane %v541_v44, 2  ;;  %v598_v49 = vrot.slane %v541_v44, 4 }
 0x3fb   :  { %v559_v54 = vrot.slane %v536_v48, 1  ;;  %v578_v56 = vrot.slane %v536_v48, 2  ;;  %v2628_v57 = vpop.f32.mrb[2].mxu0  ;;  %v597_v59 = vrot.slane %v536_v48, 4 }
 0x3fc   :  { %v551_v62 = vadd.f32 %v2628_v57, %v455_v47  ;;  %v545_v0 = vpop.f32.mrb[3].mxu0 }
 0x3fd   :  { %v546_v2 = vadd.f32 %v545_v0, %v455_v47  ;;  %v571_v5 = vsel %vm558_vm12, %v560_v51, %v559_v54  ;;  %v590_v7 = vsel %vm577_vm15, %v579_v53, %v578_v56  ;;  %v609_v8 = vsel %vm596_vm2, %v598_v49, %v597_v59 }
 0x3fe   :  { %v563_v9 = vrot.slane %v551_v62, 1  ;;  %v582_v12 = vrot.slane %v551_v62, 2  ;;  %v574_v17 = vsel %vm3226_vm5, %v571_v5, %v541_v44  ;;  %v561_v18 = vsel %vm558_vm12, %v559_v54, %v560_v51 }
 0x3ff   :  { %v562_v19 = vrot.slane %v546_v2, 1  ;;  %v581_v21 = vrot.slane %v546_v2, 2  ;;  %v593_v22 = vsel %vm3232_vm7, %v590_v7, %v574_v17  ;;  %v573_v23 = vsel %vm3226_vm5, %v561_v18, %v536_v48 }
 0x400   :  { %v612_v24 = vsel %vm3238_vm9, %v609_v8, %v593_v22  ;;  %v580_v3 = vsel %vm577_vm15, %v578_v56, %v579_v53  ;;  %v599_v25 = vsel %vm596_vm2, %v597_v59, %v598_v49  ;;  %v600_v26 = vrot.slane %v546_v2, 4 }
 0x401   :  { %v616_v6 = vsel %vm3246_vm10, %v536_v48, %v612_v24  ;;  %v592_v27 = vsel %vm3232_vm7, %v580_v3, %v573_v23  ;;  %v572_v28 = vsel %vm558_vm12, %v563_v9, %v562_v19  ;;  %v591_v29 = vsel %vm577_vm15, %v582_v12, %v581_v21 }
 0x402   :  { %v620_v30 = vadd.f32 %v616_v6, %v3094_v11  ;;  %v611_v14 = vsel %vm3238_vm9, %v599_v25, %v592_v27  ;;  %v576_v31 = vsel %vm3226_vm5, %v572_v28, %v551_v62  ;;  %v601_v20 = vrot.slane %v551_v62, 4 }
 0x403   :  { %v615_v32 = vsel %vm3246_vm10, %v541_v44, %v611_v14  ;;  %v595_v40 = vsel %vm3232_vm7, %v591_v29, %v576_v31  ;;  %v564_v33 = vsel %vm558_vm12, %v562_v19, %v563_v9  ;;  %v583_v35 = vsel %vm577_vm15, %v581_v21, %v582_v12 }
 0x404   :  { %v626_v41 = vsel %vm160_vm4, %v620_v30, 0.0  ;;  %v619_v11 = vadd.f32 %v615_v32, %v3092_v10  ;;  %v610_v36 = vsel %vm596_vm2, %v601_v20, %v600_v26  ;;  %v575_v38 = vsel %vm3226_vm5, %v564_v33, %v546_v2 }
 0x405   :  { %627 = vadd.xlane.f32.xlu1 %v626_v41  ;;  %v614_v42 = vsel %vm3238_vm9, %v610_v36, %v595_v40  ;;  %v594_v39 = vsel %vm3232_vm7, %v583_v35, %v575_v38  ;;  %v602_v37 = vsel %vm596_vm2, %v600_v26, %v601_v20  ;;  %v3304_v14 = vsub.s32 4, %v3132_v55 }
 0x406   :  { %v623_v50 = vsel %vm160_vm4, %v619_v11, 0.0  ;;  %v618_v43 = vsel %vm3246_vm10, %v546_v2, %v614_v42  ;;  %v613_v10 = vsel %vm3238_vm9, %v602_v37, %v594_v39  ;;  %v3307_v31 = vsub.s32 5, %v3132_v55 }
 0x407   :  { %624 = vadd.xlane.f32.xlu0 %v623_v50  ;;  %v622_v47 = vadd.f32 %v618_v43, %v3100_v16  ;;  %v617_v45 = vsel %vm3246_vm10, %v551_v62, %v613_v10  ;;  %v678_v20 = vrot.slane %v3140_v61, %v3304_v14 }
 0x408   :  { %v621_v44 = vadd.f32 %v617_v45, %v3098_v15  ;;  %v686_v33 = vrot.slane %v3140_v61, %v3307_v31 }
 0x409   :  { %v632_v46 = vsel %vm160_vm4, %v622_v47, 0.0 }
 0x40a   :  { %633 = vadd.xlane.f32.xlu1 %v632_v46  ;;  %v629_v48 = vsel %vm160_vm4, %v621_v44, 0.0 }
 0x40b   :  { %630 = vadd.xlane.f32.xlu0 %v629_v48 }
 0x492   :  { %v628_v51 = vpop.xlane.xlu1 %627 }
 0x493   :  { %v636_v53 = vmul.f32 0.025, %v628_v51 }
 0x494   :  { %v625_v49 = vpop.xlane.xlu0 %624 }
 0x495   :  { %v640_v54 = vsub.f32 %v620_v30, %v636_v53  ;;  %v635_v56 = vmul.f32 0.025, %v625_v49 }
 0x497   :  { %v639_v57 = vsub.f32 %v619_v11, %v635_v56  ;;  %v634_v59 = vpop.xlane.xlu1 %633  ;;  %v644_v0 = vmul.f32 %v640_v54, %v640_v54 }
 0x498   :  { %v638_v16 = vmul.f32 0.025, %v634_v59  ;;  %v631_v2 = vpop.xlane.xlu0 %630 }
 0x499   :  { %v637_v5 = vmul.f32 0.025, %v631_v2  ;;  %v650_v62 = vsel %vm160_vm4, %v644_v0, 0.0  ;;  %v643_v15 = vmul.f32 %v639_v57, %v639_v57 }
 0x49a   :  { %v642_v7 = vsub.f32 %v622_v47, %v638_v16  ;;  %651 = vadd.xlane.f32.xlu1 %v650_v62 }
 0x49b   :  { %v641_v8 = vsub.f32 %v621_v44, %v637_v5  ;;  %v647_v9 = vsel %vm160_vm4, %v643_v15, 0.0 }
 0x49c   :  { %648 = vadd.xlane.f32.xlu0 %v647_v9  ;;  %v646_v12 = vmul.f32 %v642_v7, %v642_v7 }
 0x49d   :  { %v645_v17 = vmul.f32 %v641_v8, %v641_v8 }
 0x49e   :  { %v656_v18 = vsel %vm160_vm4, %v646_v12, 0.0 }
 0x49f   :  { %657 = vadd.xlane.f32.xlu1 %v656_v18  ;;  %v653_v19 = vsel %vm160_vm4, %v645_v17, 0.0 }
 0x4a0   :  { %654 = vadd.xlane.f32.xlu0 %v653_v19 }
 0x527   :  { %v652_v21 = vpop.xlane.xlu1 %651 }
 0x528   :  { %v660_v22 = vmul.f32 0.025, %v652_v21  ;;  %v2418_v21 = vld [vmem:[%s3879_s3 + $0x28] sm:$0xff] }
 0x529   :  { %v649_v23 = vpop.xlane.xlu0 %648 }
 0x52a   :  { %v664_v24 = vadd.f32 1e-05, %v660_v22  ;;  %v659_v3 = vmul.f32 0.025, %v649_v23  ;;  %v2419_v22 = vld [vmem:[%s3879_s3 + $0x30] sm:$0xff] }
 0x52b   :  { %v2786_v23 = vpack.c.bf16 %v2419_v22, %v2418_v21 }
 0x52c   :  { %2893 = vrsqrt.f32 %v664_v24  ;;  %v663_v25 = vadd.f32 1e-05, %v659_v3  ;;  %v658_v26 = vpop.xlane.xlu1 %657  ;;  %v2420_v24 = vld [vmem:[%s3879_s3 + $0x38] sm:$0xff]  ;;  %v2421_v3 = vld [vmem:[%s3879_s3 + $0x40] sm:$0xff] }
 0x52d   :  { %v662_v6 = vmul.f32 0.025, %v658_v26  ;;  %v655_v27 = vpop.xlane.xlu0 %654  ;;  %2787 = vmatprep.subr.bf16.mxu1 %v2786_v23  ;;  %v2422_v26 = vld [vmem:[%s3879_s3 + $0x48] sm:$0xff] }
 0x52e   :  { %2895 = vrsqrt.f32 %v663_v25  ;;  %v661_v28 = vmul.f32 0.025, %v655_v27  ;;  %2789 = vmatpush3.bf16.msra.mxu1 %v2786_v23  ;;  %v2790_v25 = vpack.c.bf16 %v2421_v3, %v2420_v24 }
 0x52f   :  { %v666_v29 = vadd.f32 1e-05, %v662_v6 }
 0x530   :  { %v665_v30 = vadd.f32 1e-05, %v661_v28  ;;  %2791 = vmatprep.subr.bf16.mxu1 %v2790_v25 }
 0x531   :  { %2897 = vrsqrt.f32 %v666_v29 }
 0x532   :  { %2899 = vrsqrt.f32 %v665_v30  ;;  %2793 = vmatpush3.bf16.msra.mxu1 %v2790_v25 }
 0x533   :  { %2637 = vmatprep.subr.mxu1 %v2422_v26 }
 0x536   :  { %v2894_v32 = vpop.eup %2893  ;;  %2638 = vmatpush3.msra.mxu1 %v2422_v26 }
 0x537   :  { %v672_v40 = vmul.f32 %v2894_v32, %v640_v54 }
 0x538   :  { %v2896_v35 = vpop.eup %2895 }
 0x539   :  { %v680_v41 = vmul.f32 %v678_v20, %v672_v40  ;;  %v671_v11 = vmul.f32 %v2896_v35, %v639_v57 }
 0x53b   :  { %v2898_v36 = vpop.eup %2897  ;;  %v3313_v38 = vadd.f32 %v686_v33, %v680_v41  ;;  %v679_v42 = vmul.f32 %v678_v20, %v671_v11 }
 0x53c   :  { %v2900_v39 = vpop.eup %2899  ;;  %v674_v37 = vmul.f32 %v2898_v36, %v642_v7  ;;  %v3355_v36 = vld [vmem:[%s3881_s5 + $0x8] sm:$0xff] }
 0x53d   :  { %v696_v55 = vsel %vm160_vm4, %v3313_v38, 0.0  ;;  %v3317_v50 = vadd.f32 %v686_v33, %v679_v42  ;;  %v673_v43 = vmul.f32 %v2900_v39, %v641_v8  ;;  %v748_v42 = vrot.slane %v3355_v36, %v3135_v60 }
 0x53e   :  { %697 = vadd.xlane.f32.xlu1 %v696_v55  ;;  %v682_v10 = vmul.f32 %v678_v20, %v674_v37  ;;  %v770_v21 = vrot.slane %v3355_v36, %v3178_v34 }
 0x53f   :  { %v693_v61 = vsel %vm160_vm4, %v3317_v50, 0.0  ;;  %v681_v47 = vmul.f32 %v678_v20, %v673_v43  ;;  %v756_v43 = vrot.slane %v3355_v36, %v3143_v63 }
 0x540   :  { %694 = vadd.xlane.f32.xlu0 %v693_v61  ;;  %v3321_v45 = vadd.f32 %v686_v33, %v682_v10 }
 0x541   :  { %v3323_v44 = vadd.f32 %v686_v33, %v681_v47 }
 0x542   :  { %v702_v46 = vsel %vm160_vm4, %v3321_v45, 0.0 }
 0x543   :  { %703 = vadd.xlane.f32.xlu1 %v702_v46  ;;  %v699_v48 = vsel %vm160_vm4, %v3323_v44, 0.0 }
 0x544   :  { %700 = vadd.xlane.f32.xlu0 %v699_v48 }
 0x5cb   :  { %v698_v51 = vpop.xlane.xlu1 %697 }
 0x5cc   :  { %v706_v53 = vmul.f32 0.025, %v698_v51 }
 0x5cd   :  { %v695_v49 = vpop.xlane.xlu0 %694 }
 0x5ce   :  { %v710_v54 = vsub.f32 %v3313_v38, %v706_v53  ;;  %v705_v56 = vmul.f32 0.025, %v695_v49 }
 0x5d0   :  { %v709_v57 = vsub.f32 %v3317_v50, %v705_v56  ;;  %v704_v59 = vpop.xlane.xlu1 %703  ;;  %v714_v0 = vmul.f32 %v710_v54, %v710_v54 }
 0x5d1   :  { %v708_v16 = vmul.f32 0.025, %v704_v59  ;;  %v701_v2 = vpop.xlane.xlu0 %700 }
 0x5d2   :  { %v707_v5 = vmul.f32 0.025, %v701_v2  ;;  %v720_v62 = vsel %vm160_vm4, %v714_v0, 0.0  ;;  %v713_v15 = vmul.f32 %v709_v57, %v709_v57  ;;  %v2428_v2 = vld [vmem:[%s3880_s4 + $0x48] sm:$0xff] }
 0x5d3   :  { %v712_v7 = vsub.f32 %v3321_v45, %v708_v16  ;;  %721 = vadd.xlane.f32.xlu1 %v720_v62  ;;  %v2429_v62 = vld [vmem:[%s3880_s4 + $0x50] sm:$0xff] }
 0x5d4   :  { %v711_v8 = vsub.f32 %v3323_v44, %v707_v5  ;;  %v717_v9 = vsel %vm160_vm4, %v713_v15, 0.0  ;;  %v2430_v15 = vld [vmem:[%s3880_s4 + $0x58] sm:$0xff] }
 0x5d5   :  { %718 = vadd.xlane.f32.xlu0 %v717_v9  ;;  %v716_v12 = vmul.f32 %v712_v7, %v712_v7  ;;  %v2432_v9 = vld [vmem:[%s3880_s4 + $0x68] sm:$0xff] }
 0x5d6   :  { %v715_v17 = vmul.f32 %v711_v8, %v711_v8 }
 0x5d7   :  { %v726_v18 = vsel %vm160_vm4, %v716_v12, 0.0 }
 0x5d8   :  { %727 = vadd.xlane.f32.xlu1 %v726_v18  ;;  %v723_v19 = vsel %vm160_vm4, %v715_v17, 0.0  ;;  %v2433_v17 = vld [vmem:[%s3880_s4 + $0x70] sm:$0xff]  ;;  %v2434_v18 = vld [vmem:[%s3880_s4 + $0x78] sm:$0xff] }
 0x5d9   :  { %724 = vadd.xlane.f32.xlu0 %v723_v19  ;;  %v2806_v19 = vpack.c.bf16 %v2434_v18, %v2433_v17 }
 0x660   :  { %v722_v6 = vpop.xlane.xlu1 %721 }
 0x661   :  { %v730_v27 = vmul.f32 0.025, %v722_v6 }
 0x662   :  { %v719_v28 = vpop.xlane.xlu0 %718 }
 0x663   :  { %v734_v29 = vadd.f32 1e-05, %v730_v27  ;;  %v729_v30 = vmul.f32 0.025, %v719_v28 }
 0x665   :  { %2901 = vrsqrt.f32 %v734_v29  ;;  %v733_v20 = vadd.f32 1e-05, %v729_v30  ;;  %v728_v32 = vpop.xlane.xlu1 %727 }
 0x666   :  { %v732_v40 = vmul.f32 0.025, %v728_v32  ;;  %v725_v33 = vpop.xlane.xlu0 %724 }
 0x667   :  { %2903 = vrsqrt.f32 %v733_v20  ;;  %v731_v35 = vmul.f32 0.025, %v725_v33 }
 0x668   :  { %v736_v41 = vadd.f32 1e-05, %v732_v40 }
 0x669   :  { %v735_v11 = vadd.f32 1e-05, %v731_v35 }
 0x66a   :  { %2905 = vrsqrt.f32 %v736_v41 }
 0x66b   :  { %2907 = vrsqrt.f32 %v735_v11 }
 0x66f   :  { %v2902_v39 = vpop.eup %2901 }
 0x670   :  { %v742_v37 = vmul.f32 %v2902_v39, %v710_v54 }
 0x671   :  { %v2904_v55 = vpop.eup %2903 }
 0x672   :  { %v750_v10 = vmul.f32 %v748_v42, %v742_v37  ;;  %v741_v61 = vmul.f32 %v2904_v55, %v709_v57  ;;  %v2427_v57 = vld [vmem:[%s3880_s4 + $0x40] sm:$0xff] }
 0x673   :  { %v2794_v5 = vpack.c.bf16 %v2428_v2, %v2427_v57 }
 0x674   :  { %v2906_v47 = vpop.eup %2905  ;;  %v749_v46 = vmul.f32 %v748_v42, %v741_v61  ;;  %v758_v51 = vadd.f32 %v756_v43, %v750_v10 }
 0x675   :  { %v2908_v48 = vpop.eup %2907  ;;  %v744_v53 = vmul.f32 %v2906_v47, %v712_v7  ;;  %2795 = vmatprep.subr.bf16.mxu0 %v2794_v5  ;;  %v2798_v7 = vpack.c.bf16 %v2430_v15, %v2429_v62 }
 0x676   :  { %v757_v49 = vadd.f32 %v756_v43, %v749_v46  ;;  %v743_v56 = vmul.f32 %v2908_v48, %v711_v8  ;;  %2797 = vmatpush3.bf16.msra.mxu0 %v2794_v5  ;;  %v2431_v8 = vld [vmem:[%s3880_s4 + $0x60] sm:$0xff] }
 0x677   :  { %v752_v59 = vmul.f32 %v748_v42, %v744_v53  ;;  %2799 = vmatprep.subr.bf16.mxu0 %v2798_v7  ;;  %v2802_v12 = vpack.c.bf16 %v2432_v9, %v2431_v8 }
 0x678   :  { %2639 = vmatprep.mubr.msk.f32.mxu1 %vm160_vm4, %v757_v49  ;;  %v751_v0 = vmul.f32 %v748_v42, %v743_v56 }
 0x679   :  { %2640 = vmatmul.mubr.msk.f32.vlgmr.msra.gmra.mrb[8].mxu1 %vm160_vm4, %v758_v51  ;;  %v760_v54 = vadd.f32 %v756_v43, %v752_v59 }
 0x67a   :  { %v759_v16 = vadd.f32 %v756_v43, %v751_v0  ;;  %2801 = vmatpush3.bf16.msra.mxu0 %v2798_v7 }
 0x67b   :  { %2803 = vmatprep.subr.bf16.mxu0 %v2802_v12 }
 0x67c   :  { %2642 = vmatprep.mubr.msk.f32.mxu1 %vm160_vm4, %v759_v16 }
 0x67d   :  { %2643 = vmatmul.mubr.msk.f32.gmra.mrb[10].mxu1 %vm160_vm4, %v760_v54 }
 0x67e   :  { %2805 = vmatpush3.bf16.msra.mxu0 %v2802_v12 }
 0x67f   :  { %2807 = vmatprep.subr.bf16.mxu0 %v2806_v19 }
 0x682   :  { %2809 = vmatpush3.bf16.msra.mxu0 %v2806_v19 }
 0x74c   :  { %v2641_v22 = vpop.f32.mrb[8].mxu1 }
 0x74d   :  { %v3391_v23 = vadd.f32 %v2641_v22, %v770_v21  ;;  %v849_v24 = vpop.f32.mrb[9].mxu1 }
 0x74e   :  { %v3393_v3 = vadd.f32 %v849_v24, %v770_v21 }
 0x74f   :  { %v3396_v25 = vmul.f32 0.70710677, %v3391_v23 }
 0x750   :  { %v3399_v26 = vmul.f32 0.70710677, %v3393_v3  ;;  %v2644_v6 = vpop.f32.mrb[10].mxu1 }
 0x751   :  { %v877_v27 = vand.u32 2147483647, %v3396_v25  ;;  %v3402_v28 = vadd.f32 %v2644_v6, %v770_v21  ;;  %v859_v29 = vpop.f32.mrb[11].mxu1  ;;  %vm957_vm11 = vcmp.ge.f32.partialorder %v3396_v25, 0.0 }
 0x752   :  { %v876_v30 = vand.u32 2147483647, %v3399_v26  ;;  %v3405_v20 = vadd.f32 %v859_v29, %v770_v21  ;;  %vm956_vm13 = vcmp.ge.f32.partialorder %v3399_v26, 0.0 }
 0x753   :  { %v881_v32 = vmul.f32 0.3275911, %v877_v27  ;;  %v3408_v40 = vmul.f32 0.70710677, %v3402_v28  ;;  %v933_v61 = vsub.f32 0.0, %v877_v27 }
 0x754   :  { %v880_v33 = vmul.f32 0.3275911, %v876_v30  ;;  %v3411_v35 = vmul.f32 0.70710677, %v3405_v20  ;;  %v932_v47 = vsub.f32 0.0, %v876_v30 }
 0x755   :  { %v885_v41 = vadd.f32 1.0, %v881_v32  ;;  %v879_v11 = vand.u32 2147483647, %v3408_v40  ;;  %v937_v48 = vmul.f32 %v933_v61, %v877_v27  ;;  %vm959_vm14 = vcmp.ge.f32.partialorder %v3408_v40, 0.0 }
 0x756   :  { %v884_v42 = vadd.f32 1.0, %v880_v33  ;;  %v878_v39 = vand.u32 2147483647, %v3411_v35  ;;  %v936_v56 = vmul.f32 %v932_v47, %v876_v30  ;;  %vm958_vm0 = vcmp.ge.f32.partialorder %v3411_v35, 0.0 }
 0x757   :  { %2909 = vrcp.f32 %v885_v41  ;;  %v883_v37 = vmul.f32 0.3275911, %v879_v11  ;;  %v935_v51 = vsub.f32 0.0, %v879_v11  ;;  %v942_v57 = vmul.f32 1.442695, %v937_v48 }
 0x758   :  { %2911 = vrcp.f32 %v884_v42  ;;  %v882_v55 = vmul.f32 0.3275911, %v878_v39  ;;  %v934_v59 = vsub.f32 0.0, %v878_v39  ;;  %v940_v7 = vmul.f32 1.442695, %v936_v56 }
 0x759   :  { %v887_v43 = vadd.f32 1.0, %v883_v37  ;;  %v939_v5 = vmul.f32 %v935_v51, %v879_v11  ;;  %v988_v40 = vrot.slane %v3355_v36, %v3219_v52 }
 0x75a   :  { %v886_v10 = vadd.f32 1.0, %v882_v55  ;;  %v938_v9 = vmul.f32 %v934_v59, %v878_v39 }
 0x75b   :  { %2913 = vrcp.f32 %v887_v43  ;;  %v946_v22 = vmul.f32 1.442695, %v939_v5 }
 0x75c   :  { %2915 = vrcp.f32 %v886_v10  ;;  %v944_v29 = vmul.f32 1.442695, %v938_v9 }
 0x75d   :  { %2917 = vpow2.f32 %v942_v57 }
 0x75e   :  { %2919 = vpow2.f32 %v940_v7 }
 0x75f   :  { %2921 = vpow2.f32 %v946_v22 }
 0x760   :  { %2923 = vpow2.f32 %v944_v29 }
 0x761   :  { %v2910_v46 = vpop.eup %2909 }
 0x762   :  { %v2912_v53 = vpop.eup %2911  ;;  %v897_v49 = vmul.f32 1.0614054, %v2910_v46 }
 0x763   :  { %v896_v0 = vmul.f32 1.0614054, %v2912_v53 }
 0x764   :  { %v901_v54 = vadd.f32 -1.4531521, %v897_v49 }
 0x765   :  { %v2914_v16 = vpop.eup %2913  ;;  %v900_v2 = vadd.f32 -1.4531521, %v896_v0 }
 0x766   :  { %v2916_v62 = vpop.eup %2915  ;;  %v905_v15 = vmul.f32 %v2910_v46, %v901_v54  ;;  %v899_v8 = vmul.f32 1.0614054, %v2914_v16 }
 0x767   :  { %v904_v12 = vmul.f32 %v2912_v53, %v900_v2  ;;  %v898_v17 = vmul.f32 1.0614054, %v2916_v62  ;;  %v2918_v56 = vpop.eup %2917 }
 0x768   :  { %v909_v18 = vadd.f32 1.4214138, %v905_v15  ;;  %v903_v19 = vadd.f32 -1.4531521, %v899_v8  ;;  %v2920_v54 = vpop.eup %2919 }
 0x769   :  { %v908_v21 = vadd.f32 1.4214138, %v904_v12  ;;  %v902_v24 = vadd.f32 -1.4531521, %v898_v17  ;;  %v2922_v9 = vpop.eup %2921 }
 0x76a   :  { %v913_v6 = vmul.f32 %v2910_v46, %v909_v18  ;;  %v907_v27 = vmul.f32 %v2914_v16, %v903_v19  ;;  %v2924_v18 = vpop.eup %2923 }
 0x76b   :  { %v912_v30 = vmul.f32 %v2912_v53, %v908_v21  ;;  %v906_v32 = vmul.f32 %v2916_v62, %v902_v24 }
 0x76c   :  { %v917_v33 = vadd.f32 -0.28449672, %v913_v6  ;;  %v911_v41 = vadd.f32 1.4214138, %v907_v27 }
 0x76d   :  { %v916_v11 = vadd.f32 -0.28449672, %v912_v30  ;;  %v910_v42 = vadd.f32 1.4214138, %v906_v32  ;;  %v868_v30 = vmul.f32 0.5, %v3393_v3  ;;  %v871_v3 = vmul.f32 0.5, %v3402_v28 }
 0x76e   :  { %v921_v39 = vmul.f32 %v2910_v46, %v917_v33  ;;  %v915_v37 = vmul.f32 %v2914_v16, %v911_v41 }
 0x76f   :  { %v920_v55 = vmul.f32 %v2912_v53, %v916_v11  ;;  %v914_v43 = vmul.f32 %v2916_v62, %v910_v42 }
 0x770   :  { %v925_v10 = vadd.f32 0.2548296, %v921_v39  ;;  %v919_v61 = vadd.f32 -0.28449672, %v915_v37  ;;  %v870_v39 = vmul.f32 0.5, %v3405_v20 }
 0x771   :  { %v924_v47 = vadd.f32 0.2548296, %v920_v55  ;;  %v918_v48 = vadd.f32 -0.28449672, %v914_v43 }
 0x772   :  { %v929_v51 = vmul.f32 %v2910_v46, %v925_v10  ;;  %v923_v49 = vmul.f32 %v2914_v16, %v919_v61 }
 0x773   :  { %v928_v59 = vmul.f32 %v2912_v53, %v924_v47  ;;  %v922_v0 = vmul.f32 %v2916_v62, %v918_v48 }
 0x774   :  { %v949_v57 = vmul.f32 %v2918_v56, %v929_v51  ;;  %v927_v2 = vadd.f32 0.2548296, %v923_v49 }
 0x775   :  { %v948_v5 = vmul.f32 %v2920_v54, %v928_v59  ;;  %v926_v15 = vadd.f32 0.2548296, %v922_v0 }
 0x776   :  { %v953_v7 = vsub.f32 1.0, %v949_v57  ;;  %v931_v8 = vmul.f32 %v2914_v16, %v927_v2 }
 0x777   :  { %v952_v12 = vsub.f32 1.0, %v948_v5  ;;  %v930_v17 = vmul.f32 %v2916_v62, %v926_v15  ;;  %v869_v62 = vmul.f32 0.5, %v3391_v23 }
 0x778   :  { %v961_v19 = vsub.f32 0.0, %v953_v7  ;;  %v951_v21 = vmul.f32 %v2922_v9, %v931_v8 }
 0x779   :  { %v960_v46 = vsub.f32 0.0, %v952_v12  ;;  %v950_v22 = vmul.f32 %v2924_v18, %v930_v17 }
 0x77a   :  { %v965_v24 = vsel %vm957_vm11, %v953_v7, %v961_v19  ;;  %v955_v53 = vsub.f32 1.0, %v951_v21 }
 0x77b   :  { %v969_v6 = vadd.f32 1.0, %v965_v24  ;;  %v964_v27 = vsel %vm956_vm13, %v952_v12, %v960_v46  ;;  %v954_v29 = vsub.f32 1.0, %v950_v22 }
 0x77c   :  { %v968_v16 = vadd.f32 1.0, %v964_v27  ;;  %v963_v32 = vsub.f32 0.0, %v955_v53 }
 0x77d   :  { %v962_v33 = vsub.f32 0.0, %v954_v29  ;;  %v973_v11 = vmul.f32 %v969_v6, %v869_v62 }
 0x77e   :  { %v972_v41 = vmul.f32 %v968_v16, %v868_v30  ;;  %v967_v25 = vsel %vm959_vm14, %v955_v53, %v963_v32 }
 0x77f   :  { %v971_v42 = vadd.f32 1.0, %v967_v25  ;;  %v966_v26 = vsel %vm958_vm0, %v954_v29, %v962_v33 }
 0x780   :  { %v970_v37 = vadd.f32 1.0, %v966_v26  ;;  %2661 = vmatprep.mubr.msk.f32.mxu0 %vm456_vm8, %v972_v41 }
 0x781   :  { %2662 = vmatmul.mubr.msk.f32.vlgmr.msra.gmra.mrb[4].mxu0 %vm456_vm8, %v973_v11  ;;  %v975_v55 = vmul.f32 %v971_v42, %v871_v3 }
 0x782   :  { %v974_v23 = vmul.f32 %v970_v37, %v870_v39 }
 0x784   :  { %2664 = vmatprep.mubr.msk.f32.mxu0 %vm456_vm8, %v974_v23 }
 0x785   :  { %2665 = vmatmul.mubr.msk.f32.gmra.mrb[6].mxu0 %vm456_vm8, %v975_v55 }
 0x854   :  { %v2663_v35 = vpop.f32.mrb[4].mxu0 }
 0x855   :  { %v1073_v43 = vadd.f32 %v2663_v35, %v988_v40  ;;  %v1067_v10 = vpop.f32.mrb[5].mxu0 }
 0x856   :  { %v1068_v20 = vadd.f32 %v1067_v10, %v988_v40 }
 0x857   :  { %v1091_v61 = vrot.slane %v1073_v43, 1  ;;  %v1109_v47 = vrot.slane %v1073_v43, 2  ;;  %v1127_v48 = vrot.slane %v1073_v43, 4 }
 0x858   :  { %v1090_v51 = vrot.slane %v1068_v20, 1  ;;  %v1108_v28 = vrot.slane %v1068_v20, 2  ;;  %v2666_v49 = vpop.f32.mrb[6].mxu0  ;;  %v1126_v56 = vrot.slane %v1068_v20, 4 }
 0x859   :  { %v1083_v59 = vadd.f32 %v2666_v49, %v988_v40  ;;  %v1077_v0 = vpop.f32.mrb[7].mxu0 }
 0x85a   :  { %v1078_v54 = vadd.f32 %v1077_v0, %v988_v40  ;;  %v1102_v57 = vsel %vm558_vm12, %v1091_v61, %v1090_v51  ;;  %v1120_v2 = vsel %vm577_vm15, %v1109_v47, %v1108_v28  ;;  %v1138_v5 = vsel %vm596_vm2, %v1127_v48, %v1126_v56 }
 0x85b   :  { %v1094_v15 = vrot.slane %v1083_v59, 1  ;;  %v1112_v7 = vrot.slane %v1083_v59, 2  ;;  %v1105_v8 = vsel %vm3226_vm5, %v1102_v57, %v1073_v43  ;;  %v1092_v9 = vsel %vm558_vm12, %v1090_v51, %v1091_v61 }
 0x85c   :  { %v1093_v12 = vrot.slane %v1078_v54, 1  ;;  %v1111_v17 = vrot.slane %v1078_v54, 2  ;;  %v1123_v18 = vsel %vm3232_vm7, %v1120_v2, %v1105_v8  ;;  %v1104_v19 = vsel %vm3226_vm5, %v1092_v9, %v1068_v20 }
 0x85d   :  { %v1141_v21 = vsel %vm3238_vm9, %v1138_v5, %v1123_v18  ;;  %v1110_v46 = vsel %vm577_vm15, %v1108_v28, %v1109_v47  ;;  %v1128_v22 = vsel %vm596_vm2, %v1126_v56, %v1127_v48  ;;  %v1129_v24 = vrot.slane %v1078_v54, 4 }
 0x85e   :  { %v1145_v53 = vsel %vm3246_vm10, %v1068_v20, %v1141_v21  ;;  %v1122_v6 = vsel %vm3232_vm7, %v1110_v46, %v1104_v19  ;;  %v1103_v27 = vsel %vm558_vm12, %v1094_v15, %v1093_v12  ;;  %v1121_v29 = vsel %vm577_vm15, %v1112_v7, %v1111_v17 }
 0x85f   :  { %v1149_v30 = vadd.f32 %v1145_v53, %v3313_v38  ;;  %v1140_v16 = vsel %vm3238_vm9, %v1128_v22, %v1122_v6  ;;  %v1107_v32 = vsel %vm3226_vm5, %v1103_v27, %v1083_v59  ;;  %v1130_v62 = vrot.slane %v1083_v59, 4 }
 0x860   :  { %v1144_v33 = vsel %vm3246_vm10, %v1073_v43, %v1140_v16  ;;  %v1125_v41 = vsel %vm3232_vm7, %v1121_v29, %v1107_v32  ;;  %v1095_v25 = vsel %vm558_vm12, %v1093_v12, %v1094_v15  ;;  %v1113_v11 = vsel %vm577_vm15, %v1111_v17, %v1112_v7 }
 0x861   :  { %v1155_v42 = vsel %vm160_vm4, %v1149_v30, 0.0  ;;  %v1148_v38 = vadd.f32 %v1144_v33, %v3317_v50  ;;  %v1139_v26 = vsel %vm596_vm2, %v1130_v62, %v1129_v24  ;;  %v1106_v39 = vsel %vm3226_vm5, %v1095_v25, %v1078_v54 }
 0x862   :  { %1156 = vadd.xlane.f32.xlu1 %v1155_v42  ;;  %v1143_v37 = vsel %vm3238_vm9, %v1139_v26, %v1125_v41  ;;  %v1124_v3 = vsel %vm3232_vm7, %v1113_v11, %v1106_v39  ;;  %v1131_v23 = vsel %vm596_vm2, %v1129_v24, %v1130_v62  ;;  %v1207_v32 = vrot.slane %v3355_v36, %v3304_v14 }
 0x863   :  { %v1152_v55 = vsel %vm160_vm4, %v1148_v38, 0.0  ;;  %v1147_v40 = vsel %vm3246_vm10, %v1078_v54, %v1143_v37  ;;  %v1142_v50 = vsel %vm3238_vm9, %v1131_v23, %v1124_v3  ;;  %v1215_v41 = vrot.slane %v3355_v36, %v3307_v31 }
 0x864   :  { %1153 = vadd.xlane.f32.xlu0 %v1152_v55  ;;  %v1151_v35 = vadd.f32 %v1147_v40, %v3321_v45  ;;  %v1146_v43 = vsel %vm3246_vm10, %v1083_v59, %v1142_v50 }
 0x865   :  { %v1150_v10 = vadd.f32 %v1146_v43, %v3323_v44 }
 0x866   :  { %v1161_v20 = vsel %vm160_vm4, %v1151_v35, 0.0 }
 0x867   :  { %1162 = vadd.xlane.f32.xlu1 %v1161_v20  ;;  %v1158_v61 = vsel %vm160_vm4, %v1150_v10, 0.0 }
 0x868   :  { %1159 = vadd.xlane.f32.xlu0 %v1158_v61 }
 0x8ef   :  { %v1157_v47 = vpop.xlane.xlu1 %1156 }
 0x8f0   :  { %v1165_v48 = vmul.f32 0.025, %v1157_v47 }
 0x8f1   :  { %v1154_v51 = vpop.xlane.xlu0 %1153 }
 0x8f2   :  { %v1169_v28 = vsub.f32 %v1149_v30, %v1165_v48  ;;  %v1164_v49 = vmul.f32 0.025, %v1154_v51 }
 0x8f4   :  { %v1168_v56 = vsub.f32 %v1148_v38, %v1164_v49  ;;  %v1163_v0 = vpop.xlane.xlu1 %1162  ;;  %v1173_v54 = vmul.f32 %v1169_v28, %v1169_v28 }
 0x8f5   :  { %v1167_v45 = vmul.f32 0.025, %v1163_v0  ;;  %v1160_v57 = vpop.xlane.xlu0 %1159 }
 0x8f6   :  { %v1166_v2 = vmul.f32 0.025, %v1160_v57  ;;  %v1179_v59 = vsel %vm160_vm4, %v1173_v54, 0.0  ;;  %v1172_v44 = vmul.f32 %v1168_v56, %v1168_v56 }
 0x8f7   :  { %v1171_v5 = vsub.f32 %v1151_v35, %v1167_v45  ;;  %1180 = vadd.xlane.f32.xlu1 %v1179_v59 }
 0x8f8   :  { %v1170_v15 = vsub.f32 %v1150_v10, %v1166_v2  ;;  %v1176_v7 = vsel %vm160_vm4, %v1172_v44, 0.0 }
 0x8f9   :  { %1177 = vadd.xlane.f32.xlu0 %v1176_v7  ;;  %v1175_v8 = vmul.f32 %v1171_v5, %v1171_v5 }
 0x8fa   :  { %v1174_v9 = vmul.f32 %v1170_v15, %v1170_v15 }
 0x8fb   :  { %v1185_v12 = vsel %vm160_vm4, %v1175_v8, 0.0 }
 0x8fc   :  { %1186 = vadd.xlane.f32.xlu1 %v1185_v12  ;;  %v1182_v17 = vsel %vm160_vm4, %v1174_v9, 0.0 }
 0x8fd   :  { %1183 = vadd.xlane.f32.xlu0 %v1182_v17 }
 0x984   :  { %v1181_v18 = vpop.xlane.xlu1 %1180 }
 0x985   :  { %v1189_v19 = vmul.f32 0.025, %v1181_v18  ;;  %v2440_v18 = vld [vmem:[%s3879_s3 + $0x50] sm:$0xff] }
 0x986   :  { %v1178_v21 = vpop.xlane.xlu0 %1177 }
 0x987   :  { %v1193_v46 = vadd.f32 1e-05, %v1189_v19  ;;  %v1188_v22 = vmul.f32 0.025, %v1178_v21  ;;  %v2441_v19 = vld [vmem:[%s3879_s3 + $0x58] sm:$0xff] }
 0x988   :  { %v2810_v21 = vpack.c.bf16 %v2441_v19, %v2440_v18 }
 0x989   :  { %2925 = vrsqrt.f32 %v1193_v46  ;;  %v1192_v24 = vadd.f32 1e-05, %v1188_v22  ;;  %v1187_v53 = vpop.xlane.xlu1 %1186  ;;  %v2442_v46 = vld [vmem:[%s3879_s3 + $0x60] sm:$0xff]  ;;  %v2443_v22 = vld [vmem:[%s3879_s3 + $0x68] sm:$0xff] }
 0x98a   :  { %v1191_v6 = vmul.f32 0.025, %v1187_v53  ;;  %v1184_v27 = vpop.xlane.xlu0 %1183  ;;  %2811 = vmatprep.subr.bf16.mxu1 %v2810_v21  ;;  %v2444_v53 = vld [vmem:[%s3879_s3 + $0x70] sm:$0xff] }
 0x98b   :  { %2927 = vrsqrt.f32 %v1192_v24  ;;  %v1190_v29 = vmul.f32 0.025, %v1184_v27  ;;  %2813 = vmatpush3.bf16.msra.mxu1 %v2810_v21  ;;  %v2814_v24 = vpack.c.bf16 %v2443_v22, %v2442_v46 }
 0x98c   :  { %v1195_v30 = vadd.f32 1e-05, %v1191_v6 }
 0x98d   :  { %v1194_v16 = vadd.f32 1e-05, %v1190_v29  ;;  %2815 = vmatprep.subr.bf16.mxu1 %v2814_v24 }
 0x98e   :  { %2929 = vrsqrt.f32 %v1195_v30 }
 0x98f   :  { %2931 = vrsqrt.f32 %v1194_v16  ;;  %2817 = vmatpush3.bf16.msra.mxu1 %v2814_v24 }
 0x990   :  { %2675 = vmatprep.subr.mxu1 %v2444_v53 }
 0x993   :  { %v2926_v62 = vpop.eup %2925  ;;  %2676 = vmatpush3.msra.mxu1 %v2444_v53 }
 0x994   :  { %v1201_v33 = vmul.f32 %v2926_v62, %v1169_v28 }
 0x995   :  { %v2928_v25 = vpop.eup %2927 }
 0x996   :  { %v1209_v11 = vmul.f32 %v1207_v32, %v1201_v33  ;;  %v1200_v42 = vmul.f32 %v2928_v25, %v1168_v56 }
 0x998   :  { %v2930_v38 = vpop.eup %2929  ;;  %v3489_v26 = vadd.f32 %v1215_v41, %v1209_v11  ;;  %v1208_v39 = vmul.f32 %v1207_v32, %v1200_v42 }
 0x999   :  { %v2932_v37 = vpop.eup %2931  ;;  %v1203_v3 = vmul.f32 %v2930_v38, %v1171_v5  ;;  %v3531_v38 = vld [vmem:[%s3881_s5 + $0x10] sm:$0xff] }
 0x99a   :  { %v1225_v23 = vsel %vm160_vm4, %v3489_v26, 0.0  ;;  %v3493_v55 = vadd.f32 %v1215_v41, %v1208_v39  ;;  %v1202_v40 = vmul.f32 %v2932_v37, %v1170_v15  ;;  %v1277_v39 = vrot.slane %v3531_v38, %v3135_v60 }
 0x99b   :  { %1226 = vadd.xlane.f32.xlu1 %v1225_v23  ;;  %v1211_v50 = vmul.f32 %v1207_v32, %v1203_v3  ;;  %v1299_v18 = vrot.slane %v3531_v38, %v3178_v34 }
 0x99c   :  { %v1222_v36 = vsel %vm160_vm4, %v3493_v55, 0.0  ;;  %v1210_v35 = vmul.f32 %v1207_v32, %v1202_v40  ;;  %v1285_v40 = vrot.slane %v3531_v38, %v3143_v63 }
 0x99d   :  { %1223 = vadd.xlane.f32.xlu0 %v1222_v36  ;;  %v3497_v43 = vadd.f32 %v1215_v41, %v1211_v50 }
 0x99e   :  { %v3499_v10 = vadd.f32 %v1215_v41, %v1210_v35 }
 0x99f   :  { %v1231_v20 = vsel %vm160_vm4, %v3497_v43, 0.0 }
 0x9a0   :  { %1232 = vadd.xlane.f32.xlu1 %v1231_v20  ;;  %v1228_v61 = vsel %vm160_vm4, %v3499_v10, 0.0 }
 0x9a1   :  { %1229 = vadd.xlane.f32.xlu0 %v1228_v61 }
 0xa28   :  { %v1227_v47 = vpop.xlane.xlu1 %1226 }
 0xa29   :  { %v1235_v48 = vmul.f32 0.025, %v1227_v47 }
 0xa2a   :  { %v1224_v51 = vpop.xlane.xlu0 %1223 }
 0xa2b   :  { %v1239_v28 = vsub.f32 %v3489_v26, %v1235_v48  ;;  %v1234_v49 = vmul.f32 0.025, %v1224_v51 }
 0xa2d   :  { %v1238_v56 = vsub.f32 %v3493_v55, %v1234_v49  ;;  %v1233_v0 = vpop.xlane.xlu1 %1232  ;;  %v1243_v54 = vmul.f32 %v1239_v28, %v1239_v28 }
 0xa2e   :  { %v1237_v45 = vmul.f32 0.025, %v1233_v0  ;;  %v1230_v57 = vpop.xlane.xlu0 %1229 }
 0xa2f   :  { %v1236_v2 = vmul.f32 0.025, %v1230_v57  ;;  %v1249_v59 = vsel %vm160_vm4, %v1243_v54, 0.0  ;;  %v1242_v44 = vmul.f32 %v1238_v56, %v1238_v56  ;;  %v2450_v57 = vld [vmem:[%s3880_s4 + $0x88] sm:$0xff] }
 0xa30   :  { %v1241_v5 = vsub.f32 %v3497_v43, %v1237_v45  ;;  %1250 = vadd.xlane.f32.xlu1 %v1249_v59  ;;  %v2451_v59 = vld [vmem:[%s3880_s4 + $0x90] sm:$0xff] }
 0xa31   :  { %v1240_v15 = vsub.f32 %v3499_v10, %v1236_v2  ;;  %v1246_v7 = vsel %vm160_vm4, %v1242_v44, 0.0  ;;  %v2452_v44 = vld [vmem:[%s3880_s4 + $0x98] sm:$0xff] }
 0xa32   :  { %1247 = vadd.xlane.f32.xlu0 %v1246_v7  ;;  %v1245_v8 = vmul.f32 %v1241_v5, %v1241_v5  ;;  %v2454_v7 = vld [vmem:[%s3880_s4 + $0xa8] sm:$0xff] }
 0xa33   :  { %v1244_v9 = vmul.f32 %v1240_v15, %v1240_v15 }
 0xa34   :  { %v1255_v12 = vsel %vm160_vm4, %v1245_v8, 0.0 }
 0xa35   :  { %1256 = vadd.xlane.f32.xlu1 %v1255_v12  ;;  %v1252_v17 = vsel %vm160_vm4, %v1244_v9, 0.0  ;;  %v2455_v9 = vld [vmem:[%s3880_s4 + $0xb0] sm:$0xff]  ;;  %v2456_v12 = vld [vmem:[%s3880_s4 + $0xb8] sm:$0xff] }
 0xa36   :  { %1253 = vadd.xlane.f32.xlu0 %v1252_v17  ;;  %v2830_v17 = vpack.c.bf16 %v2456_v12, %v2455_v9 }
 0xabd   :  { %v1251_v6 = vpop.xlane.xlu1 %1250 }
 0xabe   :  { %v1259_v27 = vmul.f32 0.025, %v1251_v6 }
 0xabf   :  { %v1248_v29 = vpop.xlane.xlu0 %1247 }
 0xac0   :  { %v1263_v30 = vadd.f32 1e-05, %v1259_v27  ;;  %v1258_v16 = vmul.f32 0.025, %v1248_v29 }
 0xac2   :  { %2933 = vrsqrt.f32 %v1263_v30  ;;  %v1262_v32 = vadd.f32 1e-05, %v1258_v16  ;;  %v1257_v62 = vpop.xlane.xlu1 %1256 }
 0xac3   :  { %v1261_v33 = vmul.f32 0.025, %v1257_v62  ;;  %v1254_v41 = vpop.xlane.xlu0 %1253 }
 0xac4   :  { %2935 = vrsqrt.f32 %v1262_v32  ;;  %v1260_v25 = vmul.f32 0.025, %v1254_v41 }
 0xac5   :  { %v1265_v11 = vadd.f32 1e-05, %v1261_v33 }
 0xac6   :  { %v1264_v42 = vadd.f32 1e-05, %v1260_v25 }
 0xac7   :  { %2937 = vrsqrt.f32 %v1265_v11 }
 0xac8   :  { %2939 = vrsqrt.f32 %v1264_v42 }
 0xacc   :  { %v2934_v37 = vpop.eup %2933 }
 0xacd   :  { %v1271_v3 = vmul.f32 %v2934_v37, %v1239_v28 }
 0xace   :  { %v2936_v23 = vpop.eup %2935 }
 0xacf   :  { %v1279_v50 = vmul.f32 %v1277_v39, %v1271_v3  ;;  %v1270_v36 = vmul.f32 %v2936_v23, %v1238_v56  ;;  %v2449_v56 = vld [vmem:[%s3880_s4 + $0x80] sm:$0xff] }
 0xad0   :  { %v2818_v2 = vpack.c.bf16 %v2450_v57, %v2449_v56 }
 0xad1   :  { %v2938_v35 = vpop.eup %2937  ;;  %v1278_v20 = vmul.f32 %v1277_v39, %v1270_v36  ;;  %v1287_v47 = vadd.f32 %v1285_v40, %v1279_v50 }
 0xad2   :  { %v2940_v61 = vpop.eup %2939  ;;  %v1273_v48 = vmul.f32 %v2938_v35, %v1241_v5  ;;  %2819 = vmatprep.subr.bf16.mxu1 %v2818_v2  ;;  %v2822_v5 = vpack.c.bf16 %v2452_v44, %v2451_v59 }
 0xad3   :  { %v1286_v51 = vadd.f32 %v1285_v40, %v1278_v20  ;;  %v1272_v49 = vmul.f32 %v2940_v61, %v1240_v15  ;;  %v2453_v15 = vld [vmem:[%s3880_s4 + $0xa0] sm:$0xff] }
 0xad4   :  { %v1281_v0 = vmul.f32 %v1277_v39, %v1273_v48  ;;  %v2826_v8 = vpack.c.bf16 %v2454_v7, %v2453_v15 }
 0xad5   :  { %2677 = vmatprep.mubr.msk.f32.mxu1 %vm160_vm4, %v1286_v51  ;;  %v1280_v54 = vmul.f32 %v1277_v39, %v1272_v49 }
 0xad6   :  { %2678 = vmatmul.mubr.msk.f32.vlgmr.msra.gmra.mrb[12].mxu1 %vm160_vm4, %v1287_v47  ;;  %v1289_v28 = vadd.f32 %v1285_v40, %v1281_v0 }
 0xad7   :  { %v1288_v45 = vadd.f32 %v1285_v40, %v1280_v54  ;;  %2821 = vmatpush3.bf16.msra.mxu1 %v2818_v2 }
 0xad8   :  { %2823 = vmatprep.subr.bf16.mxu1 %v2822_v5 }
 0xad9   :  { %2680 = vmatprep.mubr.msk.f32.mxu1 %vm160_vm4, %v1288_v45 }
 0xada   :  { %2681 = vmatmul.mubr.msk.f32.gmra.mrb[14].mxu1 %vm160_vm4, %v1289_v28 }
 0xadb   :  { %2825 = vmatpush3.bf16.msra.mxu1 %v2822_v5 }
 0xadc   :  { %2827 = vmatprep.subr.bf16.mxu1 %v2826_v8 }
 0xadf   :  { %2829 = vmatpush3.bf16.msra.mxu1 %v2826_v8 }
 0xae0   :  { %2831 = vmatprep.subr.bf16.mxu1 %v2830_v17 }
 0xae3   :  { %2833 = vmatpush3.bf16.msra.mxu1 %v2830_v17 }
 0xba9   :  { %v2679_v19 = vpop.f32.mrb[12].mxu1 }
 0xbaa   :  { %v3567_v21 = vadd.f32 %v2679_v19, %v1299_v18  ;;  %v1378_v46 = vpop.f32.mrb[13].mxu1 }
 0xbab   :  { %v3569_v22 = vadd.f32 %v1378_v46, %v1299_v18 }
 0xbac   :  { %v3572_v24 = vmul.f32 0.70710677, %v3567_v21 }
 0xbad   :  { %v3575_v53 = vmul.f32 0.70710677, %v3569_v22  ;;  %v2682_v6 = vpop.f32.mrb[14].mxu1 }
 0xbae   :  { %v1406_v27 = vand.u32 2147483647, %v3572_v24  ;;  %v3578_v29 = vadd.f32 %v2682_v6, %v1299_v18  ;;  %v1388_v30 = vpop.f32.mrb[15].mxu1  ;;  %vm1486_vm1 = vcmp.ge.f32.partialorder %v3572_v24, 0.0 }
 0xbaf   :  { %v1405_v16 = vand.u32 2147483647, %v3575_v53  ;;  %v3581_v32 = vadd.f32 %v1388_v30, %v1299_v18  ;;  %vm1485_vm3 = vcmp.ge.f32.partialorder %v3575_v53, 0.0 }
 0xbb0   :  { %v1410_v62 = vmul.f32 0.3275911, %v1406_v27  ;;  %v3584_v33 = vmul.f32 0.70710677, %v3578_v29  ;;  %v1462_v36 = vsub.f32 0.0, %v1406_v27 }
 0xbb1   :  { %v1409_v41 = vmul.f32 0.3275911, %v1405_v16  ;;  %v3587_v25 = vmul.f32 0.70710677, %v3581_v32  ;;  %v1461_v35 = vsub.f32 0.0, %v1405_v16 }
 0xbb2   :  { %v1414_v11 = vadd.f32 1.0, %v1410_v62  ;;  %v1408_v42 = vand.u32 2147483647, %v3584_v33  ;;  %v1466_v61 = vmul.f32 %v1462_v36, %v1406_v27  ;;  %vm1488_vm6 = vcmp.ge.f32.partialorder %v3584_v33, 0.0 }
 0xbb3   :  { %v1413_v39 = vadd.f32 1.0, %v1409_v41  ;;  %v1407_v37 = vand.u32 2147483647, %v3587_v25  ;;  %v1465_v49 = vmul.f32 %v1461_v35, %v1405_v16  ;;  %vm1487_vm11 = vcmp.ge.f32.partialorder %v3587_v25, 0.0 }
 0xbb4   :  { %2941 = vrcp.f32 %v1414_v11  ;;  %v1412_v3 = vmul.f32 0.3275911, %v1408_v42  ;;  %v1464_v47 = vsub.f32 0.0, %v1408_v42  ;;  %v1471_v56 = vmul.f32 1.442695, %v1466_v61 }
 0xbb5   :  { %2943 = vrcp.f32 %v1413_v39  ;;  %v1411_v23 = vmul.f32 0.3275911, %v1407_v37  ;;  %v1463_v0 = vsub.f32 0.0, %v1407_v37  ;;  %v1469_v5 = vmul.f32 1.442695, %v1465_v49 }
 0xbb6   :  { %v1416_v40 = vadd.f32 1.0, %v1412_v3  ;;  %v1468_v2 = vmul.f32 %v1464_v47, %v1408_v42  ;;  %v1517_v33 = vrot.slane %v3531_v38, %v3219_v52 }
 0xbb7   :  { %v1415_v50 = vadd.f32 1.0, %v1411_v23  ;;  %v1467_v7 = vmul.f32 %v1463_v0, %v1407_v37 }
 0xbb8   :  { %2945 = vrcp.f32 %v1416_v40  ;;  %v1475_v19 = vmul.f32 1.442695, %v1468_v2 }
 0xbb9   :  { %2947 = vrcp.f32 %v1415_v50  ;;  %v1473_v30 = vmul.f32 1.442695, %v1467_v7 }
 0xbba   :  { %2949 = vpow2.f32 %v1471_v56 }
 0xbbb   :  { %2951 = vpow2.f32 %v1469_v5 }
 0xbbc   :  { %2953 = vpow2.f32 %v1475_v19 }
 0xbbd   :  { %2955 = vpow2.f32 %v1473_v30 }
 0xbbe   :  { %v2942_v20 = vpop.eup %2941 }
 0xbbf   :  { %v2944_v48 = vpop.eup %2943  ;;  %v1426_v51 = vmul.f32 1.0614054, %v2942_v20 }
 0xbc0   :  { %v1425_v54 = vmul.f32 1.0614054, %v2944_v48 }
 0xbc1   :  { %v1430_v28 = vadd.f32 -1.4531521, %v1426_v51 }
 0xbc2   :  { %v2946_v45 = vpop.eup %2945  ;;  %v1429_v57 = vadd.f32 -1.4531521, %v1425_v54 }
 0xbc3   :  { %v2948_v59 = vpop.eup %2947  ;;  %v1434_v44 = vmul.f32 %v2942_v20, %v1430_v28  ;;  %v1428_v15 = vmul.f32 1.0614054, %v2946_v45 }
 0xbc4   :  { %v1433_v8 = vmul.f32 %v2944_v48, %v1429_v57  ;;  %v1427_v9 = vmul.f32 1.0614054, %v2948_v59  ;;  %v2950_v49 = vpop.eup %2949 }
 0xbc5   :  { %v1438_v12 = vadd.f32 1.4214138, %v1434_v44  ;;  %v1432_v17 = vadd.f32 -1.4531521, %v1428_v15  ;;  %v2952_v28 = vpop.eup %2951 }
 0xbc6   :  { %v1437_v18 = vadd.f32 1.4214138, %v1433_v8  ;;  %v1431_v46 = vadd.f32 -1.4531521, %v1427_v9  ;;  %v2954_v7 = vpop.eup %2953 }
 0xbc7   :  { %v1442_v6 = vmul.f32 %v2942_v20, %v1438_v12  ;;  %v1436_v27 = vmul.f32 %v2946_v45, %v1432_v17  ;;  %v2956_v12 = vpop.eup %2955 }
 0xbc8   :  { %v1441_v16 = vmul.f32 %v2944_v48, %v1437_v18  ;;  %v1435_v62 = vmul.f32 %v2948_v59, %v1431_v46 }
 0xbc9   :  { %v1446_v41 = vadd.f32 -0.28449672, %v1442_v6  ;;  %v1440_v11 = vadd.f32 1.4214138, %v1436_v27 }
 0xbca   :  { %v1445_v42 = vadd.f32 -0.28449672, %v1441_v16  ;;  %v1439_v39 = vadd.f32 1.4214138, %v1435_v62  ;;  %v1397_v16 = vmul.f32 0.5, %v3569_v22  ;;  %v1400_v22 = vmul.f32 0.5, %v3578_v29 }
 0xbcb   :  { %v1450_v37 = vmul.f32 %v2942_v20, %v1446_v41  ;;  %v1444_v3 = vmul.f32 %v2946_v45, %v1440_v11 }
 0xbcc   :  { %v1449_v23 = vmul.f32 %v2944_v48, %v1445_v42  ;;  %v1443_v40 = vmul.f32 %v2948_v59, %v1439_v39 }
 0xbcd   :  { %v1454_v50 = vadd.f32 0.2548296, %v1450_v37  ;;  %v1448_v36 = vadd.f32 -0.28449672, %v1444_v3  ;;  %v1399_v37 = vmul.f32 0.5, %v3581_v32 }
 0xbce   :  { %v1453_v35 = vadd.f32 0.2548296, %v1449_v23  ;;  %v1447_v61 = vadd.f32 -0.28449672, %v1443_v40 }
 0xbcf   :  { %v1458_v47 = vmul.f32 %v2942_v20, %v1454_v50  ;;  %v1452_v51 = vmul.f32 %v2946_v45, %v1448_v36 }
 0xbd0   :  { %v1457_v0 = vmul.f32 %v2944_v48, %v1453_v35  ;;  %v1451_v54 = vmul.f32 %v2948_v59, %v1447_v61 }
 0xbd1   :  { %v1478_v56 = vmul.f32 %v2950_v49, %v1458_v47  ;;  %v1456_v57 = vadd.f32 0.2548296, %v1452_v51 }
 0xbd2   :  { %v1477_v2 = vmul.f32 %v2952_v28, %v1457_v0  ;;  %v1455_v44 = vadd.f32 0.2548296, %v1451_v54 }
 0xbd3   :  { %v1482_v5 = vsub.f32 1.0, %v1478_v56  ;;  %v1460_v15 = vmul.f32 %v2946_v45, %v1456_v57 }
 0xbd4   :  { %v1481_v8 = vsub.f32 1.0, %v1477_v2  ;;  %v1459_v9 = vmul.f32 %v2948_v59, %v1455_v44  ;;  %v1398_v59 = vmul.f32 0.5, %v3567_v21 }
 0xbd5   :  { %v1490_v17 = vsub.f32 0.0, %v1482_v5  ;;  %v1480_v18 = vmul.f32 %v2954_v7, %v1460_v15 }
 0xbd6   :  { %v1489_v20 = vsub.f32 0.0, %v1481_v8  ;;  %v1479_v19 = vmul.f32 %v2956_v12, %v1459_v9 }
 0xbd7   :  { %v1494_v46 = vsel %vm1486_vm1, %v1482_v5, %v1490_v17  ;;  %v1484_v48 = vsub.f32 1.0, %v1480_v18 }
 0xbd8   :  { %v1498_v6 = vadd.f32 1.0, %v1494_v46  ;;  %v1493_v27 = vsel %vm1485_vm3, %v1481_v8, %v1489_v20  ;;  %v1483_v30 = vsub.f32 1.0, %v1479_v19 }
 0xbd9   :  { %v1497_v45 = vadd.f32 1.0, %v1493_v27  ;;  %v1492_v62 = vsub.f32 0.0, %v1484_v48 }
 0xbda   :  { %v1491_v41 = vsub.f32 0.0, %v1483_v30  ;;  %v1502_v42 = vmul.f32 %v1498_v6, %v1398_v59 }
 0xbdb   :  { %v1501_v11 = vmul.f32 %v1497_v45, %v1397_v16  ;;  %v1496_v24 = vsel %vm1488_vm6, %v1484_v48, %v1492_v62 }
 0xbdc   :  { %v1500_v39 = vadd.f32 1.0, %v1496_v24  ;;  %v1495_v53 = vsel %vm1487_vm11, %v1483_v30, %v1491_v41 }
 0xbdd   :  { %v1499_v3 = vadd.f32 1.0, %v1495_v53  ;;  %2699 = vmatprep.mubr.msk.f32.mxu1 %vm456_vm8, %v1501_v11 }
 0xbde   :  { %2700 = vmatmul.mubr.msk.f32.vlgmr.msra.gmra.mrb[16].mxu1 %vm456_vm8, %v1502_v42  ;;  %v1504_v23 = vmul.f32 %v1500_v39, %v1400_v22 }
 0xbdf   :  { %v1503_v21 = vmul.f32 %v1499_v3, %v1399_v37 }
 0xbe1   :  { %2702 = vmatprep.mubr.msk.f32.mxu1 %vm456_vm8, %v1503_v21 }
 0xbe2   :  { %2703 = vmatmul.mubr.msk.f32.gmra.mrb[18].mxu1 %vm456_vm8, %v1504_v23 }
 0xcb1   :  { %v2701_v25 = vpop.f32.mrb[16].mxu1 }
 0xcb2   :  { %v1602_v40 = vadd.f32 %v2701_v25, %v1517_v33  ;;  %v1596_v50 = vpop.f32.mrb[17].mxu1 }
 0xcb3   :  { %v1597_v32 = vadd.f32 %v1596_v50, %v1517_v33 }
 0xcb4   :  { %v1620_v36 = vrot.slane %v1602_v40, 1  ;;  %v1638_v35 = vrot.slane %v1602_v40, 2  ;;  %v1656_v61 = vrot.slane %v1602_v40, 4 }
 0xcb5   :  { %v1619_v47 = vrot.slane %v1597_v32, 1  ;;  %v1637_v29 = vrot.slane %v1597_v32, 2  ;;  %v2704_v51 = vpop.f32.mrb[18].mxu1  ;;  %v1655_v49 = vrot.slane %v1597_v32, 4 }
 0xcb6   :  { %v1612_v0 = vadd.f32 %v2704_v51, %v1517_v33  ;;  %v1606_v54 = vpop.f32.mrb[19].mxu1 }
 0xcb7   :  { %v1607_v28 = vadd.f32 %v1606_v54, %v1517_v33  ;;  %v1631_v56 = vsel %vm558_vm12, %v1620_v36, %v1619_v47  ;;  %v1649_v57 = vsel %vm577_vm15, %v1638_v35, %v1637_v29  ;;  %v1667_v2 = vsel %vm596_vm2, %v1656_v61, %v1655_v49 }
 0xcb8   :  { %v1623_v44 = vrot.slane %v1612_v0, 1  ;;  %v1641_v5 = vrot.slane %v1612_v0, 2  ;;  %v1634_v15 = vsel %vm3226_vm5, %v1631_v56, %v1602_v40  ;;  %v1621_v7 = vsel %vm558_vm12, %v1619_v47, %v1620_v36 }
 0xcb9   :  { %v1622_v8 = vrot.slane %v1607_v28, 1  ;;  %v1640_v9 = vrot.slane %v1607_v28, 2  ;;  %v1652_v12 = vsel %vm3232_vm7, %v1649_v57, %v1634_v15  ;;  %v1633_v17 = vsel %vm3226_vm5, %v1621_v7, %v1597_v32 }
 0xcba   :  { %v1670_v18 = vsel %vm3238_vm9, %v1667_v2, %v1652_v12  ;;  %v1639_v20 = vsel %vm577_vm15, %v1637_v29, %v1638_v35  ;;  %v1657_v19 = vsel %vm596_vm2, %v1655_v49, %v1656_v61  ;;  %v1658_v46 = vrot.slane %v1607_v28, 4 }
 0xcbb   :  { %v1674_v48 = vsel %vm3246_vm10, %v1597_v32, %v1670_v18  ;;  %v1651_v6 = vsel %vm3232_vm7, %v1639_v20, %v1633_v17  ;;  %v1632_v27 = vsel %vm558_vm12, %v1623_v44, %v1622_v8  ;;  %v1650_v30 = vsel %vm577_vm15, %v1641_v5, %v1640_v9 }
 0xcbc   :  { %v1678_v16 = vadd.f32 %v1674_v48, %v3489_v26  ;;  %v1669_v45 = vsel %vm3238_vm9, %v1657_v19, %v1651_v6  ;;  %v1636_v62 = vsel %vm3226_vm5, %v1632_v27, %v1612_v0  ;;  %v1659_v59 = vrot.slane %v1612_v0, 4 }
 0xcbd   :  { %v1673_v41 = vsel %vm3246_vm10, %v1602_v40, %v1669_v45  ;;  %v1654_v11 = vsel %vm3232_vm7, %v1650_v30, %v1636_v62  ;;  %v1624_v24 = vsel %vm558_vm12, %v1622_v8, %v1623_v44  ;;  %v1642_v42 = vsel %vm577_vm15, %v1640_v9, %v1641_v5 }
 0xcbe   :  { %v1684_v39 = vsel %vm160_vm4, %v1678_v16, 0.0  ;;  %v1677_v26 = vadd.f32 %v1673_v41, %v3493_v55  ;;  %v1668_v53 = vsel %vm596_vm2, %v1659_v59, %v1658_v46  ;;  %v1635_v37 = vsel %vm3226_vm5, %v1624_v24, %v1607_v28 }
 0xcbf   :  { %1685 = vadd.xlane.f32.xlu1 %v1684_v39  ;;  %v1672_v3 = vsel %vm3238_vm9, %v1668_v53, %v1654_v11  ;;  %v1653_v22 = vsel %vm3232_vm7, %v1642_v42, %v1635_v37  ;;  %v1660_v21 = vsel %vm596_vm2, %v1658_v46, %v1659_v59  ;;  %v1736_v62 = vrot.slane %v3531_v38, %v3304_v14 }
 0xcc0   :  { %v1681_v23 = vsel %vm160_vm4, %v1677_v26, 0.0  ;;  %v1676_v33 = vsel %vm3246_vm10, %v1607_v28, %v1672_v3  ;;  %v1671_v55 = vsel %vm3238_vm9, %v1660_v21, %v1653_v22  ;;  %v1744_v11 = vrot.slane %v3531_v38, %v3307_v31 }
 0xcc1   :  { %1682 = vadd.xlane.f32.xlu0 %v1681_v23  ;;  %v1680_v25 = vadd.f32 %v1676_v33, %v3497_v43  ;;  %v1675_v40 = vsel %vm3246_vm10, %v1612_v0, %v1671_v55 }
 0xcc2   :  { %v1679_v50 = vadd.f32 %v1675_v40, %v3499_v10 }
 0xcc3   :  { %v1690_v32 = vsel %vm160_vm4, %v1680_v25, 0.0 }
 0xcc4   :  { %1691 = vadd.xlane.f32.xlu1 %v1690_v32  ;;  %v1687_v36 = vsel %vm160_vm4, %v1679_v50, 0.0 }
 0xcc5   :  { %1688 = vadd.xlane.f32.xlu0 %v1687_v36 }
 0xd4c   :  { %v1686_v35 = vpop.xlane.xlu1 %1685 }
 0xd4d   :  { %v1694_v61 = vmul.f32 0.025, %v1686_v35 }
 0xd4e   :  { %v1683_v47 = vpop.xlane.xlu0 %1682 }
 0xd4f   :  { %v1698_v29 = vsub.f32 %v1678_v16, %v1694_v61  ;;  %v1693_v51 = vmul.f32 0.025, %v1683_v47 }
 0xd51   :  { %v1697_v49 = vsub.f32 %v1677_v26, %v1693_v51  ;;  %v1692_v54 = vpop.xlane.xlu1 %1691  ;;  %v1702_v28 = vmul.f32 %v1698_v29, %v1698_v29 }
 0xd52   :  { %v1696_v43 = vmul.f32 0.025, %v1692_v54  ;;  %v1689_v56 = vpop.xlane.xlu0 %1688 }
 0xd53   :  { %v1695_v57 = vmul.f32 0.025, %v1689_v56  ;;  %v1708_v0 = vsel %vm160_vm4, %v1702_v28, 0.0  ;;  %v1701_v10 = vmul.f32 %v1697_v49, %v1697_v49 }
 0xd54   :  { %v1700_v2 = vsub.f32 %v1680_v25, %v1696_v43  ;;  %1709 = vadd.xlane.f32.xlu1 %v1708_v0 }
 0xd55   :  { %v1699_v44 = vsub.f32 %v1679_v50, %v1695_v57  ;;  %v1705_v5 = vsel %vm160_vm4, %v1701_v10, 0.0 }
 0xd56   :  { %1706 = vadd.xlane.f32.xlu0 %v1705_v5  ;;  %v1704_v15 = vmul.f32 %v1700_v2, %v1700_v2 }
 0xd57   :  { %v1703_v7 = vmul.f32 %v1699_v44, %v1699_v44 }
 0xd58   :  { %v1714_v8 = vsel %vm160_vm4, %v1704_v15, 0.0 }
 0xd59   :  { %1715 = vadd.xlane.f32.xlu1 %v1714_v8  ;;  %v1711_v9 = vsel %vm160_vm4, %v1703_v7, 0.0 }
 0xd5a   :  { %1712 = vadd.xlane.f32.xlu0 %v1711_v9 }
 0xde1   :  { %v1710_v12 = vpop.xlane.xlu1 %1709 }
 0xde2   :  { %v1718_v17 = vmul.f32 0.025, %v1710_v12  ;;  %v2462_v12 = vld [vmem:[%s3879_s3 + $0x78] sm:$0xff] }
 0xde3   :  { %v1707_v18 = vpop.xlane.xlu0 %1706 }
 0xde4   :  { %v1722_v20 = vadd.f32 1e-05, %v1718_v17  ;;  %v1717_v19 = vmul.f32 0.025, %v1707_v18  ;;  %v2463_v17 = vld [vmem:[%s3879_s3 + $0x80] sm:$0xff] }
 0xde5   :  { %v2834_v18 = vpack.c.bf16 %v2463_v17, %v2462_v12 }
 0xde6   :  { %2957 = vrsqrt.f32 %v1722_v20  ;;  %v1721_v46 = vadd.f32 1e-05, %v1717_v19  ;;  %v1716_v48 = vpop.xlane.xlu1 %1715  ;;  %v2464_v20 = vld [vmem:[%s3879_s3 + $0x88] sm:$0xff]  ;;  %v2465_v19 = vld [vmem:[%s3879_s3 + $0x90] sm:$0xff] }
 0xde7   :  { %v1720_v6 = vmul.f32 0.025, %v1716_v48  ;;  %v1713_v27 = vpop.xlane.xlu0 %1712  ;;  %2835 = vmatprep.subr.bf16.mxu0 %v2834_v18  ;;  %v2466_v48 = vld [vmem:[%s3879_s3 + $0x98] sm:$0xff] }
 0xde8   :  { %2959 = vrsqrt.f32 %v1721_v46  ;;  %v1719_v30 = vmul.f32 0.025, %v1713_v27  ;;  %2837 = vmatpush3.bf16.msra.mxu0 %v2834_v18  ;;  %v2838_v46 = vpack.c.bf16 %v2465_v19, %v2464_v20 }
 0xde9   :  { %v1724_v16 = vadd.f32 1e-05, %v1720_v6 }
 0xdea   :  { %v1723_v45 = vadd.f32 1e-05, %v1719_v30  ;;  %2839 = vmatprep.subr.bf16.mxu0 %v2838_v46 }
 0xdeb   :  { %2961 = vrsqrt.f32 %v1724_v16 }
 0xdec   :  { %2963 = vrsqrt.f32 %v1723_v45  ;;  %2841 = vmatpush3.bf16.msra.mxu0 %v2838_v46 }
 0xded   :  { %2713 = vmatprep.subr.mxu0 %v2466_v48 }
 0xdf0   :  { %v2958_v59 = vpop.eup %2957  ;;  %2714 = vmatpush3.msra.mxu0 %v2466_v48 }
 0xdf1   :  { %v1730_v41 = vmul.f32 %v2958_v59, %v1698_v29 }
 0xdf2   :  { %v2960_v24 = vpop.eup %2959 }
 0xdf3   :  { %v1738_v42 = vmul.f32 %v1736_v62, %v1730_v41  ;;  %v1729_v39 = vmul.f32 %v2960_v24, %v1697_v49 }
 0xdf5   :  { %v2962_v26 = vpop.eup %2961  ;;  %v3665_v53 = vadd.f32 %v1744_v11, %v1738_v42  ;;  %v1737_v37 = vmul.f32 %v1736_v62, %v1729_v39 }
 0xdf6   :  { %v2964_v3 = vpop.eup %2963  ;;  %v1732_v22 = vmul.f32 %v2962_v26, %v1700_v2  ;;  %v3707_v26 = vld [vmem:[%s3881_s5 + $0x18] sm:$0xff]  ;;  %s2395_s5 = sshll.u32 %s3025_s13, 4  ;;  %s2396_s5 = int_to_ptr.vmem [resolvable:$true] %s2395_s5 }
 0xdf7   :  { %v1754_v21 = vsel %vm160_vm4, %v3665_v53, 0.0  ;;  %v3669_v23 = vadd.f32 %v1744_v11, %v1737_v37  ;;  %v1731_v33 = vmul.f32 %v2964_v3, %v1699_v44  ;;  %v1806_v37 = vrot.slane %v3707_v26, %v3135_v60  ;;  %s2997_s14 = scalar_lea.vmem %s2396_s5, 32  ;;  %p3002_p1 = scmp.lt.s32.totalorder %s2396_s5, %s2396_s5 }
 0xdf8   :  { %1755 = vadd.xlane.f32.xlu1 %v1754_v21  ;;  %v1740_v55 = vmul.f32 %v1736_v62, %v1732_v22  ;;  %p2998_p0 = scmp.ne.s32.totalorder %s2396_s5, %s2997_s14  ;;  %p3003_p2 = scmp.lt.s32.totalorder %s2997_s14, %s2997_s14 }
 0xdf9   :  { %v1751_v38 = vsel %vm160_vm4, %v3669_v23, 0.0  ;;  %v1739_v25 = vmul.f32 %v1736_v62, %v1731_v33  ;;  %v1814_v33 = vrot.slane %v3707_v26, %v3143_v63  ;;  %v2471_v63 = vld [vmem:[%s3880_s4 + $0xc0] sm:$0xff] }
 0xdfa   :  { %1752 = vadd.xlane.f32.xlu0 %v1751_v38  ;;  %v3673_v40 = vadd.f32 %v1744_v11, %v1740_v55  ;;  %p3004_p3 = por %p3003_p2, %p3002_p1 }
 0xdfb   :  { %v3675_v50 = vadd.f32 %v1744_v11, %v1739_v25 }
 0xdfc   :  { %v1760_v32 = vsel %vm160_vm4, %v3673_v40, 0.0  ;;  %p3005_p4 = pnand %p3004_p3, %p2998_p0 }
 0xdfd   :  { %1761 = vadd.xlane.f32.xlu1 %v1760_v32  ;;  %v1757_v36 = vsel %vm160_vm4, %v3675_v50, 0.0 }
 0xdfe   :  { %1758 = vadd.xlane.f32.xlu0 %v1757_v36 }
 0xe85   :  { %v1756_v35 = vpop.xlane.xlu1 %1755 }
 0xe86   :  { %v1764_v61 = vmul.f32 0.025, %v1756_v35 }
 0xe87   :  { %v1753_v47 = vpop.xlane.xlu0 %1752 }
 0xe88   :  { %v1768_v29 = vsub.f32 %v3665_v53, %v1764_v61  ;;  %v1763_v51 = vmul.f32 0.025, %v1753_v47 }
 0xe8a   :  { %v1767_v49 = vsub.f32 %v3669_v23, %v1763_v51  ;;  %v1762_v54 = vpop.xlane.xlu1 %1761  ;;  %v1772_v28 = vmul.f32 %v1768_v29, %v1768_v29 }
 0xe8b   :  { %v1766_v43 = vmul.f32 0.025, %v1762_v54  ;;  %v1759_v56 = vpop.xlane.xlu0 %1758 }
 0xe8c   :  { %v1765_v57 = vmul.f32 0.025, %v1759_v56  ;;  %v1778_v0 = vsel %vm160_vm4, %v1772_v28, 0.0  ;;  %v1771_v10 = vmul.f32 %v1767_v49, %v1767_v49  ;;  %v2473_v56 = vld [vmem:[%s3880_s4 + $0xd0] sm:$0xff] }
 0xe8d   :  { %v1770_v2 = vsub.f32 %v3673_v40, %v1766_v43  ;;  %1779 = vadd.xlane.f32.xlu1 %v1778_v0 }
 0xe8e   :  { %v1769_v44 = vsub.f32 %v3675_v50, %v1765_v57  ;;  %v1775_v5 = vsel %vm160_vm4, %v1771_v10, 0.0  ;;  %v2474_v57 = vld [vmem:[%s3880_s4 + $0xd8] sm:$0xff]  ;;  %v2475_v10 = vld [vmem:[%s3880_s4 + $0xe0] sm:$0xff] }
 0xe8f   :  { %1776 = vadd.xlane.f32.xlu0 %v1775_v5  ;;  %v1774_v15 = vmul.f32 %v1770_v2, %v1770_v2  ;;  %v2846_v0 = vpack.c.bf16 %v2474_v57, %v2473_v56  ;;  %v2477_v5 = vld [vmem:[%s3880_s4 + $0xf0] sm:$0xff] }
 0xe90   :  { %v1773_v7 = vmul.f32 %v1769_v44, %v1769_v44 }
 0xe91   :  { %v1784_v8 = vsel %vm160_vm4, %v1774_v15, 0.0  ;;  %v2478_v15 = vld [vmem:[%s3880_s4 + $0xf8] sm:$0xff] }
 0xe92   :  { %1785 = vadd.xlane.f32.xlu1 %v1784_v8  ;;  %v1781_v9 = vsel %vm160_vm4, %v1773_v7, 0.0  ;;  %v2854_v7 = vpack.c.bf16 %v2478_v15, %v2477_v5  ;;  %v1828_v8 = vrot.slane %v3707_v26, %v3178_v34 }
 0xe93   :  { %1782 = vadd.xlane.f32.xlu0 %v1781_v9 }
 0xf1a   :  { %v1780_v6 = vpop.xlane.xlu1 %1779 }
 0xf1b   :  { %v1788_v27 = vmul.f32 0.025, %v1780_v6 }
 0xf1c   :  { %v1777_v30 = vpop.xlane.xlu0 %1776 }
 0xf1d   :  { %v1792_v16 = vadd.f32 1e-05, %v1788_v27  ;;  %v1787_v45 = vmul.f32 0.025, %v1777_v30 }
 0xf1f   :  { %2965 = vrsqrt.f32 %v1792_v16  ;;  %v1791_v62 = vadd.f32 1e-05, %v1787_v45  ;;  %v1786_v59 = vpop.xlane.xlu1 %1785 }
 0xf20   :  { %v1790_v41 = vmul.f32 0.025, %v1786_v59  ;;  %v1783_v11 = vpop.xlane.xlu0 %1782 }
 0xf21   :  { %2967 = vrsqrt.f32 %v1791_v62  ;;  %v1789_v24 = vmul.f32 0.025, %v1783_v11 }
 0xf22   :  { %v1794_v42 = vadd.f32 1e-05, %v1790_v41 }
 0xf23   :  { %v1793_v39 = vadd.f32 1e-05, %v1789_v24 }
 0xf24   :  { %2969 = vrsqrt.f32 %v1794_v42 }
 0xf25   :  { %2971 = vrsqrt.f32 %v1793_v39 }
 0xf29   :  { %v2966_v3 = vpop.eup %2965 }
 0xf2a   :  { %v1800_v22 = vmul.f32 %v2966_v3, %v1768_v29 }
 0xf2b   :  { %v2968_v21 = vpop.eup %2967 }
 0xf2c   :  { %v1808_v55 = vmul.f32 %v1806_v37, %v1800_v22  ;;  %v1799_v38 = vmul.f32 %v2968_v21, %v1767_v49  ;;  %v2472_v49 = vld [vmem:[%s3880_s4 + $0xc8] sm:$0xff] }
 0xf2d   :  { %v2842_v43 = vpack.c.bf16 %v2472_v49, %v2471_v63 }
 0xf2e   :  { %v2970_v25 = vpop.eup %2969  ;;  %v1807_v32 = vmul.f32 %v1806_v37, %v1799_v38  ;;  %v1816_v35 = vadd.f32 %v1814_v33, %v1808_v55 }
 0xf2f   :  { %v2972_v36 = vpop.eup %2971  ;;  %v1802_v61 = vmul.f32 %v2970_v25, %v1770_v2  ;;  %2843 = vmatprep.subr.bf16.mxu0 %v2842_v43  ;;  %v2476_v2 = vld [vmem:[%s3880_s4 + $0xe8] sm:$0xff] }
 0xf30   :  { %v1815_v47 = vadd.f32 %v1814_v33, %v1807_v32  ;;  %v1801_v51 = vmul.f32 %v2972_v36, %v1769_v44  ;;  %v2850_v44 = vpack.c.bf16 %v2476_v2, %v2475_v10 }
 0xf31   :  { %v1810_v54 = vmul.f32 %v1806_v37, %v1802_v61 }
 0xf32   :  { %2715 = vmatprep.mubr.msk.f32.mxu0 %vm160_vm4, %v1815_v47  ;;  %v1809_v28 = vmul.f32 %v1806_v37, %v1801_v51 }
 0xf33   :  { %2716 = vmatmul.mubr.msk.f32.vlgmr.msra.gmra.mrb[8].mxu0 %vm160_vm4, %v1816_v35  ;;  %v1818_v60 = vadd.f32 %v1814_v33, %v1810_v54 }
 0xf34   :  { %v1817_v29 = vadd.f32 %v1814_v33, %v1809_v28  ;;  %2845 = vmatpush3.bf16.msra.mxu0 %v2842_v43 }
 0xf35   :  { %2847 = vmatprep.subr.bf16.mxu0 %v2846_v0 }
 0xf36   :  { %2718 = vmatprep.mubr.msk.f32.mxu0 %vm160_vm4, %v1817_v29 }
 0xf37   :  { %2719 = vmatmul.mubr.msk.f32.gmra.mrb[10].mxu0 %vm160_vm4, %v1818_v60 }
 0xf38   :  { %2849 = vmatpush3.bf16.msra.mxu0 %v2846_v0 }
 0xf39   :  { %2851 = vmatprep.subr.bf16.mxu0 %v2850_v44 }
 0xf3c   :  { %2853 = vmatpush3.bf16.msra.mxu0 %v2850_v44 }
 0xf3d   :  { %2855 = vmatprep.subr.bf16.mxu0 %v2854_v7 }
 0xf40   :  { %2857 = vmatpush3.bf16.msra.mxu0 %v2854_v7 }
0x1006   :  { %v2717_v9 = vpop.f32.mrb[8].mxu0 }
0x1007   :  { %v3743_v12 = vadd.f32 %v2717_v9, %v1828_v8  ;;  %v1907_v17 = vpop.f32.mrb[9].mxu0 }
0x1008   :  { %v3745_v18 = vadd.f32 %v1907_v17, %v1828_v8 }
0x1009   :  { %v3748_v20 = vmul.f32 0.70710677, %v3743_v12 }
0x100a   :  { %v3751_v19 = vmul.f32 0.70710677, %v3745_v18  ;;  %v2720_v46 = vpop.f32.mrb[10].mxu0 }
0x100b   :  { %v1935_v48 = vand.u32 2147483647, %v3748_v20  ;;  %v3754_v6 = vadd.f32 %v2720_v46, %v1828_v8  ;;  %v1917_v27 = vpop.f32.mrb[11].mxu0  ;;  %vm2015_vm13 = vcmp.ge.f32.partialorder %v3748_v20, 0.0 }
0x100c   :  { %v1934_v34 = vand.u32 2147483647, %v3751_v19  ;;  %v3757_v30 = vadd.f32 %v1917_v27, %v1828_v8  ;;  %vm2014_vm14 = vcmp.ge.f32.partialorder %v3751_v19, 0.0 }
0x100d   :  { %v1939_v16 = vmul.f32 0.3275911, %v1935_v48  ;;  %v3760_v45 = vmul.f32 0.70710677, %v3754_v6  ;;  %v1991_v21 = vsub.f32 0.0, %v1935_v48 }
0x100e   :  { %v1938_v62 = vmul.f32 0.3275911, %v1934_v34  ;;  %v3763_v59 = vmul.f32 0.70710677, %v3757_v30  ;;  %v1990_v33 = vsub.f32 0.0, %v1934_v34 }
0x100f   :  { %v1943_v41 = vadd.f32 1.0, %v1939_v16  ;;  %v1937_v11 = vand.u32 2147483647, %v3760_v45  ;;  %v1995_v38 = vmul.f32 %v1991_v21, %v1935_v48  ;;  %vm2017_vm0 = vcmp.ge.f32.partialorder %v3760_v45, 0.0 }
0x1010   :  { %v1942_v24 = vadd.f32 1.0, %v1938_v62  ;;  %v1936_v42 = vand.u32 2147483647, %v3763_v59  ;;  %v1994_v35 = vmul.f32 %v1990_v33, %v1934_v34  ;;  %vm2016_vm1 = vcmp.ge.f32.partialorder %v3763_v59, 0.0 }
0x1011   :  { %2973 = vrcp.f32 %v1943_v41  ;;  %v1941_v39 = vmul.f32 0.3275911, %v1937_v11  ;;  %v1993_v25 = vsub.f32 0.0, %v1937_v11  ;;  %v2000_v28 = vmul.f32 1.442695, %v1995_v38 }
0x1012   :  { %2975 = vrcp.f32 %v1942_v24  ;;  %v1940_v37 = vmul.f32 0.3275911, %v1936_v42  ;;  %v1992_v61 = vsub.f32 0.0, %v1936_v42  ;;  %v1998_v43 = vmul.f32 1.442695, %v1994_v35 }
0x1013   :  { %v1945_v3 = vadd.f32 1.0, %v1941_v39  ;;  %v1997_v29 = vmul.f32 %v1993_v25, %v1937_v11  ;;  %v2046_v45 = vrot.slane %v3707_v26, %v3219_v52 }
0x1014   :  { %v1944_v22 = vadd.f32 1.0, %v1940_v37  ;;  %v1996_v57 = vmul.f32 %v1992_v61, %v1936_v42 }
0x1015   :  { %2977 = vrcp.f32 %v1945_v3  ;;  %v2004_v15 = vmul.f32 1.442695, %v1997_v29 }
0x1016   :  { %2979 = vrcp.f32 %v1944_v22  ;;  %v2002_v17 = vmul.f32 1.442695, %v1996_v57 }
0x1017   :  { %2981 = vpow2.f32 %v2000_v28 }
0x1018   :  { %2983 = vpow2.f32 %v1998_v43 }
0x1019   :  { %2985 = vpow2.f32 %v2004_v15 }
0x101a   :  { %2987 = vpow2.f32 %v2002_v17 }
0x101b   :  { %v2974_v55 = vpop.eup %2973 }
0x101c   :  { %v2976_v32 = vpop.eup %2975  ;;  %v1955_v36 = vmul.f32 1.0614054, %v2974_v55 }
0x101d   :  { %v1954_v47 = vmul.f32 1.0614054, %v2976_v32 }
0x101e   :  { %v1959_v51 = vadd.f32 -1.4531521, %v1955_v36 }
0x101f   :  { %v2978_v54 = vpop.eup %2977  ;;  %v1958_v60 = vadd.f32 -1.4531521, %v1954_v47 }
0x1020   :  { %v2980_v63 = vpop.eup %2979  ;;  %v1963_v49 = vmul.f32 %v2974_v55, %v1959_v51  ;;  %v1957_v56 = vmul.f32 1.0614054, %v2978_v54 }
0x1021   :  { %v1962_v0 = vmul.f32 %v2976_v32, %v1958_v60  ;;  %v1956_v10 = vmul.f32 1.0614054, %v2980_v63  ;;  %v2982_v38 = vpop.eup %2981 }
0x1022   :  { %v1967_v2 = vadd.f32 1.4214138, %v1963_v49  ;;  %v1961_v44 = vadd.f32 -1.4531521, %v1957_v56  ;;  %v2984_v35 = vpop.eup %2983 }
0x1023   :  { %v1966_v5 = vadd.f32 1.4214138, %v1962_v0  ;;  %v1960_v7 = vadd.f32 -1.4531521, %v1956_v10  ;;  %v2986_v49 = vpop.eup %2985 }
0x1024   :  { %v1971_v8 = vmul.f32 %v2974_v55, %v1967_v2  ;;  %v1965_v9 = vmul.f32 %v2978_v54, %v1961_v44  ;;  %v2988_v57 = vpop.eup %2987 }
0x1025   :  { %v1970_v46 = vmul.f32 %v2976_v32, %v1966_v5  ;;  %v1964_v48 = vmul.f32 %v2980_v63, %v1960_v7 }
0x1026   :  { %v1975_v27 = vadd.f32 -0.28449672, %v1971_v8  ;;  %v1969_v34 = vadd.f32 1.4214138, %v1965_v9  ;;  %v1926_v8 = vmul.f32 0.5, %v3745_v18  ;;  %v1929_v18 = vmul.f32 0.5, %v3754_v6 }
0x1027   :  { %v1974_v16 = vadd.f32 -0.28449672, %v1970_v46  ;;  %v1968_v62 = vadd.f32 1.4214138, %v1964_v48 }
0x1028   :  { %v1979_v41 = vmul.f32 %v2974_v55, %v1975_v27  ;;  %v1973_v11 = vmul.f32 %v2978_v54, %v1969_v34  ;;  %v1928_v34 = vmul.f32 0.5, %v3757_v30 }
0x1029   :  { %v1978_v24 = vmul.f32 %v2976_v32, %v1974_v16  ;;  %v1972_v42 = vmul.f32 %v2980_v63, %v1968_v62 }
0x102a   :  { %v1983_v39 = vadd.f32 0.2548296, %v1979_v41  ;;  %v1977_v37 = vadd.f32 -0.28449672, %v1973_v11 }
0x102b   :  { %v1982_v3 = vadd.f32 0.2548296, %v1978_v24  ;;  %v1976_v22 = vadd.f32 -0.28449672, %v1972_v42 }
0x102c   :  { %v1987_v21 = vmul.f32 %v2974_v55, %v1983_v39  ;;  %v1981_v33 = vmul.f32 %v2978_v54, %v1977_v37 }
0x102d   :  { %v1986_v25 = vmul.f32 %v2976_v32, %v1982_v3  ;;  %v1980_v36 = vmul.f32 %v2980_v63, %v1976_v22 }
0x102e   :  { %v2007_v61 = vmul.f32 %v2982_v38, %v1987_v21  ;;  %v1985_v47 = vadd.f32 0.2548296, %v1981_v33 }
0x102f   :  { %v2006_v51 = vmul.f32 %v2984_v35, %v1986_v25  ;;  %v1984_v28 = vadd.f32 0.2548296, %v1980_v36 }
0x1030   :  { %v2011_v60 = vsub.f32 1.0, %v2007_v61  ;;  %v1989_v29 = vmul.f32 %v2978_v54, %v1985_v47 }
0x1031   :  { %v2010_v43 = vsub.f32 1.0, %v2006_v51  ;;  %v1988_v56 = vmul.f32 %v2980_v63, %v1984_v28  ;;  %v1927_v63 = vmul.f32 0.5, %v3743_v12 }
0x1032   :  { %v2019_v0 = vsub.f32 0.0, %v2011_v60  ;;  %v2009_v10 = vmul.f32 %v2986_v49, %v1989_v29 }
0x1033   :  { %v2018_v55 = vsub.f32 0.0, %v2010_v43  ;;  %v2008_v2 = vmul.f32 %v2988_v57, %v1988_v56 }
0x1034   :  { %v2023_v44 = vsel %vm2015_vm13, %v2011_v60, %v2019_v0  ;;  %v2013_v32 = vsub.f32 1.0, %v2009_v10 }
0x1035   :  { %v2027_v5 = vadd.f32 1.0, %v2023_v44  ;;  %v2022_v15 = vsel %vm2014_vm14, %v2010_v43, %v2018_v55  ;;  %v2012_v7 = vsub.f32 1.0, %v2008_v2 }
0x1036   :  { %v2026_v54 = vadd.f32 1.0, %v2022_v15  ;;  %v2021_v9 = vsub.f32 0.0, %v2013_v32 }
0x1037   :  { %v2020_v17 = vsub.f32 0.0, %v2012_v7  ;;  %v2031_v48 = vmul.f32 %v2027_v5, %v1927_v63 }
0x1038   :  { %v2030_v46 = vmul.f32 %v2026_v54, %v1926_v8  ;;  %v2025_v20 = vsel %vm2017_vm0, %v2013_v32, %v2021_v9 }
0x1039   :  { %v2029_v27 = vadd.f32 1.0, %v2025_v20  ;;  %v2024_v19 = vsel %vm2016_vm1, %v2012_v7, %v2020_v17 }
0x103a   :  { %v2028_v16 = vadd.f32 1.0, %v2024_v19  ;;  %2737 = vmatprep.mubr.msk.f32.mxu0 %vm456_vm8, %v2030_v46 }
0x103b   :  { %2738 = vmatmul.mubr.msk.f32.vlgmr.msra.gmra.mrb[12].mxu0 %vm456_vm8, %v2031_v48  ;;  %v2033_v62 = vmul.f32 %v2029_v27, %v1929_v18 }
0x103c   :  { %v2032_v12 = vmul.f32 %v2028_v16, %v1928_v34 }
0x103e   :  { %2740 = vmatprep.mubr.msk.f32.mxu0 %vm456_vm8, %v2032_v12 }
0x103f   :  { %2741 = vmatmul.mubr.msk.f32.gmra.mrb[14].mxu0 %vm456_vm8, %v2033_v62  ;;  %vm3023_vm8 = vmmov 0  }
0x110e   :  { %v2739_v59 = vpop.f32.mrb[12].mxu0 }
0x110f   :  { %v2131_v41 = vadd.f32 %v2739_v59, %v2046_v45  ;;  %v2125_v11 = vpop.f32.mrb[13].mxu0 }
0x1110   :  { %v2126_v30 = vadd.f32 %v2125_v11, %v2046_v45 }
0x1111   :  { %v2149_v24 = vrot.slane %v2131_v41, 1  ;;  %v2167_v42 = vrot.slane %v2131_v41, 2  ;;  %v2185_v39 = vrot.slane %v2131_v41, 4 }
0x1112   :  { %v2148_v37 = vrot.slane %v2126_v30, 1  ;;  %v2166_v6 = vrot.slane %v2126_v30, 2  ;;  %v2742_v3 = vpop.f32.mrb[14].mxu0  ;;  %v2184_v22 = vrot.slane %v2126_v30, 4 }
0x1113   :  { %v2141_v21 = vadd.f32 %v2742_v3, %v2046_v45  ;;  %v2135_v33 = vpop.f32.mrb[15].mxu0 }
0x1114   :  { %v2136_v38 = vadd.f32 %v2135_v33, %v2046_v45  ;;  %v2160_v25 = vsel %vm558_vm12, %v2149_v24, %v2148_v37  ;;  %v2178_v36 = vsel %vm577_vm15, %v2167_v42, %v2166_v6  ;;  %v2196_v52 = vsel %vm596_vm2, %v2185_v39, %v2184_v22 }
0x1115   :  { %v2152_v35 = vrot.slane %v2141_v21, 1  ;;  %v2170_v61 = vrot.slane %v2141_v21, 2  ;;  %v2163_v47 = vsel %vm3226_vm5, %v2160_v25, %v2131_v41  ;;  %v2150_v51 = vsel %vm558_vm12, %v2148_v37, %v2149_v24 }
0x1116   :  { %v2151_v28 = vrot.slane %v2136_v38, 1  ;;  %v2169_v60 = vrot.slane %v2136_v38, 2  ;;  %v2181_v29 = vsel %vm3232_vm7, %v2178_v36, %v2163_v47  ;;  %v2162_v49 = vsel %vm3226_vm5, %v2150_v51, %v2126_v30  ;;  %v2299_v36 = vld [vmem:[%s3882_s6] sm:$0xff]  ;;  %v2302_v51 = vld [vmem:[%s3882_s6 + $0x18] sm:$0xff] }
0x1117   :  { %v2199_v43 = vsel %vm3238_vm9, %v2196_v52, %v2181_v29  ;;  %v2168_v56 = vsel %vm577_vm15, %v2166_v6, %v2167_v42  ;;  %v2186_v57 = vsel %vm596_vm2, %v2184_v22, %v2185_v39  ;;  %v2187_v0 = vrot.slane %v2136_v38, 4  ;;  %v2300_v52 = vld [vmem:[%s3882_s6 + $0x8] sm:$0xff]  ;;  %v2303_v29 = vld [vmem:[%s3882_s6 + $0x20] sm:$0xff] }
0x1118   :  { %v2203_v10 = vsel %vm3246_vm10, %v2126_v30, %v2199_v43  ;;  %v2180_v55 = vsel %vm3232_vm7, %v2168_v56, %v2162_v49  ;;  %v2161_v2 = vsel %vm558_vm12, %v2152_v35, %v2151_v28  ;;  %v2179_v44 = vsel %vm577_vm15, %v2170_v61, %v2169_v60 }
0x1119   :  { %v2207_v32 = vadd.f32 %v2203_v10, %v3665_v53  ;;  %v2198_v5 = vsel %vm3238_vm9, %v2186_v57, %v2180_v55  ;;  %v2165_v15 = vsel %vm3226_vm5, %v2161_v2, %v2141_v21  ;;  %v2188_v7 = vrot.slane %v2141_v21, 4 }
0x111a   :  { %v2202_v8 = vsel %vm3246_vm10, %v2131_v41, %v2198_v5  ;;  %v2183_v54 = vsel %vm3232_vm7, %v2179_v44, %v2165_v15  ;;  %v2153_v9 = vsel %vm558_vm12, %v2151_v28, %v2152_v35  ;;  %v2171_v63 = vsel %vm577_vm15, %v2169_v60, %v2170_v61  ;;  %v2301_v35 = vld [vmem:[%s3882_s6 + $0x10] sm:$0xff] }
0x111b   :  { %v2213_v17 = vsel %vm160_vm4, %v2207_v32, 0.0  ;;  %v2206_v53 = vadd.f32 %v2202_v8, %v3669_v23  ;;  %v2197_v46 = vsel %vm596_vm2, %v2188_v7, %v2187_v0  ;;  %v2164_v20 = vsel %vm3226_vm5, %v2153_v9, %v2136_v38 }
0x111c   :  { %2214 = vadd.xlane.f32.xlu1 %v2213_v17  ;;  %v2201_v48 = vsel %vm3238_vm9, %v2197_v46, %v2183_v54  ;;  %v2182_v27 = vsel %vm3232_vm7, %v2171_v63, %v2164_v20  ;;  %v2189_v19 = vsel %vm596_vm2, %v2187_v0, %v2188_v7  ;;  %v3022_v61 = vmov 0.0|0.0  }
0x111d   :  { %v2210_v34 = vsel %vm160_vm4, %v2206_v53, 0.0  ;;  %v2205_v16 = vsel %vm3246_vm10, %v2136_v38, %v2201_v48  ;;  %v2200_v23 = vsel %vm3238_vm9, %v2189_v19, %v2182_v27  ;;  %2858 = vmatprep.subr.bf16.mxu1 %v3022_v61  ;;  %v2859_v47 = vpack.c.bf16 %v2300_v52, %v2299_v36 }
0x111e   :  { %2211 = vadd.xlane.f32.xlu0 %v2210_v34  ;;  %v2209_v58 = vadd.f32 %v2205_v16, %v3673_v40  ;;  %v2204_v18 = vsel %vm3246_vm10, %v2141_v21, %v2200_v23  ;;  %v3024_v28 = vmov 0.0   ;;  %v2862_v60 = vpack.c.bf16 %v2302_v51, %v2301_v35 }
0x111f   :  { %v2208_v12 = vadd.f32 %v2204_v18, %v3675_v50  ;;  %2753 = vmatprep.mubr.msk.f32.mxu1 %vm3023_vm8, %v3024_v28  ;;  %2860 = vmatpush3.bf16.msra.mxu1 %v2859_v47  ;;  %v2265_v7 = vrot.slane %v3707_v26, %v3304_v14  ;;  %v2273_v54 = vrot.slane %v3707_v26, %v3307_v31  ;;  %vm2313_vm12 = vcmask 1041409  }
0x1120   :  { %v2219_v1 = vsel %vm160_vm4, %v2209_v58, 0.0  ;;  %2861 = vmatprep.subr.bf16.mxu1 %v3022_v61  ;;  %vm2387_vm15 = vcmask 33792  }
0x1121   :  { %2220 = vadd.xlane.f32.xlu1 %v2219_v1  ;;  %v2216_v62 = vsel %vm160_vm4, %v2208_v12, 0.0 }
0x1122   :  { %2217 = vadd.xlane.f32.xlu0 %v2216_v62 }
0x1123   :  { %2863 = vmatpush3.bf16.msra.mxu1 %v2862_v60 }
0x1124   :  { %2751 = vmatprep.subr.mxu1 %v3024_v28 }
0x1127   :  { %2752 = vmatpush3.msra.mxu1 %v2303_v29 }
0x11a9   :  { %v2215_v45 = vpop.xlane.xlu1 %2214 }
0x11aa   :  { %v2223_v59 = vmul.f32 0.025, %v2215_v45 }
0x11ab   :  { %v2212_v41 = vpop.xlane.xlu0 %2211 }
0x11ac   :  { %v2227_v11 = vsub.f32 %v2207_v32, %v2223_v59  ;;  %v2222_v4 = vmul.f32 0.025, %v2212_v41 }
0x11ae   :  { %v2226_v30 = vsub.f32 %v2206_v53, %v2222_v4  ;;  %v2221_v24 = vpop.xlane.xlu1 %2220  ;;  %v2231_v42 = vmul.f32 %v2227_v11, %v2227_v11 }
0x11af   :  { %v2225_v40 = vmul.f32 0.025, %v2221_v24  ;;  %v2218_v39 = vpop.xlane.xlu0 %2217 }
0x11b0   :  { %v2224_v13 = vmul.f32 0.025, %v2218_v39  ;;  %v2237_v37 = vsel %vm160_vm4, %v2231_v42, 0.0  ;;  %v2230_v50 = vmul.f32 %v2226_v30, %v2226_v30 }
0x11b1   :  { %v2229_v6 = vsub.f32 %v2209_v58, %v2225_v40  ;;  %2238 = vadd.xlane.f32.xlu1 %v2237_v37 }
0x11b2   :  { %v2228_v3 = vsub.f32 %v2208_v12, %v2224_v13  ;;  %v2234_v22 = vsel %vm160_vm4, %v2230_v50, 0.0 }
0x11b3   :  { %2235 = vadd.xlane.f32.xlu0 %v2234_v22  ;;  %v2233_v21 = vmul.f32 %v2229_v6, %v2229_v6 }
0x11b4   :  { %v2232_v33 = vmul.f32 %v2228_v3, %v2228_v3 }
0x11b5   :  { %v2243_v38 = vsel %vm160_vm4, %v2233_v21, 0.0  ;;  %v2483_v21 = vld [vmem:[%s3883_s7] ss:$0 sm:$0xff] }
0x11b6   :  { %2244 = vadd.xlane.f32.xlu1 %v2243_v38  ;;  %v2240_v25 = vsel %vm160_vm4, %v2232_v33, 0.0 }
0x11b7   :  { %2241 = vadd.xlane.f32.xlu0 %v2240_v25 }
0x123e   :  { %v2239_v49 = vpop.xlane.xlu1 %2238 }
0x123f   :  { %v2247_v43 = vmul.f32 0.025, %v2239_v49 }
0x1240   :  { %v2236_v56 = vpop.xlane.xlu0 %2235 }
0x1241   :  { %v2251_v57 = vadd.f32 1e-05, %v2247_v43  ;;  %v2246_v0 = vmul.f32 0.025, %v2236_v56 }
0x1243   :  { %2989 = vrsqrt.f32 %v2251_v57  ;;  %v2250_v10 = vadd.f32 1e-05, %v2246_v0  ;;  %v2245_v55 = vpop.xlane.xlu1 %2244 }
0x1244   :  { %v2249_v2 = vmul.f32 0.025, %v2245_v55  ;;  %v2242_v44 = vpop.xlane.xlu0 %2241 }
0x1245   :  { %2991 = vrsqrt.f32 %v2250_v10  ;;  %v2248_v32 = vmul.f32 0.025, %v2242_v44 }
0x1246   :  { %v2253_v5 = vadd.f32 1e-05, %v2249_v2 }
0x1247   :  { %v2252_v15 = vadd.f32 1e-05, %v2248_v32 }
0x1248   :  { %2993 = vrsqrt.f32 %v2253_v5 }
0x1249   :  { %2995 = vrsqrt.f32 %v2252_v15 }
0x124d   :  { %v2990_v8 = vpop.eup %2989 }
0x124e   :  { %v2259_v9 = vmul.f32 %v2990_v8, %v2227_v11 }
0x124f   :  { %v2992_v63 = vpop.eup %2991 }
0x1250   :  { %v2267_v17 = vmul.f32 %v2265_v7, %v2259_v9  ;;  %v2258_v53 = vmul.f32 %v2992_v63, %v2226_v30 }
0x1252   :  { %v2994_v46 = vpop.eup %2993  ;;  %v2275_v20 = vadd.f32 %v2273_v54, %v2267_v17  ;;  %v2266_v48 = vmul.f32 %v2265_v7, %v2258_v53 }
0x1253   :  { %v2996_v27 = vpop.eup %2995  ;;  %v2261_v19 = vmul.f32 %v2994_v46, %v2229_v6 }
0x1254   :  { %v2279_v34 = vsel %vm160_vm4, %v2275_v20, 0.0  ;;  %v2274_v16 = vadd.f32 %v2273_v54, %v2266_v48  ;;  %v2260_v23 = vmul.f32 %v2996_v27, %v2228_v3 }
0x1255   :  { %v2269_v58 = vmul.f32 %v2265_v7, %v2261_v19 }
0x1256   :  { %v2278_v14 = vsel %vm160_vm4, %v2274_v16, 0.0  ;;  %v2268_v18 = vmul.f32 %v2265_v7, %v2260_v23 }
0x1257   :  { %v2277_v12 = vadd.f32 %v2273_v54, %v2269_v58  ;;  %v2280_v1 = vadd.f32 %v2279_v34, %v2278_v14 }
0x1258   :  { %v2276_v31 = vadd.f32 %v2273_v54, %v2268_v18 }
0x1259   :  { %v2288_v26 = vsel %vm160_vm4, %v2277_v12, 0.0  ;;  %v2281_v62 = vrot.slane %v2280_v1, 4 }
0x125a   :  { %v2287_v45 = vsel %vm160_vm4, %v2276_v31, 0.0 }
0x125b   :  { %v2289_v59 = vadd.f32 %v2288_v26, %v2287_v45  ;;  %v2282_v41 = vadd.f32 %v2281_v62, %v2280_v1 }
0x125d   :  { %v2283_v11 = vrot.slane %v2282_v41, 2  ;;  %v2290_v4 = vrot.slane %v2289_v59, 4 }
0x125f   :  { %v2284_v30 = vadd.f32 %v2283_v11, %v2282_v41  ;;  %v2291_v24 = vadd.f32 %v2290_v4, %v2289_v59 }
0x1261   :  { %v2285_v42 = vrot.slane %v2284_v30, 1  ;;  %v2292_v40 = vrot.slane %v2291_v24, 2 }
0x1263   :  { %v2293_v39 = vadd.f32 %v2292_v40, %v2291_v24  ;;  %v2286_v13 = vadd.f32 %v2285_v42, %v2284_v30 }
0x1265   :  { %v2294_v37 = vrot.slane %v2293_v39, 1  ;;  %v2297_v6 = vmul.f32 0.0625, %v2286_v13 }
0x1267   :  { %v2295_v50 = vadd.f32 %v2294_v37, %v2293_v39 }
0x1269   :  { %v2298_v3 = vmul.f32 0.0625, %v2295_v50 }
0x126b   :  { %v2314_v22 = vsel %vm2313_vm12, %v2298_v3, %v2297_v6 }
0x126c   :  { %2754 = vmatmul.mubr.msk.f32.vlgmr.msra.gmra.mrb[20].mxu1 %vm160_vm4, %v2314_v22 }
0x133f   :  { %v2383_v33 = vpop.f32.mrb[20].mxu1 }
0x1340   :  { %v2384_v38 = vadd.f32 %v2483_v21, %v2383_v33  ;;  %v2755_v25 = vpop.f32.mrb[21].mxu1 }
0x1342   :  { %2388 = vst.msk [vmem:[#allocation2] sm:$0x3] %vm2387_vm15, %v2384_v38 }
0x1343   :  { %3008 = shalt.err (!%p3005_p4)
}
0x1344   :  { %s3009_s16 = scalar_lea.hbm %s3884_s8, 32 }
0x1345   :  { %p3010_p5 = scmp.ne.s32.totalorder %s3884_s8, %s3009_s16  ;;  %p3013_p6 = scmp.lt.u32.totalorder %s3009_s16, %s3884_s8 }
0x1347   :  { %p3015_p7 = pnand %p3013_p6, %p3010_p5 }
0x1349   :  { %3018 = shalt.err (!%p3015_p7)
}
0x134a   :  { %2398 = dma.vmem_to_hbm [thread:$0]  %s2396_s5, 32, %s3884_s8, [#allocation3]  }
0x134b   :  { %3019 = dma.done.wait [#allocation3], 32  }
0x134c   :  { %3020 = vsyncadd [#allocation3], 4294967264 }
0x134d   :  { %2402 = vsyncpa [#allocation3], 1 }

</bundles_post_ra>
